<compile_context>
chip_gen: v7x
topology: tpu7x:2x2x1
jax: 0.10.0
libtpu: 0.0.40
codegen_flags: <defaults>
</compile_context>

<pallas_src>
import functools

import jax
import jax.numpy as jnp
from jax.experimental import pallas as pl
from jax.experimental.pallas import tpu as pltpu

LANE = 128       # feature-dim padding (lane width)
TILE_N = 256     # row / contraction tile (256 = v6e/v7x MXU cadence; v5e splits natively)
BN_EPS = 1e-5


def _round_up(x, m):
    return ((x + m - 1) // m) * m


def _vmem_limit(need_bytes):
    """Scoped-VMEM limit derived from actual need, capped below physical capacity
    so DMA double-buffering always has headroom (e.g. ~48 MiB cap on v7x)."""
    try:
        cap = int(pltpu.get_tpu_info().vmem_capacity_bytes)
    except Exception:
        cap = 64 << 20                      # conservative: v7x per-TensorCore VMEM
    hi = cap - (16 << 20)
    want = 2 * int(need_bytes) + (8 << 20)
    return int(max(24 << 20, min(max(want, 32 << 20), hi)))


# --------------------------------------------------------------------------- #
# Kernel 1: GIN aggregation + MLP (pre-BN) + masked per-tile BN statistics
# --------------------------------------------------------------------------- #
def gin_layer_kernel(scale_ref, shift_ref, ahat_ref, z_ref,
                     w1_ref, b1_ref, w2_ref, b2_ref,
                     h2_ref, stats_ref, acc_ref,
                     *, n_real, apply_pre, premultiplied):
    i = pl.program_id(0)          # row tile of A_hat / output
    k = pl.program_id(1)          # contraction (node) tile
    nk = pl.num_programs(1)

    @pl.when(k == 0)
    def _():
        acc_ref[...] = jnp.zeros_like(acc_ref)

    zb = z_ref[...]
    if apply_pre:
        # Previous layer's BatchNorm+ReLU folded into an affine; f32 on the VPU,
        # applied per contraction tile (no extra HBM pass over the intermediate).
        zb = jnp.maximum(zb.astype(jnp.float32) * scale_ref[...] + shift_ref[...], 0.0)
        zb = zb.astype(z_ref.dtype)

    # GIN (eps=0) aggregation: acc += A_hat[i-tile, k-tile] @ z[k-tile]  (f32 MXU acc)
    acc_ref[...] += jnp.dot(ahat_ref[...], zb, preferred_element_type=jnp.float32)

    @pl.when(k == nk - 1)
    def _():
        agg = acc_ref[...]
        if premultiplied:
            # z already carried W1 (reassociated in the wrapper): just bias + ReLU.
            h1 = jnp.maximum(agg + b1_ref[...], 0.0)
        else:
            h1 = jnp.maximum(
                jnp.dot(agg, w1_ref[...], preferred_element_type=jnp.float32)
                + b1_ref[...], 0.0)
        h2 = jnp.dot(h1, w2_ref[...], preferred_element_type=jnp.float32) + b2_ref[...]
        h2_ref[...] = h2.astype(h2_ref.dtype)

        # Masked per-tile BN statistics via the MXU (sum -> sublane 0, sumsq -> 1);
        # zero-padded rows never contribute, so train-mode stats match the
        # unpadded reference exactly.
        tm = h2.shape[0]
        node = i * tm + jax.lax.broadcasted_iota(jnp.int32, (8, tm), 1)
        sub = jax.lax.broadcasted_iota(jnp.int32, (8, tm), 0)
        mask = (node < n_real).astype(jnp.float32)
        red_sum = jnp.where(sub == 0, mask, 0.0)
        red_sq = jnp.where(sub == 1, mask, 0.0)
        stats_ref[0, :, :] = (
            jnp.dot(red_sum, h2, preferred_element_type=jnp.float32)
            + jnp.dot(red_sq, h2 * h2, preferred_element_type=jnp.float32))


def _gin_layer_call(ahat, z, w1, b1, w2, b2, scale, shift, *,
                    n_real, apply_pre, premultiplied, out_dtype):
    n_pad = ahat.shape[0]
    in_pad = z.shape[1]
    out_pad = w2.shape[1]
    t_rows = n_pad // TILE_N
    t_k = n_pad // TILE_N

    kernel = functools.partial(gin_layer_kernel, n_real=n_real,
                               apply_pre=apply_pre, premultiplied=premultiplied)

    def _full(arr):                              # full-array block, constant index
        nd = arr.ndim
        return pl.BlockSpec(arr.shape, lambda i, k, _n=nd: (0,) * _n)

    itemsize = jnp.dtype(ahat.dtype).itemsize
    need = (2 * (TILE_N * TILE_N + TILE_N * in_pad) * itemsize     # dbl-buffered tiles
            + (w1.size + w2.size + b1.size + b2.size + scale.size + shift.size) * 4
            + 2 * TILE_N * out_pad * jnp.dtype(out_dtype).itemsize
            + 2 * 8 * out_pad * 4
            + TILE_N * in_pad * 4)                                 # f32 accumulator

    grid_spec = pltpu.PrefetchScalarGridSpec(
        num_scalar_prefetch=0,
        grid=(t_rows, t_k),
        in_specs=[
            _full(scale), _full(shift),
            pl.BlockSpec((TILE_N, TILE_N), lambda i, k: (i, k)),   # A_hat row tile
            pl.BlockSpec((TILE_N, in_pad), lambda i, k: (k, 0)),   # z contraction tile
            _full(w1), _full(b1), _full(w2), _full(b2),
        ],
        out_specs=[
            pl.BlockSpec((TILE_N, out_pad), lambda i, k: (i, 0)),  # pre-BN h2 tile
            pl.BlockSpec((1, 8, out_pad), lambda i, k: (i, 0, 0)), # per-tile stats
        ],
        scratch_shapes=[pltpu.VMEM((TILE_N, in_pad), jnp.float32)],
    )
    return pl.pallas_call(
        kernel,
        grid_spec=grid_spec,
        out_shape=(jax.ShapeDtypeStruct((n_pad, out_pad), out_dtype),
                   jax.ShapeDtypeStruct((t_rows, 8, out_pad), jnp.float32)),
        compiler_params=pltpu.CompilerParams(
            dimension_semantics=("parallel", "arbitrary"),
            vmem_limit_bytes=_vmem_limit(need)),
    )(scale, shift, ahat, z, w1, b1, w2, b2)


# --------------------------------------------------------------------------- #
# Kernel 2: final BatchNorm (folded affine) + ReLU, row-parallel
# --------------------------------------------------------------------------- #
def bn_relu_kernel(h_ref, scale_ref, shift_ref, o_ref):
    o_ref[...] = jnp.maximum(
        h_ref[...].astype(jnp.float32) * scale_ref[...] + shift_ref[...], 0.0)


def _bn_relu_call(h, scale, shift):
    n_pad, out_pad = h.shape
    t_rows = n_pad // TILE_N
    need = 4 * TILE_N * out_pad * 4 + 2 * out_pad * 4
    return pl.pallas_call(
        bn_relu_kernel,
        grid_spec=pltpu.PrefetchScalarGridSpec(
            num_scalar_prefetch=0,
            grid=(t_rows,),
            in_specs=[pl.BlockSpec((TILE_N, out_pad), lambda i: (i, 0)),
                      pl.BlockSpec((1, out_pad), lambda i: (0, 0)),
                      pl.BlockSpec((1, out_pad), lambda i: (0, 0))],
            out_specs=pl.BlockSpec((TILE_N, out_pad), lambda i: (i, 0))),
        out_shape=jax.ShapeDtypeStruct((n_pad, out_pad), jnp.float32),
        compiler_params=pltpu.CompilerParams(
            dimension_semantics=("parallel",),
            vmem_limit_bytes=_vmem_limit(need)),
    )(h, scale, shift)


def _fold_bn(stats, gamma, beta, n_real):
    """Reduce per-tile (sum, sumsq) stats and fold BN into a (scale, shift) affine."""
    s = jnp.sum(stats, axis=0)                   # (8, out_pad)
    mean = s[0:1] / n_real
    var = s[1:2] / n_real - mean * mean          # biased, training-mode BN
    scale = gamma * jax.lax.rsqrt(var + BN_EPS)
    shift = beta - mean * scale
    return scale, shift


# --------------------------------------------------------------------------- #
# Forward wrapper
# --------------------------------------------------------------------------- #
@functools.partial(jax.jit, static_argnames=("n_real", "out_channels", "use_bf16"))
def dense_layer_forward_padded(ahat_p, x_p, p1, p2, *, n_real, out_channels,
                               use_bf16=False):
    """All array inputs are already padded to TPU-friendly shapes."""
    mxu_dt = jnp.bfloat16 if use_bf16 else jnp.float32
    ahat = ahat_p.astype(mxu_dt)                 # cast in the wrapper -> halves DMA
    f_pad = x_p.shape[1]
    hid_pad = p1["w2"].shape[0]

    # ---- layer 1: GIN + MLP (pre-BN) -------------------------------------- #
    premult1 = f_pad > hid_pad
    if premult1:
        # Reassociate A_hat @ (x @ W1): one cheap matmul drops the O(N^2)
        # aggregation contraction from K=f_pad down to K=hid_pad.
        z1 = jnp.dot(x_p, p1["w1"], preferred_element_type=jnp.float32)
        w1_arg = jnp.zeros((8, LANE), jnp.float32)       # unused in the kernel
    else:
        z1 = x_p
        w1_arg = p1["w1"]
    z1 = z1.astype(mxu_dt)
    ones1 = jnp.ones((1, z1.shape[1]), jnp.float32)      # pre-transform unused (layer 1)
    zeros1 = jnp.zeros((1, z1.shape[1]), jnp.float32)
    h2_1, st1 = _gin_layer_call(ahat, z1, w1_arg, p1["b1"], p1["w2"], p1["b2"],
                                ones1, zeros1, n_real=n_real, apply_pre=False,
                                premultiplied=premult1, out_dtype=mxu_dt)
    scale1, shift1 = _fold_bn(st1, p1["gamma"], p1["beta"], n_real)

    # ---- layer 2: layer-1 BN+ReLU fused as the per-tile pre-transform ----- #
    h2_2, st2 = _gin_layer_call(ahat, h2_1, p2["w1"], p2["b1"], p2["w2"], p2["b2"],
                                scale1, shift1, n_real=n_real, apply_pre=True,
                                premultiplied=False, out_dtype=jnp.float32)
    scale2, shift2 = _fold_bn(st2, p2["gamma"], p2["beta"], n_real)

    # ---- final BN + ReLU (lane-dense slab, sliced to the real shape here) -- #
    out = _bn_relu_call(h2_2, scale2, shift2)
    return out[:n_real, :out_channels]


# --------------------------------------------------------------------------- #
# Graph / parameter construction (hoisted out of the per-forward hot path)
# --------------------------------------------------------------------------- #
def build_ahat(edge_index, num_nodes, eps=0.0):
    """Dense 'adjacency + (1+eps) I' so GIN scatter-add becomes a matmul."""
    src, dst = edge_index[0], edge_index[1]
    adj = jnp.zeros((num_nodes, num_nodes), jnp.float32)
    adj = adj.at[dst, src].add(1.0)              # aggregated[i] = sum_{e: dst==i} x[src]
    return adj + (1.0 + eps) * jnp.eye(num_nodes, dtype=jnp.float32)


def _pad2(a, rows, cols):
    return jnp.pad(a, ((0, rows - a.shape[0]), (0, cols - a.shape[1])))


def init_linear(key, fan_in, fan_out):
    k1, k2 = jax.random.split(key)
    bound = 1.0 / jnp.sqrt(jnp.float32(fan_in))
    w = jax.random.uniform(k1, (fan_in, fan_out), jnp.float32, -bound, bound)
    b = jax.random.uniform(k2, (1, fan_out), jnp.float32, -bound, bound)
    return w, b


def init_graph_gin_bn(key, in_ch, out_ch):
    k1, k2 = jax.random.split(key)
    w1, b1 = init_linear(k1, in_ch, out_ch)
    w2, b2 = init_linear(k2, out_ch, out_ch)
    gamma = jnp.ones((1, out_ch), jnp.float32)
    beta = jnp.zeros((1, out_ch), jnp.float32)
    return dict(w1=w1, b1=b1, w2=w2, b2=b2, gamma=gamma, beta=beta)


def pad_graph_gin_bn(params, in_pad, out_pad):
    """Zero-pad weights to lane multiples; the padding is numerically inert."""
    return dict(
        w1=_pad2(params["w1"], in_pad, out_pad),
        b1=_pad2(params["b1"], 1, out_pad),
        w2=_pad2(params["w2"], out_pad, out_pad),
        b2=_pad2(params["b2"], 1, out_pad),
        gamma=_pad2(params["gamma"], 1, out_pad),
        beta=_pad2(params["beta"], 1, out_pad),
    )


def prepare_inputs(xs, edge_index):
    """Concat features (DenseLayer semantics), build A_hat, pad to tile multiples."""
    if not isinstance(xs, (list, tuple)):
        xs = [xs]
    x = jnp.concatenate(xs, axis=1)
    n, f_in = x.shape
    n_pad = _round_up(max(n, TILE_N), TILE_N)
    f_pad = _round_up(max(f_in, LANE), LANE)
    ahat_p = _pad2(build_ahat(edge_index, n), n_pad, n_pad)   # padded rows/cols are zero
    x_p = _pad2(x, n_pad, f_pad)
    return ahat_p, x_p, n, f_pad


# --------------------------------------------------------------------------- #
# Pure-JAX reference (correctness check)
# --------------------------------------------------------------------------- #
def _ref_gin_bn(ahat, x, p):
    h = ahat @ x
    h1 = jnp.maximum(h @ p["w1"] + p["b1"], 0.0)
    h2 = h1 @ p["w2"] + p["b2"]
    mean = jnp.mean(h2, axis=0, keepdims=True)
    var = jnp.mean((h2 - mean) ** 2, axis=0, keepdims=True)
    return jnp.maximum((h2 - mean) * jax.lax.rsqrt(var + BN_EPS) * p["gamma"]
                       + p["beta"], 0.0)


def _ref_forward(xs, edge_index, p1, p2):
    x = jnp.concatenate(xs, axis=1)
    ahat = build_ahat(edge_index, x.shape[0])
    return _ref_gin_bn(ahat, _ref_gin_bn(ahat, x, p1), p2)


# --------------------------------------------------------------------------- #
if __name__ == "__main__":
    # Small synthetic graph: 300 nodes (2 row tiles x 2 contraction tiles after
    # padding to 512), data.x is a list of two feature tensors (exercises the
    # DenseLayer concat and the layer-1 reassociation since 160 -> f_pad=256).
    num_nodes = 300
    num_edges = 1200
    feat_a, feat_b = 80, 80
    growth_rate = 32
    bn_size = 4
    hidden = growth_rate * bn_size               # 128

    key = jax.random.PRNGKey(0)
    kxa, kxb, ke1, ke2, kp1, kp2 = jax.random.split(key, 6)
    xa = jax.random.normal(kxa, (num_nodes, feat_a), jnp.float32)
    xb = jax.random.normal(kxb, (num_nodes, feat_b), jnp.float32)
    src = jax.random.randint(ke1, (num_edges,), 0, num_nodes)
    dst = jax.random.randint(ke2, (num_edges,), 0, num_nodes)
    edge_index = jnp.stack([src, dst], axis=0)   # [2, E]

    params1 = init_graph_gin_bn(kp1, feat_a + feat_b, hidden)   # conv1
    params2 = init_graph_gin_bn(kp2, hidden, growth_rate)       # conv2

    # One-time setup (outside the hot path).
    ahat_p, x_p, n_real, f_pad = prepare_inputs([xa, xb], edge_index)
    hid_pad = _round_up(hidden, LANE)
    out_pad = _round_up(growth_rate, LANE)
    p1_p = pad_graph_gin_bn(params1, f_pad, hid_pad)
    p2_p = pad_graph_gin_bn(params2, hid_pad, out_pad)

    # f32 path
    out = dense_layer_forward_padded(ahat_p, x_p, p1_p, p2_p, n_real=n_real,
                                     out_channels=growth_rate, use_bf16=False)
    out = jax.block_until_ready(out)
    assert out.shape == (num_nodes, growth_rate)

    ref = jax.block_until_ready(_ref_forward([xa, xb], edge_index, params1, params2))
    max_err = float(jnp.max(jnp.abs(out - ref)))
    assert jnp.allclose(out, ref, atol=5e-4, rtol=5e-4), max_err

    # bf16 MXU path (loose tolerance: A_hat is exact in bf16, activations drift)
    out_bf16 = jax.block_until_ready(
        dense_layer_forward_padded(ahat_p, x_p, p1_p, p2_p, n_real=n_real,
                                   out_channels=growth_rate, use_bf16=True))
    assert bool(jnp.all(jnp.isfinite(out_bf16)))
    rel = float(jnp.linalg.norm(out_bf16 - ref)) / (float(jnp.linalg.norm(ref)) + 1e-6)
    assert rel < 0.05, rel

    print("KERNEL_OK")
</pallas_src>

<mosaic_0001>
module attributes {stable_mosaic.version = 11 : i64} {
  func.func @gin_layer_kernel(%arg0: i32, %arg1: i32, %arg2: memref<1x128xf32, #tpu.memory_space<vmem>>, %arg3: memref<1x128xf32, #tpu.memory_space<vmem>>, %arg4: memref<256x256xf32, #tpu.memory_space<vmem>>, %arg5: memref<256x128xf32, #tpu.memory_space<vmem>>, %arg6: memref<8x128xf32, #tpu.memory_space<vmem>>, %arg7: memref<1x128xf32, #tpu.memory_space<vmem>>, %arg8: memref<128x128xf32, #tpu.memory_space<vmem>>, %arg9: memref<1x128xf32, #tpu.memory_space<vmem>>, %arg10: memref<256x128xf32, #tpu.memory_space<vmem>>, %arg11: memref<1x8x128xf32, #tpu.memory_space<vmem>>, %arg12: memref<256x128xf32, #tpu.memory_space<vmem>>) attributes {dimension_semantics = [#tpu.dimension_semantics<parallel>, #tpu.dimension_semantics<arbitrary>], iteration_bounds = array<i64: 2, 2>, scalar_prefetch = 0 : i64, scratch_operands = 1 : i64, tpu.core_type = #tpu.core_type<tc>, window_params = [{pipeline_mode = #tpu.pipeline_mode<synchronous>, transform_indices = @transform_0, window_bounds = array<i64: 1, 128>}, {pipeline_mode = #tpu.pipeline_mode<synchronous>, transform_indices = @transform_1, window_bounds = array<i64: 1, 128>}, {transform_indices = @transform_2, window_bounds = array<i64: 256, 256>}, {transform_indices = @transform_3, window_bounds = array<i64: 256, 128>}, {pipeline_mode = #tpu.pipeline_mode<synchronous>, transform_indices = @transform_4, window_bounds = array<i64: 8, 128>}, {pipeline_mode = #tpu.pipeline_mode<synchronous>, transform_indices = @transform_5, window_bounds = array<i64: 1, 128>}, {pipeline_mode = #tpu.pipeline_mode<synchronous>, transform_indices = @transform_6, window_bounds = array<i64: 128, 128>}, {pipeline_mode = #tpu.pipeline_mode<synchronous>, transform_indices = @transform_7, window_bounds = array<i64: 1, 128>}, {transform_indices = @transform_8, window_bounds = array<i64: 256, 128>}, {transform_indices = @transform_9, window_bounds = array<i64: 1, 8, 128>}]} {
    %c0_i32 = arith.constant 0 : i32
    %0 = arith.cmpi eq, %arg1, %c0_i32 : i32
    %1 = arith.extui %0 : i1 to i32
    %c0_i32_0 = arith.constant 0 : i32
    %2 = arith.cmpi ne, %1, %c0_i32_0 : i32
    scf.if %2 {
      %cst_9 = arith.constant 0.000000e+00 : f32
      %12 = vector.broadcast %cst_9 : f32 to vector<256x128xf32>
      %c0_10 = arith.constant 0 : index
      %c0_11 = arith.constant 0 : index
      %13 = vector.load %arg12[%c0_10, %c0_11] : memref<256x128xf32, #tpu.memory_space<vmem>>, vector<256x128xf32>
      tpu.vector_store %arg12[%c0_10, %c0_11], %12 {strides = array<i32>} : memref<256x128xf32, #tpu.memory_space<vmem>>, vector<256x128xf32>,
    } else {
    }
    %c0 = arith.constant 0 : index
    %c0_1 = arith.constant 0 : index
    %3 = vector.load %arg5[%c0, %c0_1] : memref<256x128xf32, #tpu.memory_space<vmem>>, vector<256x128xf32>
    %c0_2 = arith.constant 0 : index
    %c0_3 = arith.constant 0 : index
    %4 = vector.load %arg12[%c0_2, %c0_3] : memref<256x128xf32, #tpu.memory_space<vmem>>, vector<256x128xf32>
    %c0_4 = arith.constant 0 : index
    %c0_5 = arith.constant 0 : index
    %5 = vector.load %arg4[%c0_4, %c0_5] : memref<256x256xf32, #tpu.memory_space<vmem>>, vector<256x256xf32>
    %cst = arith.constant dense<0.000000e+00> : vector<256x128xf32>
    %6 = tpu.matmul %5, %3, %cst {dimension_numbers = #tpu.dot_dimension_numbers<[1], [0], [0], [1], [0, 0, 1, 1], [], []>} : vector<256x256xf32>, vector<256x128xf32>, vector<256x128xf32> -> vector<256x128xf32>
    %7 = arith.addf %4, %6 : vector<256x128xf32>
    %c0_6 = arith.constant 0 : index
    %c0_7 = arith.constant 0 : index
    %8 = vector.load %arg12[%c0_6, %c0_7] : memref<256x128xf32, #tpu.memory_space<vmem>>, vector<256x128xf32>
    tpu.vector_store %arg12[%c0_6, %c0_7], %7 {strides = array<i32>} : memref<256x128xf32, #tpu.memory_space<vmem>>, vector<256x128xf32>,
    %c1_i32 = arith.constant 1 : i32
    %9 = arith.cmpi eq, %arg1, %c1_i32 : i32
    %10 = arith.extui %9 : i1 to i32
    %c0_i32_8 = arith.constant 0 : i32
    %11 = arith.cmpi ne, %10, %c0_i32_8 : i32
    scf.if %11 {
      %c0_9 = arith.constant 0 : index
      %c0_10 = arith.constant 0 : index
      %12 = vector.load %arg12[%c0_9, %c0_10] : memref<256x128xf32, #tpu.memory_space<vmem>>, vector<256x128xf32>
      %c0_11 = arith.constant 0 : index
      %c0_12 = arith.constant 0 : index
      %13 = vector.load %arg7[%c0_11, %c0_12] : memref<1x128xf32, #tpu.memory_space<vmem>>, vector<1x128xf32>
      %14 = vector.broadcast %13 : vector<1x128xf32> to vector<256x128xf32>
      %15 = arith.addf %12, %14 : vector<256x128xf32>
      %cst_13 = arith.constant 0.000000e+00 : f32
      %16 = vector.broadcast %cst_13 : f32 to vector<256x128xf32>
      %17 = arith.maximumf %15, %16 : vector<256x128xf32>
      %c0_14 = arith.constant 0 : index
      %c0_15 = arith.constant 0 : index
      %18 = vector.load %arg8[%c0_14, %c0_15] : memref<128x128xf32, #tpu.memory_space<vmem>>, vector<128x128xf32>
      %cst_16 = arith.constant dense<0.000000e+00> : vector<256x128xf32>
      %19 = tpu.matmul %17, %18, %cst_16 {dimension_numbers = #tpu.dot_dimension_numbers<[1], [0], [0], [1], [0, 0, 1, 1], [], []>} : vector<256x128xf32>, vector<128x128xf32>, vector<256x128xf32> -> vector<256x128xf32>
      %c0_17 = arith.constant 0 : index
      %c0_18 = arith.constant 0 : index
      %20 = vector.load %arg9[%c0_17, %c0_18] : memref<1x128xf32, #tpu.memory_space<vmem>>, vector<1x128xf32>
      %21 = vector.broadcast %20 : vector<1x128xf32> to vector<256x128xf32>
      %22 = arith.addf %19, %21 : vector<256x128xf32>
      %c0_19 = arith.constant 0 : index
      %c0_20 = arith.constant 0 : index
      %23 = vector.load %arg10[%c0_19, %c0_20] : memref<256x128xf32, #tpu.memory_space<vmem>>, vector<256x128xf32>
      tpu.vector_store %arg10[%c0_19, %c0_20], %22 {strides = array<i32>} : memref<256x128xf32, #tpu.memory_space<vmem>>, vector<256x128xf32>,
      %c256_i32 = arith.constant 256 : i32
      %24 = arith.muli %arg0, %c256_i32 : i32
      %25 = tpu.iota {dimensions = array<i32: 1>} : vector<8x256xi32>
      %26 = vector.broadcast %24 : i32 to vector<8x256xi32>
      %27 = arith.addi %26, %25 : vector<8x256xi32>
      %28 = tpu.iota {dimensions = array<i32: 0>} : vector<8x256xi32>
      %c300_i32 = arith.constant 300 : i32
      %29 = vector.broadcast %c300_i32 : i32 to vector<8x256xi32>
      %30 = arith.cmpi slt, %27, %29 : vector<8x256xi32>
      %31 = arith.extui %30 : vector<8x256xi1> to vector<8x256xi32>
      %32 = arith.sitofp %31 : vector<8x256xi32> to vector<8x256xf32>
      %c0_i32_21 = arith.constant 0 : i32
      %33 = vector.broadcast %c0_i32_21 : i32 to vector<8x256xi32>
      %34 = arith.cmpi eq, %28, %33 : vector<8x256xi32>
      %cst_22 = arith.constant 0.000000e+00 : f32
      %35 = vector.broadcast %cst_22 : f32 to vector<8x256xf32>
      %36 = arith.select %34, %32, %35 : vector<8x256xi1>, vector<8x256xf32>
      %c1_i32_23 = arith.constant 1 : i32
      %37 = vector.broadcast %c1_i32_23 : i32 to vector<8x256xi32>
      %38 = arith.cmpi eq, %28, %37 : vector<8x256xi32>
      %cst_24 = arith.constant 0.000000e+00 : f32
      %39 = vector.broadcast %cst_24 : f32 to vector<8x256xf32>
      %40 = arith.select %38, %32, %39 : vector<8x256xi1>, vector<8x256xf32>
      %cst_25 = arith.constant dense<0.000000e+00> : vector<8x128xf32>
      %41 = tpu.matmul %36, %22, %cst_25 {dimension_numbers = #tpu.dot_dimension_numbers<[1], [0], [0], [1], [0, 0, 1, 1], [], []>} : vector<8x256xf32>, vector<256x128xf32>, vector<8x128xf32> -> vector<8x128xf32>
      %42 = arith.mulf %22, %22 : vector<256x128xf32>
      %cst_26 = arith.constant dense<0.000000e+00> : vector<8x128xf32>
      %43 = tpu.matmul %40, %42, %cst_26 {dimension_numbers = #tpu.dot_dimension_numbers<[1], [0], [0], [1], [0, 0, 1, 1], [], []>} : vector<8x256xf32>, vector<256x128xf32>, vector<8x128xf32> -> vector<8x128xf32>
      %44 = arith.addf %41, %43 : vector<8x128xf32>
      %c0_27 = arith.constant 0 : index
      %c0_28 = arith.constant 0 : index
      %c0_29 = arith.constant 0 : index
      %45 = vector.load %arg11[%c0_27, %c0_28, %c0_29] : memref<1x8x128xf32, #tpu.memory_space<vmem>>, vector<1x8x128xf32>
      %46 = vector.shape_cast %45 : vector<1x8x128xf32> to vector<8x128xf32>
      %47 = vector.shape_cast %44 : vector<8x128xf32> to vector<1x8x128xf32>
      tpu.vector_store %arg11[%c0_27, %c0_28, %c0_29], %47 {strides = array<i32>} : memref<1x8x128xf32, #tpu.memory_space<vmem>>, vector<1x8x128xf32>,
    } else {
    }
    return
  }
  func.func @transform_0(%arg0: i32, %arg1: i32) -> (i32, i32) {
    %c0_i32 = arith.constant 0 : i32
    %c0_i32_0 = arith.constant 0 : i32
    %c0_i32_1 = arith.constant 0 : i32
    return %c0_i32, %c0_i32_0 : i32, i32
  }
  func.func @transform_1(%arg0: i32, %arg1: i32) -> (i32, i32) {
    %c0_i32 = arith.constant 0 : i32
    %c0_i32_0 = arith.constant 0 : i32
    %c0_i32_1 = arith.constant 0 : i32
    return %c0_i32, %c0_i32_0 : i32, i32
  }
  func.func @transform_2(%arg0: i32, %arg1: i32) -> (i32, i32) {
    %c0_i32 = arith.constant 0 : i32
    return %arg0, %arg1 : i32, i32
  }
  func.func @transform_3(%arg0: i32, %arg1: i32) -> (i32, i32) {
    %c0_i32 = arith.constant 0 : i32
    %c0_i32_0 = arith.constant 0 : i32
    return %arg1, %c0_i32 : i32, i32
  }
  func.func @transform_4(%arg0: i32, %arg1: i32) -> (i32, i32) {
    %c0_i32 = arith.constant 0 : i32
    %c0_i32_0 = arith.constant 0 : i32
    %c0_i32_1 = arith.constant 0 : i32
    return %c0_i32, %c0_i32_0 : i32, i32
  }
  func.func @transform_5(%arg0: i32, %arg1: i32) -> (i32, i32) {
    %c0_i32 = arith.constant 0 : i32
    %c0_i32_0 = arith.constant 0 : i32
    %c0_i32_1 = arith.constant 0 : i32
    return %c0_i32, %c0_i32_0 : i32, i32
  }
  func.func @transform_6(%arg0: i32, %arg1: i32) -> (i32, i32) {
    %c0_i32 = arith.constant 0 : i32
    %c0_i32_0 = arith.constant 0 : i32
    %c0_i32_1 = arith.constant 0 : i32
    return %c0_i32, %c0_i32_0 : i32, i32
  }
  func.func @transform_7(%arg0: i32, %arg1: i32) -> (i32, i32) {
    %c0_i32 = arith.constant 0 : i32
    %c0_i32_0 = arith.constant 0 : i32
    %c0_i32_1 = arith.constant 0 : i32
    return %c0_i32, %c0_i32_0 : i32, i32
  }
  func.func @transform_8(%arg0: i32, %arg1: i32) -> (i32, i32) {
    %c0_i32 = arith.constant 0 : i32
    %c0_i32_0 = arith.constant 0 : i32
    return %arg0, %c0_i32 : i32, i32
  }
  func.func @transform_9(%arg0: i32, %arg1: i32) -> (i32, i32, i32) {
    %c0_i32 = arith.constant 0 : i32
    %c0_i32_0 = arith.constant 0 : i32
    %c0_i32_1 = arith.constant 0 : i32
    return %arg0, %c0_i32, %c0_i32_0 : i32, i32, i32
  }
}

module attributes {stable_mosaic.version = 11 : i64} {
  func.func @bn_relu_kernel(%arg0: i32, %arg1: memref<256x128xf32, #tpu.memory_space<vmem>>, %arg2: memref<1x128xf32, #tpu.memory_space<vmem>>, %arg3: memref<1x128xf32, #tpu.memory_space<vmem>>, %arg4: memref<256x128xf32, #tpu.memory_space<vmem>>) attributes {dimension_semantics = [#tpu.dimension_semantics<parallel>], iteration_bounds = array<i64: 2>, scalar_prefetch = 0 : i64, scratch_operands = 0 : i64, tpu.core_type = #tpu.core_type<tc>, window_params = [{transform_indices = @transform_0, window_bounds = array<i64: 256, 128>}, {pipeline_mode = #tpu.pipeline_mode<synchronous>, transform_indices = @transform_1, window_bounds = array<i64: 1, 128>}, {pipeline_mode = #tpu.pipeline_mode<synchronous>, transform_indices = @transform_2, window_bounds = array<i64: 1, 128>}, {transform_indices = @transform_3, window_bounds = array<i64: 256, 128>}]} {
    %c0 = arith.constant 0 : index
    %c0_0 = arith.constant 0 : index
    %0 = vector.load %arg1[%c0, %c0_0] : memref<256x128xf32, #tpu.memory_space<vmem>>, vector<256x128xf32>
    %c0_1 = arith.constant 0 : index
    %c0_2 = arith.constant 0 : index
    %1 = vector.load %arg2[%c0_1, %c0_2] : memref<1x128xf32, #tpu.memory_space<vmem>>, vector<1x128xf32>
    %2 = vector.broadcast %1 : vector<1x128xf32> to vector<256x128xf32>
    %3 = arith.mulf %0, %2 : vector<256x128xf32>
    %c0_3 = arith.constant 0 : index
    %c0_4 = arith.constant 0 : index
    %4 = vector.load %arg3[%c0_3, %c0_4] : memref<1x128xf32, #tpu.memory_space<vmem>>, vector<1x128xf32>
    %5 = vector.broadcast %4 : vector<1x128xf32> to vector<256x128xf32>
    %6 = arith.addf %3, %5 : vector<256x128xf32>
    %cst = arith.constant 0.000000e+00 : f32
    %7 = vector.broadcast %cst : f32 to vector<256x128xf32>
    %8 = arith.maximumf %6, %7 : vector<256x128xf32>
    %c0_5 = arith.constant 0 : index
    %c0_6 = arith.constant 0 : index
    %9 = vector.load %arg4[%c0_5, %c0_6] : memref<256x128xf32, #tpu.memory_space<vmem>>, vector<256x128xf32>
    tpu.vector_store %arg4[%c0_5, %c0_6], %8 {strides = array<i32>} : memref<256x128xf32, #tpu.memory_space<vmem>>, vector<256x128xf32>,
    return
  }
  func.func @transform_0(%arg0: i32) -> (i32, i32) {
    %c0_i32 = arith.constant 0 : i32
    %c0_i32_0 = arith.constant 0 : i32
    return %arg0, %c0_i32 : i32, i32
  }
  func.func @transform_1(%arg0: i32) -> (i32, i32) {
    %c0_i32 = arith.constant 0 : i32
    %c0_i32_0 = arith.constant 0 : i32
    %c0_i32_1 = arith.constant 0 : i32
    return %c0_i32, %c0_i32_0 : i32, i32
  }
  func.func @transform_2(%arg0: i32) -> (i32, i32) {
    %c0_i32 = arith.constant 0 : i32
    %c0_i32_0 = arith.constant 0 : i32
    %c0_i32_1 = arith.constant 0 : i32
    return %c0_i32, %c0_i32_0 : i32, i32
  }
  func.func @transform_3(%arg0: i32) -> (i32, i32) {
    %c0_i32 = arith.constant 0 : i32
    %c0_i32_0 = arith.constant 0 : i32
    return %arg0, %c0_i32 : i32, i32
  }
}

module attributes {stable_mosaic.version = 11 : i64} {
  func.func @gin_layer_kernel(%arg0: i32, %arg1: i32, %arg2: memref<1x128xf32, #tpu.memory_space<vmem>>, %arg3: memref<1x128xf32, #tpu.memory_space<vmem>>, %arg4: memref<256x256xf32, #tpu.memory_space<vmem>>, %arg5: memref<256x128xf32, #tpu.memory_space<vmem>>, %arg6: memref<128x128xf32, #tpu.memory_space<vmem>>, %arg7: memref<1x128xf32, #tpu.memory_space<vmem>>, %arg8: memref<128x128xf32, #tpu.memory_space<vmem>>, %arg9: memref<1x128xf32, #tpu.memory_space<vmem>>, %arg10: memref<256x128xf32, #tpu.memory_space<vmem>>, %arg11: memref<1x8x128xf32, #tpu.memory_space<vmem>>, %arg12: memref<256x128xf32, #tpu.memory_space<vmem>>) attributes {dimension_semantics = [#tpu.dimension_semantics<parallel>, #tpu.dimension_semantics<arbitrary>], iteration_bounds = array<i64: 2, 2>, scalar_prefetch = 0 : i64, scratch_operands = 1 : i64, tpu.core_type = #tpu.core_type<tc>, window_params = [{pipeline_mode = #tpu.pipeline_mode<synchronous>, transform_indices = @transform_0, window_bounds = array<i64: 1, 128>}, {pipeline_mode = #tpu.pipeline_mode<synchronous>, transform_indices = @transform_1, window_bounds = array<i64: 1, 128>}, {transform_indices = @transform_2, window_bounds = array<i64: 256, 256>}, {transform_indices = @transform_3, window_bounds = array<i64: 256, 128>}, {pipeline_mode = #tpu.pipeline_mode<synchronous>, transform_indices = @transform_4, window_bounds = array<i64: 128, 128>}, {pipeline_mode = #tpu.pipeline_mode<synchronous>, transform_indices = @transform_5, window_bounds = array<i64: 1, 128>}, {pipeline_mode = #tpu.pipeline_mode<synchronous>, transform_indices = @transform_6, window_bounds = array<i64: 128, 128>}, {pipeline_mode = #tpu.pipeline_mode<synchronous>, transform_indices = @transform_7, window_bounds = array<i64: 1, 128>}, {transform_indices = @transform_8, window_bounds = array<i64: 256, 128>}, {transform_indices = @transform_9, window_bounds = array<i64: 1, 8, 128>}]} {
    %c0_i32 = arith.constant 0 : i32
    %0 = arith.cmpi eq, %arg1, %c0_i32 : i32
    %1 = arith.extui %0 : i1 to i32
    %c0_i32_0 = arith.constant 0 : i32
    %2 = arith.cmpi ne, %1, %c0_i32_0 : i32
    scf.if %2 {
      %cst_14 = arith.constant 0.000000e+00 : f32
      %20 = vector.broadcast %cst_14 : f32 to vector<256x128xf32>
      %c0_15 = arith.constant 0 : index
      %c0_16 = arith.constant 0 : index
      %21 = vector.load %arg12[%c0_15, %c0_16] : memref<256x128xf32, #tpu.memory_space<vmem>>, vector<256x128xf32>
      tpu.vector_store %arg12[%c0_15, %c0_16], %20 {strides = array<i32>} : memref<256x128xf32, #tpu.memory_space<vmem>>, vector<256x128xf32>,
    } else {
    }
    %c0 = arith.constant 0 : index
    %c0_1 = arith.constant 0 : index
    %3 = vector.load %arg5[%c0, %c0_1] : memref<256x128xf32, #tpu.memory_space<vmem>>, vector<256x128xf32>
    %c0_2 = arith.constant 0 : index
    %c0_3 = arith.constant 0 : index
    %4 = vector.load %arg2[%c0_2, %c0_3] : memref<1x128xf32, #tpu.memory_space<vmem>>, vector<1x128xf32>
    %5 = vector.broadcast %4 : vector<1x128xf32> to vector<256x128xf32>
    %6 = arith.mulf %3, %5 : vector<256x128xf32>
    %c0_4 = arith.constant 0 : index
    %c0_5 = arith.constant 0 : index
    %7 = vector.load %arg3[%c0_4, %c0_5] : memref<1x128xf32, #tpu.memory_space<vmem>>, vector<1x128xf32>
    %8 = vector.broadcast %7 : vector<1x128xf32> to vector<256x128xf32>
    %9 = arith.addf %6, %8 : vector<256x128xf32>
    %cst = arith.constant 0.000000e+00 : f32
    %10 = vector.broadcast %cst : f32 to vector<256x128xf32>
    %11 = arith.maximumf %9, %10 : vector<256x128xf32>
    %c0_6 = arith.constant 0 : index
    %c0_7 = arith.constant 0 : index
    %12 = vector.load %arg12[%c0_6, %c0_7] : memref<256x128xf32, #tpu.memory_space<vmem>>, vector<256x128xf32>
    %c0_8 = arith.constant 0 : index
    %c0_9 = arith.constant 0 : index
    %13 = vector.load %arg4[%c0_8, %c0_9] : memref<256x256xf32, #tpu.memory_space<vmem>>, vector<256x256xf32>
    %cst_10 = arith.constant dense<0.000000e+00> : vector<256x128xf32>
    %14 = tpu.matmul %13, %11, %cst_10 {dimension_numbers = #tpu.dot_dimension_numbers<[1], [0], [0], [1], [0, 0, 1, 1], [], []>} : vector<256x256xf32>, vector<256x128xf32>, vector<256x128xf32> -> vector<256x128xf32>
    %15 = arith.addf %12, %14 : vector<256x128xf32>
    %c0_11 = arith.constant 0 : index
    %c0_12 = arith.constant 0 : index
    %16 = vector.load %arg12[%c0_11, %c0_12] : memref<256x128xf32, #tpu.memory_space<vmem>>, vector<256x128xf32>
    tpu.vector_store %arg12[%c0_11, %c0_12], %15 {strides = array<i32>} : memref<256x128xf32, #tpu.memory_space<vmem>>, vector<256x128xf32>,
    %c1_i32 = arith.constant 1 : i32
    %17 = arith.cmpi eq, %arg1, %c1_i32 : i32
    %18 = arith.extui %17 : i1 to i32
    %c0_i32_13 = arith.constant 0 : i32
    %19 = arith.cmpi ne, %18, %c0_i32_13 : i32
    scf.if %19 {
      %c0_14 = arith.constant 0 : index
      %c0_15 = arith.constant 0 : index
      %20 = vector.load %arg12[%c0_14, %c0_15] : memref<256x128xf32, #tpu.memory_space<vmem>>, vector<256x128xf32>
      %c0_16 = arith.constant 0 : index
      %c0_17 = arith.constant 0 : index
      %21 = vector.load %arg6[%c0_16, %c0_17] : memref<128x128xf32, #tpu.memory_space<vmem>>, vector<128x128xf32>
      %cst_18 = arith.constant dense<0.000000e+00> : vector<256x128xf32>
      %22 = tpu.matmul %20, %21, %cst_18 {dimension_numbers = #tpu.dot_dimension_numbers<[1], [0], [0], [1], [0, 0, 1, 1], [], []>} : vector<256x128xf32>, vector<128x128xf32>, vector<256x128xf32> -> vector<256x128xf32>
      %c0_19 = arith.constant 0 : index
      %c0_20 = arith.constant 0 : index
      %23 = vector.load %arg7[%c0_19, %c0_20] : memref<1x128xf32, #tpu.memory_space<vmem>>, vector<1x128xf32>
      %24 = vector.broadcast %23 : vector<1x128xf32> to vector<256x128xf32>
      %25 = arith.addf %22, %24 : vector<256x128xf32>
      %cst_21 = arith.constant 0.000000e+00 : f32
      %26 = vector.broadcast %cst_21 : f32 to vector<256x128xf32>
      %27 = arith.maximumf %25, %26 : vector<256x128xf32>
      %c0_22 = arith.constant 0 : index
      %c0_23 = arith.constant 0 : index
      %28 = vector.load %arg8[%c0_22, %c0_23] : memref<128x128xf32, #tpu.memory_space<vmem>>, vector<128x128xf32>
      %cst_24 = arith.constant dense<0.000000e+00> : vector<256x128xf32>
      %29 = tpu.matmul %27, %28, %cst_24 {dimension_numbers = #tpu.dot_dimension_numbers<[1], [0], [0], [1], [0, 0, 1, 1], [], []>} : vector<256x128xf32>, vector<128x128xf32>, vector<256x128xf32> -> vector<256x128xf32>
      %c0_25 = arith.constant 0 : index
      %c0_26 = arith.constant 0 : index
      %30 = vector.load %arg9[%c0_25, %c0_26] : memref<1x128xf32, #tpu.memory_space<vmem>>, vector<1x128xf32>
      %31 = vector.broadcast %30 : vector<1x128xf32> to vector<256x128xf32>
      %32 = arith.addf %29, %31 : vector<256x128xf32>
      %c0_27 = arith.constant 0 : index
      %c0_28 = arith.constant 0 : index
      %33 = vector.load %arg10[%c0_27, %c0_28] : memref<256x128xf32, #tpu.memory_space<vmem>>, vector<256x128xf32>
      tpu.vector_store %arg10[%c0_27, %c0_28], %32 {strides = array<i32>} : memref<256x128xf32, #tpu.memory_space<vmem>>, vector<256x128xf32>,
      %c256_i32 = arith.constant 256 : i32
      %34 = arith.muli %arg0, %c256_i32 : i32
      %35 = tpu.iota {dimensions = array<i32: 1>} : vector<8x256xi32>
      %36 = vector.broadcast %34 : i32 to vector<8x256xi32>
      %37 = arith.addi %36, %35 : vector<8x256xi32>
      %38 = tpu.iota {dimensions = array<i32: 0>} : vector<8x256xi32>
      %c300_i32 = arith.constant 300 : i32
      %39 = vector.broadcast %c300_i32 : i32 to vector<8x256xi32>
      %40 = arith.cmpi slt, %37, %39 : vector<8x256xi32>
      %41 = arith.extui %40 : vector<8x256xi1> to vector<8x256xi32>
      %42 = arith.sitofp %41 : vector<8x256xi32> to vector<8x256xf32>
      %c0_i32_29 = arith.constant 0 : i32
      %43 = vector.broadcast %c0_i32_29 : i32 to vector<8x256xi32>
      %44 = arith.cmpi eq, %38, %43 : vector<8x256xi32>
      %cst_30 = arith.constant 0.000000e+00 : f32
      %45 = vector.broadcast %cst_30 : f32 to vector<8x256xf32>
      %46 = arith.select %44, %42, %45 : vector<8x256xi1>, vector<8x256xf32>
      %c1_i32_31 = arith.constant 1 : i32
      %47 = vector.broadcast %c1_i32_31 : i32 to vector<8x256xi32>
      %48 = arith.cmpi eq, %38, %47 : vector<8x256xi32>
      %cst_32 = arith.constant 0.000000e+00 : f32
      %49 = vector.broadcast %cst_32 : f32 to vector<8x256xf32>
      %50 = arith.select %48, %42, %49 : vector<8x256xi1>, vector<8x256xf32>
      %cst_33 = arith.constant dense<0.000000e+00> : vector<8x128xf32>
      %51 = tpu.matmul %46, %32, %cst_33 {dimension_numbers = #tpu.dot_dimension_numbers<[1], [0], [0], [1], [0, 0, 1, 1], [], []>} : vector<8x256xf32>, vector<256x128xf32>, vector<8x128xf32> -> vector<8x128xf32>
      %52 = arith.mulf %32, %32 : vector<256x128xf32>
      %cst_34 = arith.constant dense<0.000000e+00> : vector<8x128xf32>
      %53 = tpu.matmul %50, %52, %cst_34 {dimension_numbers = #tpu.dot_dimension_numbers<[1], [0], [0], [1], [0, 0, 1, 1], [], []>} : vector<8x256xf32>, vector<256x128xf32>, vector<8x128xf32> -> vector<8x128xf32>
      %54 = arith.addf %51, %53 : vector<8x128xf32>
      %c0_35 = arith.constant 0 : index
      %c0_36 = arith.constant 0 : index
      %c0_37 = arith.constant 0 : index
      %55 = vector.load %arg11[%c0_35, %c0_36, %c0_37] : memref<1x8x128xf32, #tpu.memory_space<vmem>>, vector<1x8x128xf32>
      %56 = vector.shape_cast %55 : vector<1x8x128xf32> to vector<8x128xf32>
      %57 = vector.shape_cast %54 : vector<8x128xf32> to vector<1x8x128xf32>
      tpu.vector_store %arg11[%c0_35, %c0_36, %c0_37], %57 {strides = array<i32>} : memref<1x8x128xf32, #tpu.memory_space<vmem>>, vector<1x8x128xf32>,
    } else {
    }
    return
  }
  func.func @transform_0(%arg0: i32, %arg1: i32) -> (i32, i32) {
    %c0_i32 = arith.constant 0 : i32
    %c0_i32_0 = arith.constant 0 : i32
    %c0_i32_1 = arith.constant 0 : i32
    return %c0_i32, %c0_i32_0 : i32, i32
  }
  func.func @transform_1(%arg0: i32, %arg1: i32) -> (i32, i32) {
    %c0_i32 = arith.constant 0 : i32
    %c0_i32_0 = arith.constant 0 : i32
    %c0_i32_1 = arith.constant 0 : i32
    return %c0_i32, %c0_i32_0 : i32, i32
  }
  func.func @transform_2(%arg0: i32, %arg1: i32) -> (i32, i32) {
    %c0_i32 = arith.constant 0 : i32
    return %arg0, %arg1 : i32, i32
  }
  func.func @transform_3(%arg0: i32, %arg1: i32) -> (i32, i32) {
    %c0_i32 = arith.constant 0 : i32
    %c0_i32_0 = arith.constant 0 : i32
    return %arg1, %c0_i32 : i32, i32
  }
  func.func @transform_4(%arg0: i32, %arg1: i32) -> (i32, i32) {
    %c0_i32 = arith.constant 0 : i32
    %c0_i32_0 = arith.constant 0 : i32
    %c0_i32_1 = arith.constant 0 : i32
    return %c0_i32, %c0_i32_0 : i32, i32
  }
  func.func @transform_5(%arg0: i32, %arg1: i32) -> (i32, i32) {
    %c0_i32 = arith.constant 0 : i32
    %c0_i32_0 = arith.constant 0 : i32
    %c0_i32_1 = arith.constant 0 : i32
    return %c0_i32, %c0_i32_0 : i32, i32
  }
  func.func @transform_6(%arg0: i32, %arg1: i32) -> (i32, i32) {
    %c0_i32 = arith.constant 0 : i32
    %c0_i32_0 = arith.constant 0 : i32
    %c0_i32_1 = arith.constant 0 : i32
    return %c0_i32, %c0_i32_0 : i32, i32
  }
  func.func @transform_7(%arg0: i32, %arg1: i32) -> (i32, i32) {
    %c0_i32 = arith.constant 0 : i32
    %c0_i32_0 = arith.constant 0 : i32
    %c0_i32_1 = arith.constant 0 : i32
    return %c0_i32, %c0_i32_0 : i32, i32
  }
  func.func @transform_8(%arg0: i32, %arg1: i32) -> (i32, i32) {
    %c0_i32 = arith.constant 0 : i32
    %c0_i32_0 = arith.constant 0 : i32
    return %arg0, %c0_i32 : i32, i32
  }
  func.func @transform_9(%arg0: i32, %arg1: i32) -> (i32, i32, i32) {
    %c0_i32 = arith.constant 0 : i32
    %c0_i32_0 = arith.constant 0 : i32
    %c0_i32_1 = arith.constant 0 : i32
    return %arg0, %c0_i32, %c0_i32_0 : i32, i32, i32
  }
}

</mosaic_0001>

<bundles_post_ra>
// kernel: dense_layer_forward_padded.5
= control target key start
LH: loop header
LB: loop body
LE: loop exit
PB: predicated region body
PF: predicated region fallthrough
CT: control target
= control target key end

     0   :  { %s453_s12 = smov 0   ;;  %s612_s0 = inlined_call_operand.vmem [shape: f32[512,128], index: 0, kind: input, shape index: {}]   ;;  %s613_s1 = inlined_call_operand.vmem [shape: f32[1,128], index: 1, kind: input, shape index: {}]   ;;  %s614_s2 = inlined_call_operand.vmem [shape: f32[1,128], index: 2, kind: input, shape index: {}]   ;;  %s615_s3 = inlined_call_operand.vmem [shape: f32[512,128], index: 3, kind: output, shape index: {}]  }
   0x1 LB: > { %s404_s13 = sadd.s32 4294967295, %s431_s12   ;;  %p408_p0 = scmp.ge.s32.totalorder %s431_s12, 1  ;;  %s431_s12 = sphi %s453_s12, %s13_s12  }
   0x2   : > { %p138_p1 = scmp.lt.s32.totalorder %s431_s12, 3 }
   0x4   : > { %p139_p2 = pnand %p408_p0, %p138_p1 }
   0x5   : > { %s409_s14 = sshll.u32 (!%p139_p2), %s404_s13, 5  ;;  %v464_v0 = vld [vmem:[%s613_s1] ss:$0 sm:$0xff] (!%p139_p2) }
   0x6   : > { %142 = sbr.rel (%p139_p2) target bundleno = 46 (0x2e), region = 32  ;;  %p163_p3 = scmp.lt.s32.totalorder (!%p139_p2), %s409_s14, 63  ;;  %v474_v1 = vld [vmem:[%s614_s2] ss:$0 sm:$0xff] (!%p139_p2) }
   0xd   : > { %s617_s14 = smov (!%p163_p3, %s409_s14), 63 }
   0xe   : > { %s410_s15 = sshll.u32 %s617_s14, 3 }
   0xf   : > { %s469_s20 = scalar_lea.vmem %s612_s0, %s410_s15  ;;  %s497_s25 = scalar_lea.vmem %s615_s3, %s410_s15 }
  0x10   : > { %v174_v2 = vld [vmem:[%s469_s20] sm:$0xff]  ;;  %v175_v3 = vld [vmem:[%s469_s20 + $0x8] sm:$0xff]  ;;  %v176_v4 = vld [vmem:[%s469_s20 + $0x10] sm:$0xff] }
  0x11   : > { %v213_v5 = vmul.f32 %v464_v0, %v174_v2  ;;  %v214_v6 = vmul.f32 %v464_v0, %v175_v3  ;;  %v215_v7 = vmul.f32 %v464_v0, %v176_v4  ;;  %v177_v8 = vld [vmem:[%s469_s20 + $0x18] sm:$0xff]  ;;  %v178_v9 = vld [vmem:[%s469_s20 + $0x20] sm:$0xff]  ;;  %v179_v10 = vld [vmem:[%s469_s20 + $0x28] sm:$0xff] }
  0x12   : > { %v216_v11 = vmul.f32 %v464_v0, %v177_v8  ;;  %v217_v12 = vmul.f32 %v464_v0, %v178_v9  ;;  %v218_v13 = vmul.f32 %v464_v0, %v179_v10  ;;  %v180_v14 = vld [vmem:[%s469_s20 + $0x30] sm:$0xff]  ;;  %v181_v15 = vld [vmem:[%s469_s20 + $0x38] sm:$0xff]  ;;  %v182_v24 = vld [vmem:[%s469_s20 + $0x40] sm:$0xff] }
  0x13   : > { %v252_v16 = vadd.f32 %v474_v1, %v213_v5  ;;  %v253_v17 = vadd.f32 %v474_v1, %v214_v6  ;;  %v254_v18 = vadd.f32 %v474_v1, %v215_v7  ;;  %v219_v19 = vmul.f32 %v464_v0, %v180_v14  ;;  %v183_v25 = vld [vmem:[%s469_s20 + $0x48] sm:$0xff]  ;;  %v184_v26 = vld [vmem:[%s469_s20 + $0x50] sm:$0xff]  ;;  %v185_v31 = vld [vmem:[%s469_s20 + $0x58] sm:$0xff] }
  0x14   : > { %v255_v20 = vadd.f32 %v474_v1, %v216_v11  ;;  %v256_v21 = vadd.f32 %v474_v1, %v217_v12  ;;  %v257_v22 = vadd.f32 %v474_v1, %v218_v13  ;;  %v220_v23 = vmul.f32 %v464_v0, %v181_v15  ;;  %v186_v32 = vld [vmem:[%s469_s20 + $0x60] sm:$0xff]  ;;  %v187_v33 = vld [vmem:[%s469_s20 + $0x68] sm:$0xff]  ;;  %v188_v38 = vld [vmem:[%s469_s20 + $0x70] sm:$0xff] }
  0x15   : > { %v284_v27 = vmax.f32 %v252_v16, 0.0  ;;  %v285_v28 = vmax.f32 %v253_v17, 0.0  ;;  %v286_v29 = vmax.f32 %v254_v18, 0.0  ;;  %v258_v30 = vadd.f32 %v474_v1, %v219_v19  ;;  %v189_v43 = vld [vmem:[%s469_s20 + $0x78] sm:$0xff]  ;;  %v190_v56 = vld [vmem:[%s469_s20 + $0x80] sm:$0xff]  ;;  %v191_v57 = vld [vmem:[%s469_s20 + $0x88] sm:$0xff] }
  0x16   : > { %v287_v34 = vmax.f32 %v255_v20, 0.0  ;;  %v288_v35 = vmax.f32 %v256_v21, 0.0  ;;  %v289_v36 = vmax.f32 %v257_v22, 0.0  ;;  %v259_v37 = vadd.f32 %v474_v1, %v220_v23  ;;  %v192_v58 = vld [vmem:[%s469_s20 + $0x90] sm:$0xff]  ;;  %v193_v63 = vld [vmem:[%s469_s20 + $0x98] sm:$0xff]  ;;  %v194_v2 = vld [vmem:[%s469_s20 + $0xa0] sm:$0xff] }
  0x17   : > { %316 = vst [vmem:[%s497_s25] sm:$0xff] %v284_v27  ;;  %317 = vst [vmem:[%s497_s25 + $0x8] sm:$0xff] %v285_v28  ;;  %v290_v39 = vmax.f32 %v258_v30, 0.0  ;;  %v221_v40 = vmul.f32 %v464_v0, %v182_v24  ;;  %v222_v41 = vmul.f32 %v464_v0, %v183_v25  ;;  %v223_v42 = vmul.f32 %v464_v0, %v184_v26  ;;  %v195_v3 = vld [vmem:[%s469_s20 + $0xa8] sm:$0xff]  ;;  %v196_v8 = vld [vmem:[%s469_s20 + $0xb0] sm:$0xff] }
  0x18   : > { %318 = vst [vmem:[%s497_s25 + $0x10] sm:$0xff] %v286_v29  ;;  %319 = vst [vmem:[%s497_s25 + $0x18] sm:$0xff] %v287_v34  ;;  %v291_v44 = vmax.f32 %v259_v37, 0.0  ;;  %v224_v45 = vmul.f32 %v464_v0, %v185_v31  ;;  %v225_v46 = vmul.f32 %v464_v0, %v186_v32  ;;  %v226_v47 = vmul.f32 %v464_v0, %v187_v33  ;;  %v197_v13 = vld [vmem:[%s469_s20 + $0xb8] sm:$0xff]  ;;  %v198_v26 = vld [vmem:[%s469_s20 + $0xc0] sm:$0xff] }
  0x19   : > { %320 = vst [vmem:[%s497_s25 + $0x20] sm:$0xff] %v288_v35  ;;  %321 = vst [vmem:[%s497_s25 + $0x28] sm:$0xff] %v289_v36  ;;  %v260_v48 = vadd.f32 %v474_v1, %v221_v40  ;;  %v261_v49 = vadd.f32 %v474_v1, %v222_v41  ;;  %v262_v50 = vadd.f32 %v474_v1, %v223_v42  ;;  %v199_v27 = vld [vmem:[%s469_s20 + $0xc8] sm:$0xff]  ;;  %v200_v28 = vld [vmem:[%s469_s20 + $0xd0] sm:$0xff] }
  0x1a   : > { %322 = vst [vmem:[%s497_s25 + $0x30] sm:$0xff] %v290_v39  ;;  %v227_v51 = vmul.f32 %v464_v0, %v188_v38  ;;  %323 = vst [vmem:[%s497_s25 + $0x38] sm:$0xff] %v291_v44  ;;  %v263_v52 = vadd.f32 %v474_v1, %v224_v45  ;;  %v264_v53 = vadd.f32 %v474_v1, %v225_v46  ;;  %v201_v33 = vld [vmem:[%s469_s20 + $0xd8] sm:$0xff]  ;;  %v202_v34 = vld [vmem:[%s469_s20 + $0xe0] sm:$0xff] }
  0x1b   : > { %v265_v54 = vadd.f32 %v474_v1, %v226_v47  ;;  %v228_v55 = vmul.f32 %v464_v0, %v189_v43  ;;  %v292_v59 = vmax.f32 %v260_v48, 0.0  ;;  %v293_v60 = vmax.f32 %v261_v49, 0.0  ;;  %v203_v35 = vld [vmem:[%s469_s20 + $0xe8] sm:$0xff]  ;;  %v204_v40 = vld [vmem:[%s469_s20 + $0xf0] sm:$0xff]  ;;  %v205_v45 = vld [vmem:[%s469_s20 + $0xf8] sm:$0xff] }
  0x1c   : > { %v294_v61 = vmax.f32 %v262_v50, 0.0  ;;  %v266_v62 = vadd.f32 %v474_v1, %v227_v51  ;;  %v295_v4 = vmax.f32 %v263_v52, 0.0  ;;  %v296_v5 = vmax.f32 %v264_v53, 0.0 }
  0x1d   : > { %v297_v6 = vmax.f32 %v265_v54, 0.0  ;;  %v267_v7 = vadd.f32 %v474_v1, %v228_v55  ;;  %324 = vst [vmem:[%s497_s25 + $0x40] sm:$0xff] %v292_v59  ;;  %325 = vst [vmem:[%s497_s25 + $0x48] sm:$0xff] %v293_v60  ;;  %v229_v10 = vmul.f32 %v464_v0, %v190_v56  ;;  %v230_v11 = vmul.f32 %v464_v0, %v191_v57 }
  0x1e   : > { %326 = vst [vmem:[%s497_s25 + $0x50] sm:$0xff] %v294_v61  ;;  %v298_v9 = vmax.f32 %v266_v62, 0.0  ;;  %v231_v12 = vmul.f32 %v464_v0, %v192_v58  ;;  %327 = vst [vmem:[%s497_s25 + $0x58] sm:$0xff] %v295_v4  ;;  %v232_v15 = vmul.f32 %v464_v0, %v193_v63  ;;  %v233_v16 = vmul.f32 %v464_v0, %v194_v2 }
  0x1f   : > { %328 = vst [vmem:[%s497_s25 + $0x60] sm:$0xff] %v296_v5  ;;  %329 = vst [vmem:[%s497_s25 + $0x68] sm:$0xff] %v297_v6  ;;  %v299_v14 = vmax.f32 %v267_v7, 0.0  ;;  %v234_v17 = vmul.f32 %v464_v0, %v195_v3  ;;  %v268_v18 = vadd.f32 %v474_v1, %v229_v10  ;;  %v269_v19 = vadd.f32 %v474_v1, %v230_v11 }
  0x20   : > { %330 = vst [vmem:[%s497_s25 + $0x70] sm:$0xff] %v298_v9  ;;  %v270_v20 = vadd.f32 %v474_v1, %v231_v12  ;;  %v235_v21 = vmul.f32 %v464_v0, %v196_v8  ;;  %v271_v22 = vadd.f32 %v474_v1, %v232_v15  ;;  %v272_v23 = vadd.f32 %v474_v1, %v233_v16 }
  0x21   : > { %331 = vst [vmem:[%s497_s25 + $0x78] sm:$0xff] %v299_v14  ;;  %v273_v24 = vadd.f32 %v474_v1, %v234_v17  ;;  %v236_v25 = vmul.f32 %v464_v0, %v197_v13  ;;  %v300_v29 = vmax.f32 %v268_v18, 0.0  ;;  %v301_v30 = vmax.f32 %v269_v19, 0.0 }
  0x22   : > { %v302_v31 = vmax.f32 %v270_v20, 0.0  ;;  %v274_v32 = vadd.f32 %v474_v1, %v235_v21  ;;  %v303_v36 = vmax.f32 %v271_v22, 0.0  ;;  %v304_v37 = vmax.f32 %v272_v23, 0.0 }
  0x23   : > { %v305_v38 = vmax.f32 %v273_v24, 0.0  ;;  %v275_v39 = vadd.f32 %v474_v1, %v236_v25  ;;  %332 = vst [vmem:[%s497_s25 + $0x80] sm:$0xff] %v300_v29  ;;  %333 = vst [vmem:[%s497_s25 + $0x88] sm:$0xff] %v301_v30  ;;  %v237_v42 = vmul.f32 %v464_v0, %v198_v26  ;;  %v238_v43 = vmul.f32 %v464_v0, %v199_v27 }
  0x24   : > { %334 = vst [vmem:[%s497_s25 + $0x90] sm:$0xff] %v302_v31  ;;  %v306_v41 = vmax.f32 %v274_v32, 0.0  ;;  %v239_v44 = vmul.f32 %v464_v0, %v200_v28  ;;  %335 = vst [vmem:[%s497_s25 + $0x98] sm:$0xff] %v303_v36  ;;  %v240_v47 = vmul.f32 %v464_v0, %v201_v33  ;;  %v241_v48 = vmul.f32 %v464_v0, %v202_v34 }
  0x25   : > { %336 = vst [vmem:[%s497_s25 + $0xa0] sm:$0xff] %v304_v37  ;;  %337 = vst [vmem:[%s497_s25 + $0xa8] sm:$0xff] %v305_v38  ;;  %v307_v46 = vmax.f32 %v275_v39, 0.0  ;;  %v242_v49 = vmul.f32 %v464_v0, %v203_v35  ;;  %v276_v50 = vadd.f32 %v474_v1, %v237_v42  ;;  %v277_v51 = vadd.f32 %v474_v1, %v238_v43 }
  0x26   : > { %338 = vst [vmem:[%s497_s25 + $0xb0] sm:$0xff] %v306_v41  ;;  %v278_v52 = vadd.f32 %v474_v1, %v239_v44  ;;  %v243_v53 = vmul.f32 %v464_v0, %v204_v40  ;;  %v279_v54 = vadd.f32 %v474_v1, %v240_v47  ;;  %v280_v55 = vadd.f32 %v474_v1, %v241_v48 }
  0x27   : > { %339 = vst [vmem:[%s497_s25 + $0xb8] sm:$0xff] %v307_v46  ;;  %v281_v56 = vadd.f32 %v474_v1, %v242_v49  ;;  %v244_v57 = vmul.f32 %v464_v0, %v205_v45  ;;  %v308_v58 = vmax.f32 %v276_v50, 0.0  ;;  %v309_v59 = vmax.f32 %v277_v51, 0.0 }
  0x28   : > { %v310_v60 = vmax.f32 %v278_v52, 0.0  ;;  %v282_v61 = vadd.f32 %v474_v1, %v243_v53  ;;  %v311_v62 = vmax.f32 %v279_v54, 0.0  ;;  %v312_v63 = vmax.f32 %v280_v55, 0.0 }
  0x29   : > { %v313_v2 = vmax.f32 %v281_v56, 0.0  ;;  %v283_v3 = vadd.f32 %v474_v1, %v244_v57  ;;  %340 = vst [vmem:[%s497_s25 + $0xc0] sm:$0xff] %v308_v58  ;;  %341 = vst [vmem:[%s497_s25 + $0xc8] sm:$0xff] %v309_v59 }
  0x2a   : > { %342 = vst [vmem:[%s497_s25 + $0xd0] sm:$0xff] %v310_v60  ;;  %v314_v4 = vmax.f32 %v282_v61, 0.0  ;;  %343 = vst [vmem:[%s497_s25 + $0xd8] sm:$0xff] %v311_v62 }
  0x2b   : > { %344 = vst [vmem:[%s497_s25 + $0xe0] sm:$0xff] %v312_v63  ;;  %345 = vst [vmem:[%s497_s25 + $0xe8] sm:$0xff] %v313_v2  ;;  %v315_v0 = vmax.f32 %v283_v3, 0.0 }
  0x2c   : > { %346 = vst [vmem:[%s497_s25 + $0xf0] sm:$0xff] %v314_v4 }
  0x2d   : > { %347 = vst [vmem:[%s497_s25 + $0xf8] sm:$0xff] %v315_v0 }
  0x2e PF: > { %s13_s12 = sadd.s32 1, %s431_s12  }
  0x2f   : > { %p10_p4 = scmp.ge.s32.totalorder %s13_s12, 4  }
  0x31   :  { %12 = sbr.rel (!%p10_p4) target bundleno = 1 (0x1), region = 62 }

// kernel: dense_layer_forward_padded.3
= control target key start
LH: loop header
LB: loop body
LE: loop exit
PB: predicated region body
PF: predicated region fallthrough
CT: control target
= control target key end

     0   :  { %s3106_s0 = inlined_call_operand.vmem [shape: f32[1,128], index: 0, kind: input, shape index: {}]   ;;  %s3107_s1 = inlined_call_operand.vmem [shape: f32[1,128], index: 1, kind: input, shape index: {}]   ;;  %s3108_s2 = inlined_call_operand.hbm [shape: f32[512,512], index: 2, kind: input, shape index: {}]   ;;  %s3109_s3 = inlined_call_operand.vmem [shape: f32[512,128], index: 3, kind: input, shape index: {}]   ;;  %s3110_s4 = inlined_call_operand.vmem [shape: f32[8,128], index: 4, kind: input, shape index: {}]   ;;  %s3111_s5 = inlined_call_operand.hbm [shape: f32[1,128], index: 5, kind: input, shape index: {}]   ;;  %s3112_s6 = inlined_call_operand.vmem [shape: f32[128,128], index: 6, kind: input, shape index: {}]   ;;  %s3113_s7 = inlined_call_operand.hbm [shape: f32[1,128], index: 7, kind: input, shape index: {}]   ;;  %s3114_s8 = inlined_call_operand.vmem [shape: f32[512,128], index: 8, kind: output, shape index: {0}]   ;;  %s3115_s9 = inlined_call_operand.vmem [shape: f32[2,8,128], index: 9, kind: output, shape index: {1}]  }
   0x1   :  { %3122 = sst [smem:[#allocation11_spill]] %s3111_s5 }
   0x2   :  { %3123 = sst [smem:[#allocation12_spill]] %s3113_s7 }
   0x3   :  { %15 = vsyncpa [#allocation4], 0 }
   0x4   :  { %17 = vsyncpa [#allocation4 + $0x1], 0 }
   0x5   :  { %18 = vsyncpa [#allocation6], 0  ;;  %s2332_s28 = smov 0   ;;  %s2334_s4 = smov 0  }
   0x6   :  { %s2336_s29 = smov 0   ;;  %s2338_s30 = smov 0  }
   0x7   :  { %s2340_s10 = smov 0   ;;  %s2342_s11 = smov 0  }
   0x8   :  { %s2344_s12 = smov 0   ;;  %s2346_s13 = smov 0  }
   0x9 LB: > { %s1609_s14 = sadd.s32 4294967295, %s2271_s13   ;;  %p94_p0 = scmp.ne.s32.totalorder %s2251_s29, %s2247_s4  ;;  %s2271_s13 = sphi %s2346_s13, %s24_s13   ;;  %s2267_s12 = sphi %s2344_s12, %s3149_s12   ;;  %s2263_s11 = sphi %s2342_s11, %s3148_s11   ;;  %s2259_s10 = sphi %s2340_s10, %s3147_s10   ;;  %s2255_s30 = sphi %s2338_s30, %s3146_s30   ;;  %s2251_s29 = sphi %s2336_s29, %s3145_s29   ;;  %s2247_s4 = sphi %s2334_s4, %s3144_s4   ;;  %s2243_s28 = sphi %s2332_s28, %s3143_s28  }
   0xa   : > { %p95_p1 = scmp.eq.s32.totalorder %s2271_s13, 0  ;;  %p100_p2 = scmp.ne.s32.totalorder %s2247_s4, %s2243_s28 }
   0xb   : > { %p2376_p3 = scmp.eq.s32.totalorder %s1609_s14, 0  ;;  %p1611_p5 = scmp.ge.s32.totalorder %s2271_s13, 1 }
   0xc   : > { %p96_p4 = por %p95_p1, %p94_p0  ;;  %p273_p7 = scmp.lt.s32.totalorder %s2271_s13, 5 }
   0xd   : > { %s3124_s16 = scalar_select %p2376_p3, 1, 0 }
   0xe   : > { %p2383_p6 = por %p2376_p3, %p100_p2  ;;  %p2388_p8 = pnand %p1611_p5, %p273_p7 }
   0xf   : > { %s2273_s19 = smov [#allocation5]   ;;  %p2040_p10 = scmp.lt.s32.totalorder %s2271_s13, 4 }
  0x10   : > { %s3125_s17 = scalar_select %p2383_p6, 1, 0 }
  0x11   : > { %s3126_s18 = scalar_select %p2388_p8, 1, 0 }
  0x12   : > { %s295_s20 = sshll.u32 %s2273_s19, 4  ;;  %p2027_p9 = pneg %p2388_p8  ;;  %s296_s20 = int_to_ptr.vmem [resolvable:$true] %s295_s20 }
  0x13   : > { %p2401_p12 = pnand %p2040_p10, %p96_p4  ;;  %s2274_s23 = smov [#allocation7]  }
  0x14   : > { %p2397_p11 = pnand %p2027_p9, %p2376_p3  ;;  %s309_s24 = sshll.u32 %s2274_s23, 4  ;;  %s310_s24 = int_to_ptr.vmem [resolvable:$true] %s309_s24 }
  0x15   : > { %s3128_s22 = scalar_select %p2401_p12, 1, 0 }
  0x16   : > { %s3129_s5 = sld [smem:[#allocation11_spill]]  ;;  %p2117_p0 = pneg %p2397_p11 }
  0x1c   : > { %s2115_s1 = scalar_lea.hbm %s3129_s5, 16 }
  0x1d   : > { %p2116_p13 = scmp.ne.s32.totalorder %s3129_s5, %s2115_s1  ;;  %p2122_p4 = scmp.lt.u32.totalorder %s2115_s1, %s3129_s5 }
  0x1f   : > { %p2118_p1 = pnand %p2117_p0, %p2116_p13 }
  0x21   : > { %p2119_p2 = pneg %p2118_p1 }
  0x23   : > { %p2124_p5 = pnand %p2122_p4, %p2119_p2 }
  0x25   : > { %2127 = shalt.err (!%p2124_p5)
}
  0x26   : > { %s2128_s19 = scalar_lea.vmem %s296_s20, 16  ;;  %s2135_s23 = scalar_lea.vmem %s296_s20, 32 }
  0x27   : > { %p2129_p7 = scmp.ne.s32.totalorder %s296_s20, %s2128_s19  ;;  %p2136_p3 = scmp.lt.s32.totalorder %s296_s20, %s296_s20 }
  0x28   : > { %p2137_p6 = scmp.lt.s32.totalorder %s2135_s23, %s2128_s19 }
  0x29   : > { %p2131_p9 = pnand %p2129_p7, %p2117_p0 }
  0x2a   : > { %p2138_p8 = por %p2137_p6, %p2136_p3 }
  0x2b   : > { %p2132_p10 = pneg %p2131_p9 }
  0x2d   : > { %p2139_p12 = pnand %p2138_p8, %p2132_p10 }
  0x2f   : > { %2142 = shalt.err (!%p2139_p12)
}
  0x30   : > { %2030 = dma.hbm_to_vmem [thread:$0]  (!%p2397_p11), %s3129_s5, 16, %s296_s20, [#allocation6]  }
  0x31   : > { %s3130_s7 = sld [smem:[#allocation12_spill]] }
  0x37   : > { %s2143_s27 = scalar_lea.hbm %s3130_s7, 16 }
  0x38   : > { %p2144_p13 = scmp.ne.s32.totalorder %s3130_s7, %s2143_s27  ;;  %p2150_p8 = scmp.lt.u32.totalorder %s2143_s27, %s3130_s7 }
  0x3a   : > { %p2146_p3 = pnand %p2144_p13, %p2117_p0 }
  0x3c   : > { %p2147_p6 = pneg %p2146_p3 }
  0x3e   : > { %p2152_p12 = pnand %p2150_p8, %p2147_p6 }
  0x40   : > { %2155 = shalt.err (!%p2152_p12)
}
  0x41   : > { %s2156_s20 = scalar_lea.vmem %s310_s24, 16  ;;  %s2163_s0 = scalar_lea.vmem %s310_s24, 32 }
  0x42   : > { %p2157_p1 = scmp.ne.s32.totalorder %s310_s24, %s2156_s20  ;;  %p2164_p5 = scmp.lt.s32.totalorder %s310_s24, %s310_s24 }
  0x43   : > { %p2165_p7 = scmp.lt.s32.totalorder %s2163_s0, %s2156_s20 }
  0x44   : > { %p2159_p2 = pnand %p2157_p1, %p2117_p0 }
  0x45   : > { %p2166_p9 = por %p2165_p7, %p2164_p5 }
  0x46   : > { %p2160_p4 = pneg %p2159_p2 }
  0x48   : > { %p2167_p10 = pnand %p2166_p9, %p2160_p4 }
  0x4a   : > { %2170 = shalt.err (!%p2167_p10)
}
  0x4b   : > { %2033 = dma.hbm_to_vmem [thread:$0]  (!%p2397_p11), %s3130_s7, 16, %s310_s24, [#allocation6]  }
  0x4c   : > { %s36_s26 = sadd.s32 1, %s2267_s12  ;;  %s33_s27 = sadd.s32 1, %s2263_s11 }
  0x4d   : > { %s320_s28 = sand.u32 1, %s2251_s29   ;;  %p34_p0 = scmp.ge.s32.totalorder %s33_s27, 2 }
  0x4e   : > { %s1615_s14 = sshll.u32 %s320_s28, 9  ;;  %s1617_s19 = sshll.u32 %s2263_s11, 1 }
  0x4f   : > { %s3151_s27 = smov (%p34_p0, %s33_s27), 0  ;;  %s3153_s26 = smov (!%p34_p0, %s36_s26), %s2267_s12 }
  0x50   : > { %3131 = sst [smem:[#allocation10_spill]] %s3151_s27  ;;  %s83_s21 = ssub.s32 %s2263_s11, %s3151_s27 }
  0x51   : > { %p38_p13 = scmp.ge.s32.totalorder %s3153_s26, 2  ;;  %s1642_s23 = sshll.u32 %s2267_s12, 7 }
  0x52   : > { %s331_s20 = sadd.s32 %s1642_s23, %s1617_s19  ;;  %s324_s24 = scalar_lea.vmem [#allocation3], %s1615_s14 }
  0x53   : > { %s334_s0 = sshll.u32 %s324_s24, 4  ;;  %s3155_s26 = smov (%p38_p13, %s3153_s26), 0  ;;  %s2459_s0 = int_to_ptr.vmem [resolvable:$true] %s334_s0 }
  0x54   : > { %s1619_s25 = sshll.u32 %s331_s20, 7  ;;  %s82_s1 = ssub.s32 %s2267_s12, %s3155_s26 }
  0x55   : > { %s2466_s7 = scalar_lea.hbm %s3108_s2, %s1619_s25  ;;  %s84_s27 = sor.u32 %s83_s21, %s82_s1 }
  0x56   : > { %p85_p11 = scmp.eq.s32.totalorder %s84_s27, 0  ;;  %s3132_s14 = sadd.s32 1, %s2251_s29 }
  0x57   : > { %s2473_s23 = scalar_lea.sflag [#allocation4], %s320_s28  ;;  %s2171_s20 = scalar_lea.hbm %s2466_s7, 8192 }
  0x58   : > { %s2471_s19 = scalar_select %p85_p11, %s2251_s29, %s3132_s14  }
  0x59   : > { %p2172_p3 = scmp.ne.s32.totalorder %s2466_s7, %s2171_s20  ;;  %p3133_p6 = scmp.ne.s32.totalorder %s3128_s22, 0 }
  0x5a   : > { %s2176_s24 = scalar_lea.hbm %s3108_s2, 32768  ;;  %p2177_p2 = scmp.lt.u32.totalorder %s2466_s7, %s3108_s2 }
  0x5b   : > { %p2173_p8 = pneg %p3133_p6  ;;  %p2178_p4 = scmp.lt.u32.totalorder %s2176_s24, %s2171_s20 }
  0x5c   : > { %p2180_p7 = scmp.lt.u32.totalorder %s2171_s20, %s2466_s7 }
  0x5d   : > { %p2174_p12 = pnand %p2173_p8, %p2172_p3  ;;  %p2179_p5 = por %p2178_p4, %p2177_p2 }
  0x5f   : > { %p2175_p1 = pneg %p2174_p12  ;;  %p2181_p9 = por %p2180_p7, %p2179_p5 }
  0x61   : > { %p2182_p10 = pnand %p2181_p9, %p2175_p1 }
  0x63   : > { %2185 = shalt.err (!%p2182_p10)
}
  0x64   : > { %s2186_s27 = scalar_lea.vmem %s2459_s0, 8192  ;;  %s2275_s28 = smov [#allocation3]  }
  0x65   : > { %p2187_p0 = scmp.ne.s32.totalorder %s2459_s0, %s2186_s27  ;;  %s2191_s1 = sshll.u32 %s2275_s28, 4  ;;  %s2192_s1 = int_to_ptr.vmem [resolvable:$false] %s2191_s1 }
  0x66   : > { %s2193_s14 = scalar_lea.vmem %s2192_s1, 16384  ;;  %p2194_p3 = scmp.lt.s32.totalorder %s2459_s0, %s2192_s1 }
  0x67   : > { %p2189_p13 = pnand %p2187_p0, %p2173_p8  ;;  %p2195_p12 = scmp.lt.s32.totalorder %s2193_s14, %s2186_s27 }
  0x69   : > { %p2190_p11 = pneg %p2189_p13  ;;  %p2196_p2 = por %p2195_p12, %p2194_p3 }
  0x6b   : > { %p2197_p4 = pnand %p2196_p2, %p2190_p11 }
  0x6d   : > { %2200 = shalt.err (!%p2197_p4)
}
  0x6e   : > { %s2276_s20 = smov 512   ;;  %s2277_s5 = smov 256  }
  0x6f   : > { %s2278_s15 = smov 16   ;;  %p3134_p8 = scmp.ne.s32.totalorder %s3126_s18, 0 }
  0x70   : > { %2037 = dma.hbm_to_vmem [thread:$0]  (!%p3133_p6), %s2466_s7, 8192, %s2459_s0, %s2473_s23, %s2276_s20, %s2277_s5, %s2278_s15  }
  0x71   : > { %355 = sbr.rel (%p3134_p8) target bundleno = 1024 (0x400), region = 52  ;;  %s357_s24 = sand.u32 (!%p3134_p8), 1, %s2247_s4  }
  0x72   : > { %s1621_s25 = sshll.u32 (!%p3134_p8), %s357_s24, 9  ;;  %s358_s21 = scalar_lea.sflag (!%p3134_p8), [#allocation4], %s357_s24 }
  0x73   : > { %s2504_s27 = scalar_lea.vmem (!%p3134_p8), [#allocation3], %s1621_s25  ;;  %p3135_p1 = scmp.ne.s32.totalorder (!%p3134_p8), %s3125_s17, 0 }
  0x78   : > { %2234 = dma.done.wait (%p3135_p1), %s358_s21, 8192  }
  0x79   : > { %2236 = vsyncadd (%p3135_p1), %s358_s21, 4294959104  ;;  %p3136_p5 = scmp.ne.s32.totalorder %s3124_s16, 0 }
  0x7b   : > { %2238 = dma.done.wait (%p3136_p5), [#allocation6], 32  }
  0x7c   : > { %2240 = vsyncadd (%p3136_p5), [#allocation6], 4294967264  ;;  %s1624_s7 = sshll.u32 %s2255_s30, 5  ;;  %s1626_s18 = sshll.u32 %s2259_s10, 5 }
  0x7d   : > { %p416_p6 = scmp.lt.s32.totalorder %s1624_s7, 63  ;;  %p422_p7 = scmp.lt.s32.totalorder %s1626_s18, 63 }
  0x7e   : > { %p427_p9 = scmp.lt.s32.totalorder %s2259_s10, 1  ;;  %p1629_p10 = scmp.ne.s32.totalorder %s2255_s30, 0 }
  0x7f   : > { %s3157_s7 = smov (!%p416_p6, %s1624_s7), 63  ;;  %s3159_s18 = smov (!%p422_p7, %s1626_s18), 63 }
  0x80   : > { %s1625_s22 = sshll.u32 %s3157_s7, 3  ;;  %s1627_s28 = sshll.u32 %s3159_s18, 3  ;;  %v2279_v0 = vmov (!%p1629_p10), 0.0  }
  0x81   : > { %s2520_s23 = scalar_lea.vmem %s3109_s3, %s1625_s22  ;;  %s2525_s14 = scalar_lea.vmem %s3114_s8, %s1627_s28  ;;  %435 = vst [vmem:[#allocation2] sm:$0xff] (!%p1629_p10), %v2279_v0  ;;  %436 = vst [vmem:[#allocation2 + $0x8] sm:$0xff] (!%p1629_p10), %v2279_v0 }
  0x82   : > { %s428_s20 = scalar_select %p427_p9, %s2259_s10, 1 }
  0x83   : > { %434 = sbr.rel (%p1629_p10) target bundleno = 146 (0x92), region = 68  ;;  %437 = vst [vmem:[#allocation2 + $0x10] sm:$0xff] (!%p1629_p10), %v2279_v0  ;;  %438 = vst [vmem:[#allocation2 + $0x18] sm:$0xff] (!%p1629_p10), %v2279_v0 }
  0x84   : > { %s1628_s5 = sshll.u32 %s428_s20, 3  ;;  %439 = vst [vmem:[#allocation2 + $0x20] sm:$0xff] (!%p1629_p10), %v2279_v0  ;;  %440 = vst [vmem:[#allocation2 + $0x28] sm:$0xff] (!%p1629_p10), %v2279_v0 }
  0x85   : > { %s2531_s25 = scalar_lea.vmem %s3115_s9, %s1628_s5  ;;  %441 = vst [vmem:[#allocation2 + $0x30] sm:$0xff] (!%p1629_p10), %v2279_v0  ;;  %442 = vst [vmem:[#allocation2 + $0x38] sm:$0xff] (!%p1629_p10), %v2279_v0 }
  0x86   : > { %443 = vst [vmem:[#allocation2 + $0x40] sm:$0xff] (!%p1629_p10), %v2279_v0  ;;  %444 = vst [vmem:[#allocation2 + $0x48] sm:$0xff] (!%p1629_p10), %v2279_v0 }
  0x87   : > { %445 = vst [vmem:[#allocation2 + $0x50] sm:$0xff] (!%p1629_p10), %v2279_v0  ;;  %446 = vst [vmem:[#allocation2 + $0x58] sm:$0xff] (!%p1629_p10), %v2279_v0 }
  0x88   : > { %447 = vst [vmem:[#allocation2 + $0x60] sm:$0xff] (!%p1629_p10), %v2279_v0  ;;  %448 = vst [vmem:[#allocation2 + $0x68] sm:$0xff] (!%p1629_p10), %v2279_v0 }
  0x89   : > { %449 = vst [vmem:[#allocation2 + $0x70] sm:$0xff] (!%p1629_p10), %v2279_v0  ;;  %450 = vst [vmem:[#allocation2 + $0x78] sm:$0xff] (!%p1629_p10), %v2279_v0 }
  0x8a   : > { %451 = vst [vmem:[#allocation2 + $0x80] sm:$0xff] %v2279_v0  ;;  %452 = vst [vmem:[#allocation2 + $0x88] sm:$0xff] %v2279_v0 }
  0x8b   : > { %453 = vst [vmem:[#allocation2 + $0x90] sm:$0xff] %v2279_v0  ;;  %454 = vst [vmem:[#allocation2 + $0x98] sm:$0xff] %v2279_v0 }
  0x8c   : > { %455 = vst [vmem:[#allocation2 + $0xa0] sm:$0xff] %v2279_v0  ;;  %456 = vst [vmem:[#allocation2 + $0xa8] sm:$0xff] %v2279_v0 }
  0x8d   : > { %457 = vst [vmem:[#allocation2 + $0xb0] sm:$0xff] %v2279_v0  ;;  %458 = vst [vmem:[#allocation2 + $0xb8] sm:$0xff] %v2279_v0 }
  0x8e   : > { %459 = vst [vmem:[#allocation2 + $0xc0] sm:$0xff] %v2279_v0  ;;  %460 = vst [vmem:[#allocation2 + $0xc8] sm:$0xff] %v2279_v0 }
  0x8f   : > { %461 = vst [vmem:[#allocation2 + $0xd0] sm:$0xff] %v2279_v0  ;;  %462 = vst [vmem:[#allocation2 + $0xd8] sm:$0xff] %v2279_v0 }
  0x90   : > { %463 = vst [vmem:[#allocation2 + $0xe0] sm:$0xff] %v2279_v0  ;;  %464 = vst [vmem:[#allocation2 + $0xe8] sm:$0xff] %v2279_v0 }
  0x91   : > { %465 = vst [vmem:[#allocation2 + $0xf0] sm:$0xff] %v2279_v0  ;;  %466 = vst [vmem:[#allocation2 + $0xf8] sm:$0xff] %v2279_v0 }
  0x92 PF: > { %v467_v1 = vld [vmem:[%s2520_s23] sm:$0xff]  ;;  %v468_v2 = vld [vmem:[%s2520_s23 + $0x8] sm:$0xff]  ;;  %v469_v3 = vld [vmem:[%s2520_s23 + $0x10] sm:$0xff]  ;;  %v2280_v4 = vmov 0.0|0.0   ;;  %p1630_p0 = scmp.ne.s32.totalorder %s2255_s30, 1 }
  0x93   : > { %1841 = vmatprep.subr.bf16.mxu0 %v2280_v4  ;;  %1985 = vmatprep.subr.bf16.mxu1 %v2280_v4  ;;  %v1842_v5 = vpack.c.bf16 %v468_v2, %v467_v1  ;;  %v470_v6 = vld [vmem:[%s2520_s23 + $0x18] sm:$0xff]  ;;  %v471_v8 = vld [vmem:[%s2520_s23 + $0x20] sm:$0xff]  ;;  %v472_v9 = vld [vmem:[%s2520_s23 + $0x28] sm:$0xff]  ;;  %s1633_s21 = sshll.u32 (!%p1630_p0), %s2259_s10, 8 }
  0x94   : > { %v1845_v7 = vpack.c.bf16 %v470_v6, %v469_v3  ;;  %v1848_v10 = vpack.c.bf16 %v472_v9, %v471_v8  ;;  %v473_v11 = vld [vmem:[%s2520_s23 + $0x30] sm:$0xff]  ;;  %v474_v12 = vld [vmem:[%s2520_s23 + $0x38] sm:$0xff]  ;;  %v532_v13 = vld [vmem:[%s2504_s27 + $0x8] sm:$0xff] }
  0x95   : > { %1843 = vmatpush1.bf16.msra.mxu0 %v1842_v5  ;;  %2001 = vmatpush1.bf16.msra.mxu1 %v1842_v5  ;;  %v1851_v14 = vpack.c.bf16 %v474_v12, %v473_v11  ;;  %v564_v15 = vld [vmem:[%s2504_s27 + $0x108] sm:$0xff]  ;;  %v475_v16 = vld [vmem:[%s2520_s23 + $0x40] sm:$0xff]  ;;  %v477_v19 = vld [vmem:[%s2520_s23 + $0x50] sm:$0xff] }
  0x96   : > { %1844 = vmatprep.subr.bf16.mxu0 %v2280_v4  ;;  %1986 = vmatprep.subr.bf16.mxu1 %v2280_v4  ;;  %v476_v17 = vld [vmem:[%s2520_s23 + $0x48] sm:$0xff]  ;;  %v478_v20 = vld [vmem:[%s2520_s23 + $0x58] sm:$0xff]  ;;  %v479_v22 = vld [vmem:[%s2520_s23 + $0x60] sm:$0xff] }
  0x97   : > { %659 = vmatprep.mubr.f32.mxu0 %v532_v13  ;;  %739 = vmatprep.mubr.f32.mxu1 %v564_v15  ;;  %v1854_v18 = vpack.c.bf16 %v476_v17, %v475_v16  ;;  %v1857_v21 = vpack.c.bf16 %v478_v20, %v477_v19  ;;  %v480_v23 = vld [vmem:[%s2520_s23 + $0x68] sm:$0xff]  ;;  %v481_v25 = vld [vmem:[%s2520_s23 + $0x70] sm:$0xff]  ;;  %v482_v26 = vld [vmem:[%s2520_s23 + $0x78] sm:$0xff] }
  0x98   : > { %v1860_v24 = vpack.c.bf16 %v480_v23, %v479_v22  ;;  %v1863_v27 = vpack.c.bf16 %v482_v26, %v481_v25  ;;  %v483_v28 = vld [vmem:[%s2520_s23 + $0x80] sm:$0xff]  ;;  %v484_v29 = vld [vmem:[%s2520_s23 + $0x88] sm:$0xff]  ;;  %v485_v31 = vld [vmem:[%s2520_s23 + $0x90] sm:$0xff] }
  0x99   : > { %1846 = vmatpush1.bf16.msra.mxu0 %v1845_v7  ;;  %2002 = vmatpush1.bf16.msra.mxu1 %v1845_v7  ;;  %v1866_v30 = vpack.c.bf16 %v484_v29, %v483_v28  ;;  %v486_v32 = vld [vmem:[%s2520_s23 + $0x98] sm:$0xff]  ;;  %v487_v34 = vld [vmem:[%s2520_s23 + $0xa0] sm:$0xff]  ;;  %v488_v35 = vld [vmem:[%s2520_s23 + $0xa8] sm:$0xff] }
  0x9a   : > { %1847 = vmatprep.subr.bf16.mxu0 %v2280_v4  ;;  %1987 = vmatprep.subr.bf16.mxu1 %v2280_v4  ;;  %v1869_v33 = vpack.c.bf16 %v486_v32, %v485_v31  ;;  %v1872_v36 = vpack.c.bf16 %v488_v35, %v487_v34  ;;  %v489_v37 = vld [vmem:[%s2520_s23 + $0xb0] sm:$0xff]  ;;  %v490_v38 = vld [vmem:[%s2520_s23 + $0xb8] sm:$0xff]  ;;  %v491_v40 = vld [vmem:[%s2520_s23 + $0xc0] sm:$0xff] }
  0x9b   : > { %v1875_v39 = vpack.c.bf16 %v490_v38, %v489_v37  ;;  %v492_v41 = vld [vmem:[%s2520_s23 + $0xc8] sm:$0xff]  ;;  %v493_v43 = vld [vmem:[%s2520_s23 + $0xd0] sm:$0xff]  ;;  %v494_v44 = vld [vmem:[%s2520_s23 + $0xd8] sm:$0xff] }
  0x9c   : > { %v1878_v42 = vpack.c.bf16 %v492_v41, %v491_v40  ;;  %v1881_v45 = vpack.c.bf16 %v494_v44, %v493_v43  ;;  %v495_v46 = vld [vmem:[%s2520_s23 + $0xe0] sm:$0xff]  ;;  %v496_v47 = vld [vmem:[%s2520_s23 + $0xe8] sm:$0xff]  ;;  %v497_v49 = vld [vmem:[%s2520_s23 + $0xf0] sm:$0xff] }
  0x9d   : > { %1849 = vmatpush1.bf16.msra.mxu0 %v1848_v10  ;;  %2003 = vmatpush1.bf16.msra.mxu1 %v1848_v10  ;;  %v1884_v48 = vpack.c.bf16 %v496_v47, %v495_v46  ;;  %v498_v50 = vld [vmem:[%s2520_s23 + $0xf8] sm:$0xff]  ;;  %v531_v52 = vld [vmem:[%s2504_s27] sm:$0xff]  ;;  %v533_v56 = vld [vmem:[%s2504_s27 + $0x10] sm:$0xff] }
  0x9e   : > { %1850 = vmatprep.subr.bf16.mxu0 %v2280_v4  ;;  %1988 = vmatprep.subr.bf16.mxu1 %v2280_v4  ;;  %v1887_v51 = vpack.c.bf16 %v498_v50, %v497_v49  ;;  %v563_v53 = vld [vmem:[%s2504_s27 + $0x100] sm:$0xff]  ;;  %v534_v54 = vld [vmem:[%s2504_s27 + $0x18] sm:$0xff]  ;;  %v565_v57 = vld [vmem:[%s2504_s27 + $0x110] sm:$0xff] }
  0x9f   : > { %v566_v55 = vld [vmem:[%s2504_s27 + $0x118] sm:$0xff]  ;;  %v536_v58 = vld [vmem:[%s2504_s27 + $0x28] sm:$0xff]  ;;  %v535_v60 = vld [vmem:[%s2504_s27 + $0x20] sm:$0xff] }
  0xa0   : > { %v568_v59 = vld [vmem:[%s2504_s27 + $0x128] sm:$0xff]  ;;  %v567_v61 = vld [vmem:[%s2504_s27 + $0x120] sm:$0xff]  ;;  %v538_v62 = vld [vmem:[%s2504_s27 + $0x38] sm:$0xff] }
  0xa1   : > { %1852 = vmatpush1.bf16.msra.mxu0 %v1851_v14  ;;  %2004 = vmatpush1.bf16.msra.mxu1 %v1851_v14  ;;  %v570_v63 = vld [vmem:[%s2504_s27 + $0x138] sm:$0xff]  ;;  %v537_v0 = vld [vmem:[%s2504_s27 + $0x30] sm:$0xff]  ;;  %v540_v2 = vld [vmem:[%s2504_s27 + $0x48] sm:$0xff] }
  0xa2   : > { %1853 = vmatprep.subr.bf16.mxu0 %v2280_v4  ;;  %1989 = vmatprep.subr.bf16.mxu1 %v2280_v4  ;;  %v569_v1 = vld [vmem:[%s2504_s27 + $0x130] sm:$0xff]  ;;  %v572_v3 = vld [vmem:[%s2504_s27 + $0x148] sm:$0xff]  ;;  %v571_v5 = vld [vmem:[%s2504_s27 + $0x140] sm:$0xff] }
  0xa3   : > { %v542_v6 = vld [vmem:[%s2504_s27 + $0x58] sm:$0xff]  ;;  %v541_v8 = vld [vmem:[%s2504_s27 + $0x50] sm:$0xff]  ;;  %v544_v10 = vld [vmem:[%s2504_s27 + $0x68] sm:$0xff] }
  0xa4   : > { %v574_v7 = vld [vmem:[%s2504_s27 + $0x158] sm:$0xff]  ;;  %v573_v9 = vld [vmem:[%s2504_s27 + $0x150] sm:$0xff]  ;;  %v576_v11 = vld [vmem:[%s2504_s27 + $0x168] sm:$0xff] }
  0xa5   : > { %1855 = vmatpush1.bf16.msra.mxu0 %v1854_v18  ;;  %2005 = vmatpush1.bf16.msra.mxu1 %v1854_v18  ;;  %v543_v12 = vld [vmem:[%s2504_s27 + $0x60] sm:$0xff]  ;;  %v546_v14 = vld [vmem:[%s2504_s27 + $0x78] sm:$0xff]  ;;  %v545_v16 = vld [vmem:[%s2504_s27 + $0x70] sm:$0xff] }
  0xa6   : > { %1856 = vmatprep.subr.bf16.mxu0 %v2280_v4  ;;  %1990 = vmatprep.subr.bf16.mxu1 %v2280_v4  ;;  %v575_v13 = vld [vmem:[%s2504_s27 + $0x160] sm:$0xff]  ;;  %v578_v15 = vld [vmem:[%s2504_s27 + $0x178] sm:$0xff]  ;;  %v577_v17 = vld [vmem:[%s2504_s27 + $0x170] sm:$0xff] }
  0xa7   : > { %v548_v18 = vld [vmem:[%s2504_s27 + $0x88] sm:$0xff]  ;;  %v547_v20 = vld [vmem:[%s2504_s27 + $0x80] sm:$0xff]  ;;  %v550_v22 = vld [vmem:[%s2504_s27 + $0x98] sm:$0xff] }
  0xa8   : > { %v580_v19 = vld [vmem:[%s2504_s27 + $0x188] sm:$0xff]  ;;  %v582_v23 = vld [vmem:[%s2504_s27 + $0x198] sm:$0xff]  ;;  %v581_v25 = vld [vmem:[%s2504_s27 + $0x190] sm:$0xff] }
  0xa9   : > { %1858 = vmatpush1.bf16.msra.mxu0 %v1857_v21  ;;  %2006 = vmatpush1.bf16.msra.mxu1 %v1857_v21  ;;  %v579_v21 = vld [vmem:[%s2504_s27 + $0x180] sm:$0xff]  ;;  %v552_v26 = vld [vmem:[%s2504_s27 + $0xa8] sm:$0xff]  ;;  %v586_v31 = vld [vmem:[%s2504_s27 + $0x1b8] sm:$0xff] }
  0xaa   : > { %1859 = vmatprep.subr.bf16.mxu0 %v2280_v4  ;;  %1991 = vmatprep.subr.bf16.mxu1 %v2280_v4  ;;  %v551_v28 = vld [vmem:[%s2504_s27 + $0xa0] sm:$0xff]  ;;  %v553_v32 = vld [vmem:[%s2504_s27 + $0xb0] sm:$0xff]  ;;  %v556_v34 = vld [vmem:[%s2504_s27 + $0xc8] sm:$0xff] }
  0xab   : > { %v583_v29 = vld [vmem:[%s2504_s27 + $0x1a0] sm:$0xff]  ;;  %v588_v35 = vld [vmem:[%s2504_s27 + $0x1c8] sm:$0xff]  ;;  %v558_v38 = vld [vmem:[%s2504_s27 + $0xd8] sm:$0xff] }
  0xac   : > { %v587_v37 = vld [vmem:[%s2504_s27 + $0x1c0] sm:$0xff]  ;;  %v557_v40 = vld [vmem:[%s2504_s27 + $0xd0] sm:$0xff]  ;;  %v592_v43 = vld [vmem:[%s2504_s27 + $0x1e8] sm:$0xff] }
  0xad   : > { %1861 = vmatpush1.bf16.msra.mxu0 %v1860_v24  ;;  %2007 = vmatpush1.bf16.msra.mxu1 %v1860_v24  ;;  %v549_v24 = vld [vmem:[%s2504_s27 + $0x90] sm:$0xff]  ;;  %v559_v44 = vld [vmem:[%s2504_s27 + $0xe0] sm:$0xff]  ;;  %v562_v46 = vld [vmem:[%s2504_s27 + $0xf8] sm:$0xff] }
  0xae   : > { %1862 = vmatprep.subr.bf16.mxu0 %v2280_v4  ;;  %1992 = vmatprep.subr.bf16.mxu1 %v2280_v4  ;;  %v589_v41 = vld [vmem:[%s2504_s27 + $0x1d0] sm:$0xff]  ;;  %v594_v47 = vld [vmem:[%s2504_s27 + $0x1f8] sm:$0xff]  ;;  %v499_v50 = vld [vmem:[#allocation2] sm:$0xff] }
  0xaf   : > { %v593_v49 = vld [vmem:[%s2504_s27 + $0x1f0] sm:$0xff] }
  0xb1   : > { %1864 = vmatpush1.bf16.msra.mxu0 %v1863_v27  ;;  %2008 = vmatpush1.bf16.msra.mxu1 %v1863_v27  ;;  %v584_v27 = vld [vmem:[%s2504_s27 + $0x1a8] sm:$0xff] }
  0xb2   : > { %1865 = vmatprep.subr.bf16.mxu0 %v2280_v4  ;;  %1993 = vmatprep.subr.bf16.mxu1 %v2280_v4 }
  0xb5   : > { %1867 = vmatpush1.bf16.msra.mxu0 %v1866_v30  ;;  %2009 = vmatpush1.bf16.msra.mxu1 %v1866_v30  ;;  %v554_v30 = vld [vmem:[%s2504_s27 + $0xb8] sm:$0xff] }
  0xb6   : > { %1868 = vmatprep.subr.bf16.mxu0 %v2280_v4  ;;  %1994 = vmatprep.subr.bf16.mxu1 %v2280_v4 }
  0xb9   : > { %1870 = vmatpush1.bf16.msra.mxu0 %v1869_v33  ;;  %2010 = vmatpush1.bf16.msra.mxu1 %v1869_v33  ;;  %v585_v33 = vld [vmem:[%s2504_s27 + $0x1b0] sm:$0xff] }
  0xba   : > { %1871 = vmatprep.subr.bf16.mxu0 %v2280_v4  ;;  %1995 = vmatprep.subr.bf16.mxu1 %v2280_v4 }
  0xbd   : > { %1873 = vmatpush1.bf16.msra.mxu0 %v1872_v36  ;;  %2011 = vmatpush1.bf16.msra.mxu1 %v1872_v36  ;;  %v555_v36 = vld [vmem:[%s2504_s27 + $0xc0] sm:$0xff] }
  0xbe   : > { %1874 = vmatprep.subr.bf16.mxu0 %v2280_v4  ;;  %1996 = vmatprep.subr.bf16.mxu1 %v2280_v4 }
  0xc1   : > { %1876 = vmatpush1.bf16.msra.mxu0 %v1875_v39  ;;  %2012 = vmatpush1.bf16.msra.mxu1 %v1875_v39  ;;  %v590_v39 = vld [vmem:[%s2504_s27 + $0x1d8] sm:$0xff] }
  0xc2   : > { %1877 = vmatprep.subr.bf16.mxu0 %v2280_v4  ;;  %1997 = vmatprep.subr.bf16.mxu1 %v2280_v4 }
  0xc5   : > { %1879 = vmatpush1.bf16.msra.mxu0 %v1878_v42  ;;  %2013 = vmatpush1.bf16.msra.mxu1 %v1878_v42  ;;  %v560_v42 = vld [vmem:[%s2504_s27 + $0xe8] sm:$0xff] }
  0xc6   : > { %1880 = vmatprep.subr.bf16.mxu0 %v2280_v4  ;;  %1998 = vmatprep.subr.bf16.mxu1 %v2280_v4 }
  0xc9   : > { %1882 = vmatpush1.bf16.msra.mxu0 %v1881_v45  ;;  %2014 = vmatpush1.bf16.msra.mxu1 %v1881_v45  ;;  %v591_v45 = vld [vmem:[%s2504_s27 + $0x1e0] sm:$0xff] }
  0xca   : > { %1883 = vmatprep.subr.bf16.mxu0 %v2280_v4  ;;  %1999 = vmatprep.subr.bf16.mxu1 %v2280_v4 }
  0xcd   : > { %1885 = vmatpush1.bf16.msra.mxu0 %v1884_v48  ;;  %2015 = vmatpush1.bf16.msra.mxu1 %v1884_v48  ;;  %v561_v48 = vld [vmem:[%s2504_s27 + $0xf0] sm:$0xff] }
  0xce   : > { %1886 = vmatprep.subr.bf16.mxu0 %v2280_v4  ;;  %2000 = vmatprep.subr.bf16.mxu1 %v2280_v4  ;;  %v539_v4 = vld [vmem:[%s2504_s27 + $0x40] sm:$0xff] }
  0xd1   : > { %1888 = vmatpush1.bf16.msra.mxu0 %v1887_v51  ;;  %2016 = vmatpush1.bf16.msra.mxu1 %v1887_v51  ;;  %v515_v51 = vld [vmem:[#allocation2 + $0x80] sm:$0xff] }
  0xd4   : > { %660 = vmatmul.mubr.f32.vlgmr.msra.gmra.mrb[0].mxu0 %v531_v52  ;;  %740 = vmatmul.mubr.f32.vlgmr.msra.gmra.mrb[0].mxu1 %v563_v53 }
  0xd5   : > { %664 = vmatprep.mubr.f32.mxu0 %v534_v54  ;;  %744 = vmatprep.mubr.f32.mxu1 %v566_v55 }
  0xd8   : > { %665 = vmatmul.mubr.f32.gmra.mrb[2].mxu0 %v533_v56  ;;  %745 = vmatmul.mubr.f32.gmra.mrb[2].mxu1 %v565_v57 }
  0xd9   : > { %669 = vmatprep.mubr.f32.mxu0 %v536_v58  ;;  %749 = vmatprep.mubr.f32.mxu1 %v568_v59  ;;  %v500_v58 = vld [vmem:[#allocation2 + $0x8] sm:$0xff] }
  0xda   : > { %v516_v59 = vld [vmem:[#allocation2 + $0x88] sm:$0xff] }
  0xdc   : > { %670 = vmatmul.mubr.f32.gmra.mrb[4].mxu0 %v535_v60  ;;  %750 = vmatmul.mubr.f32.gmra.mrb[4].mxu1 %v567_v61 }
  0xdd   : > { %674 = vmatprep.mubr.f32.mxu0 %v538_v62  ;;  %754 = vmatprep.mubr.f32.mxu1 %v570_v63 }
  0xe0   : > { %675 = vmatmul.mubr.f32.gmra.mrb[6].mxu0 %v537_v0  ;;  %755 = vmatmul.mubr.f32.gmra.mrb[6].mxu1 %v569_v1 }
  0xe1   : > { %679 = vmatprep.mubr.f32.mxu0 %v540_v2  ;;  %759 = vmatprep.mubr.f32.mxu1 %v572_v3  ;;  %v501_v2 = vld [vmem:[#allocation2 + $0x10] sm:$0xff] }
  0xe2   : > { %v517_v3 = vld [vmem:[#allocation2 + $0x90] sm:$0xff] }
  0xe4   : > { %680 = vmatmul.mubr.f32.gmra.mrb[8].mxu0 %v539_v4  ;;  %760 = vmatmul.mubr.f32.gmra.mrb[8].mxu1 %v571_v5 }
  0xe5   : > { %684 = vmatprep.mubr.f32.mxu0 %v542_v6  ;;  %764 = vmatprep.mubr.f32.mxu1 %v574_v7 }
  0xe8   : > { %685 = vmatmul.mubr.f32.gmra.mrb[10].mxu0 %v541_v8  ;;  %765 = vmatmul.mubr.f32.gmra.mrb[10].mxu1 %v573_v9 }
  0xe9   : > { %689 = vmatprep.mubr.f32.mxu0 %v544_v10  ;;  %769 = vmatprep.mubr.f32.mxu1 %v576_v11  ;;  %v502_v10 = vld [vmem:[#allocation2 + $0x18] sm:$0xff] }
  0xea   : > { %v518_v11 = vld [vmem:[#allocation2 + $0x98] sm:$0xff] }
  0xec   : > { %690 = vmatmul.mubr.f32.gmra.mrb[12].mxu0 %v543_v12  ;;  %770 = vmatmul.mubr.f32.gmra.mrb[12].mxu1 %v575_v13 }
  0xed   : > { %694 = vmatprep.mubr.f32.mxu0 %v546_v14  ;;  %774 = vmatprep.mubr.f32.mxu1 %v578_v15 }
  0xf0   : > { %695 = vmatmul.mubr.f32.gmra.mrb[14].mxu0 %v545_v16  ;;  %775 = vmatmul.mubr.f32.gmra.mrb[14].mxu1 %v577_v17 }
  0xf1   : > { %699 = vmatprep.mubr.f32.mxu0 %v548_v18  ;;  %779 = vmatprep.mubr.f32.mxu1 %v580_v19  ;;  %v503_v18 = vld [vmem:[#allocation2 + $0x20] sm:$0xff] }
  0xf2   : > { %v519_v19 = vld [vmem:[#allocation2 + $0xa0] sm:$0xff] }
  0xf4   : > { %700 = vmatmul.mubr.f32.gmra.mrb[16].mxu0 %v547_v20  ;;  %780 = vmatmul.mubr.f32.gmra.mrb[16].mxu1 %v579_v21 }
  0xf5   : > { %704 = vmatprep.mubr.f32.mxu0 %v550_v22  ;;  %784 = vmatprep.mubr.f32.mxu1 %v582_v23 }
  0xf8   : > { %705 = vmatmul.mubr.f32.gmra.mrb[18].mxu0 %v549_v24  ;;  %785 = vmatmul.mubr.f32.gmra.mrb[18].mxu1 %v581_v25 }
  0xf9   : > { %709 = vmatprep.mubr.f32.mxu0 %v552_v26  ;;  %789 = vmatprep.mubr.f32.mxu1 %v584_v27  ;;  %v504_v26 = vld [vmem:[#allocation2 + $0x28] sm:$0xff] }
  0xfa   : > { %v520_v27 = vld [vmem:[#allocation2 + $0xa8] sm:$0xff] }
  0xfc   : > { %710 = vmatmul.mubr.f32.gmra.mrb[20].mxu0 %v551_v28  ;;  %790 = vmatmul.mubr.f32.gmra.mrb[20].mxu1 %v583_v29 }
  0xfd   : > { %714 = vmatprep.mubr.f32.mxu0 %v554_v30  ;;  %794 = vmatprep.mubr.f32.mxu1 %v586_v31 }
 0x100   : > { %715 = vmatmul.mubr.f32.gmra.mrb[22].mxu0 %v553_v32  ;;  %795 = vmatmul.mubr.f32.gmra.mrb[22].mxu1 %v585_v33 }
 0x101   : > { %719 = vmatprep.mubr.f32.mxu0 %v556_v34  ;;  %799 = vmatprep.mubr.f32.mxu1 %v588_v35  ;;  %v505_v34 = vld [vmem:[#allocation2 + $0x30] sm:$0xff] }
 0x102   : > { %v521_v35 = vld [vmem:[#allocation2 + $0xb0] sm:$0xff] }
 0x104   : > { %720 = vmatmul.mubr.f32.gmra.mrb[24].mxu0 %v555_v36  ;;  %800 = vmatmul.mubr.f32.gmra.mrb[24].mxu1 %v587_v37 }
 0x105   : > { %724 = vmatprep.mubr.f32.mxu0 %v558_v38  ;;  %804 = vmatprep.mubr.f32.mxu1 %v590_v39 }
 0x108   : > { %725 = vmatmul.mubr.f32.gmra.mrb[26].mxu0 %v557_v40  ;;  %805 = vmatmul.mubr.f32.gmra.mrb[26].mxu1 %v589_v41 }
 0x109   : > { %729 = vmatprep.mubr.f32.mxu0 %v560_v42  ;;  %809 = vmatprep.mubr.f32.mxu1 %v592_v43  ;;  %v506_v42 = vld [vmem:[#allocation2 + $0x38] sm:$0xff] }
 0x10a   : > { %v522_v43 = vld [vmem:[#allocation2 + $0xb8] sm:$0xff] }
 0x10c   : > { %730 = vmatmul.mubr.f32.gmra.mrb[28].mxu0 %v559_v44  ;;  %810 = vmatmul.mubr.f32.gmra.mrb[28].mxu1 %v591_v45 }
 0x10d   : > { %734 = vmatprep.mubr.f32.mxu0 %v562_v46  ;;  %814 = vmatprep.mubr.f32.mxu1 %v594_v47 }
 0x110   : > { %735 = vmatmul.mubr.f32.gmra.mrb[30].mxu0 %v561_v48  ;;  %815 = vmatmul.mubr.f32.gmra.mrb[30].mxu1 %v593_v49 }
 0x1a7   : > { %v661_v52 = vpop.f32.mrb[0].mxu0  ;;  %v741_v53 = vpop.f32.mrb[0].mxu1 }
 0x1a8   : > { %v820_v54 = vadd.f32 %v661_v52, %v499_v50  ;;  %v836_v55 = vadd.f32 %v741_v53, %v515_v51  ;;  %v663_v56 = vpop.f32.mrb[1].mxu0  ;;  %v743_v57 = vpop.f32.mrb[1].mxu1  ;;  %v507_v50 = vld [vmem:[#allocation2 + $0x40] sm:$0xff] }
 0x1a9   : > { %v523_v51 = vld [vmem:[#allocation2 + $0xc0] sm:$0xff] }
 0x1aa   : > { %852 = vst [vmem:[#allocation2] sm:$0xff] %v820_v54  ;;  %868 = vst [vmem:[#allocation2 + $0x80] sm:$0xff] %v836_v55 }
 0x1ab   : > { %v666_v60 = vpop.f32.mrb[2].mxu0  ;;  %v746_v61 = vpop.f32.mrb[2].mxu1 }
 0x1ac   : > { %v821_v62 = vadd.f32 %v666_v60, %v500_v58  ;;  %v837_v63 = vadd.f32 %v746_v61, %v516_v59  ;;  %v668_v0 = vpop.f32.mrb[3].mxu0  ;;  %v748_v1 = vpop.f32.mrb[3].mxu1  ;;  %v508_v58 = vld [vmem:[#allocation2 + $0x48] sm:$0xff] }
 0x1ad   : > { %v524_v59 = vld [vmem:[#allocation2 + $0xc8] sm:$0xff] }
 0x1ae   : > { %853 = vst [vmem:[#allocation2 + $0x8] sm:$0xff] %v821_v62  ;;  %869 = vst [vmem:[#allocation2 + $0x88] sm:$0xff] %v837_v63 }
 0x1af   : > { %v671_v4 = vpop.f32.mrb[4].mxu0  ;;  %v751_v5 = vpop.f32.mrb[4].mxu1 }
 0x1b0   : > { %v822_v6 = vadd.f32 %v671_v4, %v501_v2  ;;  %v838_v7 = vadd.f32 %v751_v5, %v517_v3  ;;  %v673_v8 = vpop.f32.mrb[5].mxu0  ;;  %v753_v9 = vpop.f32.mrb[5].mxu1  ;;  %v509_v2 = vld [vmem:[#allocation2 + $0x50] sm:$0xff] }
 0x1b1   : > { %v525_v3 = vld [vmem:[#allocation2 + $0xd0] sm:$0xff] }
 0x1b2   : > { %854 = vst [vmem:[#allocation2 + $0x10] sm:$0xff] %v822_v6  ;;  %870 = vst [vmem:[#allocation2 + $0x90] sm:$0xff] %v838_v7 }
 0x1b3   : > { %v676_v12 = vpop.f32.mrb[6].mxu0  ;;  %v756_v13 = vpop.f32.mrb[6].mxu1 }
 0x1b4   : > { %v823_v14 = vadd.f32 %v676_v12, %v502_v10  ;;  %v839_v15 = vadd.f32 %v756_v13, %v518_v11  ;;  %v678_v16 = vpop.f32.mrb[7].mxu0  ;;  %v758_v17 = vpop.f32.mrb[7].mxu1  ;;  %v510_v10 = vld [vmem:[#allocation2 + $0x58] sm:$0xff] }
 0x1b5   : > { %v526_v11 = vld [vmem:[#allocation2 + $0xd8] sm:$0xff] }
 0x1b6   : > { %855 = vst [vmem:[#allocation2 + $0x18] sm:$0xff] %v823_v14  ;;  %871 = vst [vmem:[#allocation2 + $0x98] sm:$0xff] %v839_v15 }
 0x1b7   : > { %v681_v20 = vpop.f32.mrb[8].mxu0  ;;  %v761_v21 = vpop.f32.mrb[8].mxu1 }
 0x1b8   : > { %v824_v22 = vadd.f32 %v681_v20, %v503_v18  ;;  %v840_v23 = vadd.f32 %v761_v21, %v519_v19  ;;  %v683_v24 = vpop.f32.mrb[9].mxu0  ;;  %v763_v25 = vpop.f32.mrb[9].mxu1  ;;  %v511_v18 = vld [vmem:[#allocation2 + $0x60] sm:$0xff] }
 0x1b9   : > { %v527_v19 = vld [vmem:[#allocation2 + $0xe0] sm:$0xff] }
 0x1ba   : > { %856 = vst [vmem:[#allocation2 + $0x20] sm:$0xff] %v824_v22  ;;  %872 = vst [vmem:[#allocation2 + $0xa0] sm:$0xff] %v840_v23 }
 0x1bb   : > { %v686_v28 = vpop.f32.mrb[10].mxu0  ;;  %v766_v29 = vpop.f32.mrb[10].mxu1 }
 0x1bc   : > { %v825_v30 = vadd.f32 %v686_v28, %v504_v26  ;;  %v841_v31 = vadd.f32 %v766_v29, %v520_v27  ;;  %v688_v32 = vpop.f32.mrb[11].mxu0  ;;  %v768_v33 = vpop.f32.mrb[11].mxu1  ;;  %v512_v26 = vld [vmem:[#allocation2 + $0x68] sm:$0xff] }
 0x1bd   : > { %v528_v27 = vld [vmem:[#allocation2 + $0xe8] sm:$0xff] }
 0x1be   : > { %857 = vst [vmem:[#allocation2 + $0x28] sm:$0xff] %v825_v30  ;;  %873 = vst [vmem:[#allocation2 + $0xa8] sm:$0xff] %v841_v31 }
 0x1bf   : > { %v691_v36 = vpop.f32.mrb[12].mxu0  ;;  %v771_v37 = vpop.f32.mrb[12].mxu1 }
 0x1c0   : > { %v826_v38 = vadd.f32 %v691_v36, %v505_v34  ;;  %v842_v39 = vadd.f32 %v771_v37, %v521_v35  ;;  %v693_v40 = vpop.f32.mrb[13].mxu0  ;;  %v773_v41 = vpop.f32.mrb[13].mxu1  ;;  %v513_v34 = vld [vmem:[#allocation2 + $0x70] sm:$0xff] }
 0x1c1   : > { %v529_v35 = vld [vmem:[#allocation2 + $0xf0] sm:$0xff] }
 0x1c2   : > { %858 = vst [vmem:[#allocation2 + $0x30] sm:$0xff] %v826_v38  ;;  %874 = vst [vmem:[#allocation2 + $0xb0] sm:$0xff] %v842_v39 }
 0x1c3   : > { %v696_v44 = vpop.f32.mrb[14].mxu0  ;;  %v776_v45 = vpop.f32.mrb[14].mxu1 }
 0x1c4   : > { %v827_v46 = vadd.f32 %v696_v44, %v506_v42  ;;  %v843_v47 = vadd.f32 %v776_v45, %v522_v43  ;;  %v698_v48 = vpop.f32.mrb[15].mxu0  ;;  %v778_v49 = vpop.f32.mrb[15].mxu1  ;;  %v514_v42 = vld [vmem:[#allocation2 + $0x78] sm:$0xff] }
 0x1c5   : > { %v530_v43 = vld [vmem:[#allocation2 + $0xf8] sm:$0xff] }
 0x1c6   : > { %859 = vst [vmem:[#allocation2 + $0x38] sm:$0xff] %v827_v46  ;;  %875 = vst [vmem:[#allocation2 + $0xb8] sm:$0xff] %v843_v47 }
 0x1c7   : > { %v701_v52 = vpop.f32.mrb[16].mxu0  ;;  %v781_v53 = vpop.f32.mrb[16].mxu1 }
 0x1c8   : > { %v828_v54 = vadd.f32 %v701_v52, %v507_v50  ;;  %v844_v55 = vadd.f32 %v781_v53, %v523_v51  ;;  %v703_v56 = vpop.f32.mrb[17].mxu0  ;;  %v783_v57 = vpop.f32.mrb[17].mxu1  ;;  %v991_v50 = vld [vmem:[%s3112_s6] sm:$0xff] (!%p1630_p0)  ;;  %v992_v51 = vld [vmem:[%s3112_s6 + $0x8] sm:$0xff] (!%p1630_p0)  ;;  %v993_v52 = vld [vmem:[%s3112_s6 + $0x10] sm:$0xff] (!%p1630_p0) }
 0x1c9   : > { %v1889_v53 = vpack.c.bf16 (!%p1630_p0), %v992_v51, %v991_v50  ;;  %v995_v56 = vld [vmem:[%s3112_s6 + $0x20] sm:$0xff] (!%p1630_p0)  ;;  %v996_v57 = vld [vmem:[%s3112_s6 + $0x28] sm:$0xff] (!%p1630_p0) }
 0x1ca   : > { %860 = vst [vmem:[#allocation2 + $0x40] sm:$0xff] %v828_v54  ;;  %876 = vst [vmem:[#allocation2 + $0xc0] sm:$0xff] %v844_v55  ;;  %v994_v54 = vld [vmem:[%s3112_s6 + $0x18] sm:$0xff] (!%p1630_p0) }
 0x1cb   : > { %v706_v60 = vpop.f32.mrb[18].mxu0  ;;  %v786_v61 = vpop.f32.mrb[18].mxu1  ;;  %v1893_v55 = vpack.c.bf16 (!%p1630_p0), %v994_v54, %v993_v52  ;;  %1890 = vmatprep.subr.bf16.mxu0 (!%p1630_p0), %v1889_v53 }
 0x1cc   : > { %v829_v62 = vadd.f32 %v706_v60, %v508_v58  ;;  %v845_v63 = vadd.f32 %v786_v61, %v524_v59  ;;  %v708_v0 = vpop.f32.mrb[19].mxu0  ;;  %v788_v1 = vpop.f32.mrb[19].mxu1  ;;  %1892 = vmatpush3.bf16.msra.mxu0 (!%p1630_p0), %v1889_v53  ;;  %v1897_v58 = vpack.c.bf16 (!%p1630_p0), %v996_v57, %v995_v56  ;;  %v888_v59 = vld [vmem:[#allocation2] sm:$0xff] (!%p1630_p0)  ;;  %v997_v61 = vld [vmem:[%s3112_s6 + $0x30] sm:$0xff] (!%p1630_p0) }
 0x1cd   : > { %1894 = vmatprep.subr.bf16.mxu0 (!%p1630_p0), %v1893_v55  ;;  %v2681_v60 = vld [vmem:[#allocation5] ss:$0 sm:$0xff] (!%p1630_p0) }
 0x1ce   : > { %861 = vst [vmem:[#allocation2 + $0x48] sm:$0xff] %v829_v62  ;;  %877 = vst [vmem:[#allocation2 + $0xc8] sm:$0xff] %v845_v63  ;;  %v998_v62 = vld [vmem:[%s3112_s6 + $0x38] sm:$0xff] (!%p1630_p0)  ;;  %v927_v63 = vadd.f32 (!%p1630_p0), %v2681_v60, %v888_v59 }
 0x1cf   : > { %v711_v4 = vpop.f32.mrb[20].mxu0  ;;  %v791_v5 = vpop.f32.mrb[20].mxu1  ;;  %v1901_v1 = vpack.c.bf16 (!%p1630_p0), %v998_v62, %v997_v61  ;;  %v905_v61 = vld [vmem:[#allocation2 + $0x88] sm:$0xff] (!%p1630_p0)  ;;  %v906_v62 = vld [vmem:[#allocation2 + $0x90] sm:$0xff] (!%p1630_p0) }
 0x1d0   : > { %v830_v6 = vadd.f32 %v711_v4, %v509_v2  ;;  %v846_v7 = vadd.f32 %v791_v5, %v525_v3  ;;  %v713_v8 = vpop.f32.mrb[21].mxu0  ;;  %v793_v9 = vpop.f32.mrb[21].mxu1  ;;  %1896 = vmatpush3.bf16.msra.mxu0 (!%p1630_p0), %v1893_v55  ;;  %v959_v0 = vmax.f32 (!%p1630_p0), %v927_v63, 0.0  ;;  %v999_v2 = vld [vmem:[%s3112_s6 + $0x40] sm:$0xff] (!%p1630_p0)  ;;  %v1000_v3 = vld [vmem:[%s3112_s6 + $0x48] sm:$0xff] (!%p1630_p0)  ;;  %v1001_v5 = vld [vmem:[%s3112_s6 + $0x50] sm:$0xff] (!%p1630_p0) }
 0x1d1   : > { %1898 = vmatprep.subr.bf16.mxu0 (!%p1630_p0), %v1897_v58  ;;  %v1905_v4 = vpack.c.bf16 (!%p1630_p0), %v1000_v3, %v999_v2  ;;  %v1003_v8 = vld [vmem:[%s3112_s6 + $0x60] sm:$0xff] (!%p1630_p0)  ;;  %v1004_v9 = vld [vmem:[%s3112_s6 + $0x68] sm:$0xff] (!%p1630_p0)  ;;  %v945_v2 = vadd.f32 (!%p1630_p0), %v2681_v60, %v906_v62  ;;  %v907_v3 = vld [vmem:[#allocation2 + $0x98] sm:$0xff] (!%p1630_p0) }
 0x1d2   : > { %862 = vst [vmem:[#allocation2 + $0x50] sm:$0xff] %v830_v6  ;;  %878 = vst [vmem:[#allocation2 + $0xd0] sm:$0xff] %v846_v7  ;;  %1793 = vmatprep.mubr.f32.mxu0 (!%p1630_p0), %v959_v0  ;;  %v1002_v6 = vld [vmem:[%s3112_s6 + $0x58] sm:$0xff] (!%p1630_p0)  ;;  %v904_v55 = vld [vmem:[#allocation2 + $0x80] sm:$0xff] (!%p1630_p0)  ;;  %v944_v0 = vadd.f32 (!%p1630_p0), %v2681_v60, %v905_v61 }
 0x1d3   : > { %v716_v12 = vpop.f32.mrb[22].mxu0  ;;  %v796_v13 = vpop.f32.mrb[22].mxu1  ;;  %v1909_v7 = vpack.c.bf16 (!%p1630_p0), %v1002_v6, %v1001_v5  ;;  %v943_v59 = vadd.f32 (!%p1630_p0), %v2681_v60, %v904_v55  ;;  %v946_v6 = vadd.f32 (!%p1630_p0), %v2681_v60, %v907_v3 }
 0x1d4   : > { %v831_v14 = vadd.f32 %v716_v12, %v510_v10  ;;  %v847_v15 = vadd.f32 %v796_v13, %v526_v11  ;;  %v718_v16 = vpop.f32.mrb[23].mxu0  ;;  %v798_v17 = vpop.f32.mrb[23].mxu1  ;;  %1900 = vmatpush3.bf16.msra.mxu0 (!%p1630_p0), %v1897_v58  ;;  %v1913_v10 = vpack.c.bf16 (!%p1630_p0), %v1004_v9, %v1003_v8  ;;  %v1005_v11 = vld [vmem:[%s3112_s6 + $0x70] sm:$0xff] (!%p1630_p0)  ;;  %v1006_v12 = vld [vmem:[%s3112_s6 + $0x78] sm:$0xff] (!%p1630_p0)  ;;  %v889_v13 = vld [vmem:[#allocation2 + $0x8] sm:$0xff] (!%p1630_p0)  ;;  %v976_v5 = vmax.f32 (!%p1630_p0), %v944_v0, 0.0 }
 0x1d5   : > { %1902 = vmatprep.subr.bf16.mxu0 (!%p1630_p0), %v1901_v1  ;;  %v928_v16 = vadd.f32 (!%p1630_p0), %v2681_v60, %v889_v13  ;;  %v909_v9 = vld [vmem:[#allocation2 + $0xa8] sm:$0xff] (!%p1630_p0) }
 0x1d6   : > { %863 = vst [vmem:[#allocation2 + $0x58] sm:$0xff] %v831_v14  ;;  %879 = vst [vmem:[#allocation2 + $0xd8] sm:$0xff] %v847_v15  ;;  %v1917_v14 = vpack.c.bf16 (!%p1630_p0), %v1006_v12, %v1005_v11  ;;  %v890_v15 = vld [vmem:[#allocation2 + $0x10] sm:$0xff] (!%p1630_p0)  ;;  %v978_v11 = vmax.f32 (!%p1630_p0), %v946_v6, 0.0  ;;  %v948_v12 = vadd.f32 (!%p1630_p0), %v2681_v60, %v909_v9 }
 0x1d7   : > { %v721_v20 = vpop.f32.mrb[24].mxu0  ;;  %v801_v21 = vpop.f32.mrb[24].mxu1  ;;  %v929_v17 = vadd.f32 (!%p1630_p0), %v2681_v60, %v890_v15  ;;  %v911_v15 = vld [vmem:[#allocation2 + $0xb8] sm:$0xff] (!%p1630_p0) }
 0x1d8   : > { %v832_v22 = vadd.f32 %v721_v20, %v511_v18  ;;  %v848_v23 = vadd.f32 %v801_v21, %v527_v19  ;;  %v723_v24 = vpop.f32.mrb[25].mxu0  ;;  %v803_v25 = vpop.f32.mrb[25].mxu1  ;;  %1904 = vmatpush3.bf16.msra.mxu0 (!%p1630_p0), %v1901_v1  ;;  %v891_v18 = vld [vmem:[#allocation2 + $0x18] sm:$0xff] (!%p1630_p0)  ;;  %v892_v19 = vld [vmem:[#allocation2 + $0x20] sm:$0xff] (!%p1630_p0)  ;;  %v960_v20 = vmax.f32 (!%p1630_p0), %v928_v16, 0.0  ;;  %v975_v1 = vmax.f32 (!%p1630_p0), %v943_v59, 0.0 }
 0x1d9   : > { %1906 = vmatprep.subr.bf16.mxu0 (!%p1630_p0), %v1905_v4  ;;  %v930_v21 = vadd.f32 (!%p1630_p0), %v2681_v60, %v891_v18  ;;  %v893_v24 = vld [vmem:[#allocation2 + $0x28] sm:$0xff] (!%p1630_p0)  ;;  %v894_v25 = vld [vmem:[#allocation2 + $0x30] sm:$0xff] (!%p1630_p0)  ;;  %v912_v16 = vld [vmem:[#allocation2 + $0xc0] sm:$0xff] (!%p1630_p0)  ;;  %v950_v18 = vadd.f32 (!%p1630_p0), %v2681_v60, %v911_v15 }
 0x1da   : > { %864 = vst [vmem:[#allocation2 + $0x60] sm:$0xff] %v832_v22  ;;  %880 = vst [vmem:[#allocation2 + $0xe0] sm:$0xff] %v848_v23  ;;  %v961_v22 = vmax.f32 (!%p1630_p0), %v929_v17, 0.0  ;;  %v931_v23 = vadd.f32 (!%p1630_p0), %v2681_v60, %v892_v19  ;;  %v980_v17 = vmax.f32 (!%p1630_p0), %v948_v12, 0.0 }
 0x1db   : > { %v726_v28 = vpop.f32.mrb[26].mxu0  ;;  %v806_v29 = vpop.f32.mrb[26].mxu1 }
 0x1dc   : > { %v833_v30 = vadd.f32 %v726_v28, %v512_v26  ;;  %v849_v31 = vadd.f32 %v806_v29, %v528_v27  ;;  %v728_v32 = vpop.f32.mrb[27].mxu0  ;;  %v808_v33 = vpop.f32.mrb[27].mxu1  ;;  %1908 = vmatpush3.bf16.msra.mxu0 (!%p1630_p0), %v1905_v4  ;;  %v962_v26 = vmax.f32 (!%p1630_p0), %v930_v21, 0.0  ;;  %v932_v27 = vadd.f32 (!%p1630_p0), %v2681_v60, %v893_v24  ;;  %v908_v4 = vld [vmem:[#allocation2 + $0xa0] sm:$0xff] (!%p1630_p0)  ;;  %v913_v21 = vld [vmem:[#allocation2 + $0xc8] sm:$0xff] (!%p1630_p0) }
 0x1dd   : > { %1910 = vmatprep.subr.bf16.mxu0 (!%p1630_p0), %v1909_v7  ;;  %v963_v28 = vmax.f32 (!%p1630_p0), %v931_v23, 0.0  ;;  %v933_v29 = vadd.f32 (!%p1630_p0), %v2681_v60, %v894_v25  ;;  %v947_v8 = vadd.f32 (!%p1630_p0), %v2681_v60, %v908_v4  ;;  %v982_v23 = vmax.f32 (!%p1630_p0), %v950_v18, 0.0 }
 0x1de   : > { %865 = vst [vmem:[#allocation2 + $0x68] sm:$0xff] %v833_v30  ;;  %881 = vst [vmem:[#allocation2 + $0xe8] sm:$0xff] %v849_v31  ;;  %v895_v30 = vld [vmem:[#allocation2 + $0x38] sm:$0xff] (!%p1630_p0)  ;;  %v896_v31 = vld [vmem:[#allocation2 + $0x40] sm:$0xff] (!%p1630_p0)  ;;  %v964_v32 = vmax.f32 (!%p1630_p0), %v932_v27, 0.0  ;;  %v952_v24 = vadd.f32 (!%p1630_p0), %v2681_v60, %v913_v21 }
 0x1df   : > { %v731_v36 = vpop.f32.mrb[28].mxu0  ;;  %v811_v37 = vpop.f32.mrb[28].mxu1  ;;  %v934_v33 = vadd.f32 (!%p1630_p0), %v2681_v60, %v895_v30  ;;  %v979_v13 = vmax.f32 (!%p1630_p0), %v947_v8, 0.0  ;;  %v915_v27 = vld [vmem:[#allocation2 + $0xd8] sm:$0xff] (!%p1630_p0) }
 0x1e0   : > { %v834_v38 = vadd.f32 %v731_v36, %v513_v34  ;;  %v850_v39 = vadd.f32 %v811_v37, %v529_v35  ;;  %v733_v40 = vpop.f32.mrb[29].mxu0  ;;  %v813_v41 = vpop.f32.mrb[29].mxu1  ;;  %887 = sbr.rel (%p1630_p0) target bundleno = 1024 (0x400), region = 72  ;;  %1912 = vmatpush3.bf16.msra.mxu0 (!%p1630_p0), %v1909_v7  ;;  %v965_v34 = vmax.f32 (!%p1630_p0), %v933_v29, 0.0  ;;  %v935_v35 = vadd.f32 (!%p1630_p0), %v2681_v60, %v896_v31  ;;  %v897_v36 = vld [vmem:[#allocation2 + $0x48] sm:$0xff] (!%p1630_p0)  ;;  %v898_v37 = vld [vmem:[#allocation2 + $0x50] sm:$0xff] (!%p1630_p0) }
 0x1e1   : > { %1914 = vmatprep.subr.bf16.mxu0 (!%p1630_p0), %v1913_v10  ;;  %v937_v41 = vadd.f32 (!%p1630_p0), %v2681_v60, %v898_v37  ;;  %v977_v7 = vmax.f32 (!%p1630_p0), %v945_v2, 0.0  ;;  %v984_v29 = vmax.f32 (!%p1630_p0), %v952_v24, 0.0  ;;  %v954_v30 = vadd.f32 (!%p1630_p0), %v2681_v60, %v915_v27 }
 0x1e2   : > { %866 = vst [vmem:[#allocation2 + $0x70] sm:$0xff] %v834_v38  ;;  %882 = vst [vmem:[#allocation2 + $0xf0] sm:$0xff] %v850_v39  ;;  %v966_v38 = vmax.f32 (!%p1630_p0), %v934_v33, 0.0  ;;  %v936_v39 = vadd.f32 (!%p1630_p0), %v2681_v60, %v897_v36  ;;  %v967_v40 = vmax.f32 (!%p1630_p0), %v935_v35, 0.0 }
 0x1e3   : > { %v736_v44 = vpop.f32.mrb[30].mxu0  ;;  %v816_v45 = vpop.f32.mrb[30].mxu1  ;;  %v986_v35 = vmax.f32 (!%p1630_p0), %v954_v30, 0.0 }
 0x1e4   : > { %v835_v46 = vadd.f32 %v736_v44, %v514_v42  ;;  %v851_v47 = vadd.f32 %v816_v45, %v530_v43  ;;  %v738_v48 = vpop.f32.mrb[31].mxu0  ;;  %v818_v49 = vpop.f32.mrb[31].mxu1  ;;  %1916 = vmatpush3.bf16.msra.mxu0 (!%p1630_p0), %v1913_v10  ;;  %v899_v42 = vld [vmem:[#allocation2 + $0x58] sm:$0xff] (!%p1630_p0)  ;;  %v900_v43 = vld [vmem:[#allocation2 + $0x60] sm:$0xff] (!%p1630_p0)  ;;  %v968_v44 = vmax.f32 (!%p1630_p0), %v936_v39, 0.0  ;;  %v910_v10 = vld [vmem:[#allocation2 + $0xb0] sm:$0xff] (!%p1630_p0) }
 0x1e5   : > { %1918 = vmatprep.subr.bf16.mxu0 (!%p1630_p0), %v1917_v14  ;;  %v938_v45 = vadd.f32 (!%p1630_p0), %v2681_v60, %v899_v42  ;;  %v901_v48 = vld [vmem:[#allocation2 + $0x68] sm:$0xff] (!%p1630_p0) }
 0x1e6   : > { %867 = vst [vmem:[#allocation2 + $0x78] sm:$0xff] %v835_v46  ;;  %883 = vst [vmem:[#allocation2 + $0xf8] sm:$0xff] %v851_v47  ;;  %v969_v46 = vmax.f32 (!%p1630_p0), %v937_v41, 0.0  ;;  %v939_v47 = vadd.f32 (!%p1630_p0), %v2681_v60, %v900_v43  ;;  %v940_v51 = vadd.f32 (!%p1630_p0), %v2681_v60, %v901_v48  ;;  %v917_v33 = vld [vmem:[#allocation2 + $0xe8] sm:$0xff] (!%p1630_p0) }
 0x1e7   : > { %v970_v50 = vmax.f32 %v938_v45, 0.0  ;;  %v956_v36 = vadd.f32 %v2681_v60, %v917_v33 }
 0x1e8   : > { %1920 = vmatpush3.bf16.msra.mxu0 %v1917_v14  ;;  %v971_v52 = vmax.f32 %v939_v47, 0.0  ;;  %v972_v56 = vmax.f32 %v940_v51, 0.0  ;;  %v949_v14 = vadd.f32 %v2681_v60, %v910_v10  ;;  %v1275_v47 = vstv %s1633_s21 }
 0x1e9   : > { %v902_v49 = vld [vmem:[#allocation2 + $0x70] sm:$0xff] }
 0x1ea   : > { %v941_v53 = vadd.f32 %v2681_v60, %v902_v49  ;;  %v981_v19 = vmax.f32 %v949_v14, 0.0 }
 0x1eb   : > { %1794 = vmatmul.mubr.f32.vlgmr.msra.gmra.mrb[0].mxu0 %v960_v20  ;;  %v951_v20 = vadd.f32 %v2681_v60, %v912_v16 }
 0x1ec   : > { %1796 = vmatprep.mubr.f32.mxu0 %v961_v22  ;;  %v973_v58 = vmax.f32 %v941_v53, 0.0  ;;  %v914_v22 = vld [vmem:[#allocation2 + $0xd0] sm:$0xff]  ;;  %v2756_v53 = vld [vmem:[#allocation7] ss:$0 sm:$0xff] }
 0x1ed   : > { %v903_v54 = vld [vmem:[#allocation2 + $0x78] sm:$0xff]  ;;  %v983_v25 = vmax.f32 %v951_v20, 0.0 }
 0x1ee   : > { %v942_v57 = vadd.f32 %v2681_v60, %v903_v54  ;;  %v919_v39 = vld [vmem:[#allocation2 + $0xf8] sm:$0xff] }
 0x1ef   : > { %1797 = vmatmul.mubr.f32.gmra.mrb[2].mxu0 %v962_v26  ;;  %v953_v26 = vadd.f32 %v2681_v60, %v914_v22  ;;  %v958_v41 = vadd.f32 %v2681_v60, %v919_v39 }
 0x1f0   : > { %1799 = vmatprep.mubr.f32.mxu0 %v963_v28  ;;  %v974_v63 = vmax.f32 %v942_v57, 0.0  ;;  %v916_v28 = vld [vmem:[#allocation2 + $0xe0] sm:$0xff] }
 0x1f1   : > { %v985_v31 = vmax.f32 %v953_v26, 0.0  ;;  %v990_v43 = vmax.f32 %v958_v41, 0.0 }
 0x1f3   : > { %1800 = vmatmul.mubr.f32.gmra.mrb[4].mxu0 %v964_v32  ;;  %v955_v32 = vadd.f32 %v2681_v60, %v916_v28 }
 0x1f4   : > { %1802 = vmatprep.mubr.f32.mxu0 %v965_v34  ;;  %v918_v34 = vld [vmem:[#allocation2 + $0xf0] sm:$0xff] }
 0x1f5   : > { %v987_v37 = vmax.f32 %v955_v32, 0.0 }
 0x1f7   : > { %1803 = vmatmul.mubr.f32.gmra.mrb[6].mxu0 %v966_v38  ;;  %v957_v38 = vadd.f32 %v2681_v60, %v918_v34  ;;  %v2281_v60 = vmov 0.0  }
 0x1f8   : > { %1805 = vmatprep.mubr.f32.mxu0 %v967_v40  ;;  %v988_v40 = vmax.f32 %v956_v36, 0.0 }
 0x1f9   : > { %v989_v42 = vmax.f32 %v957_v38, 0.0 }
 0x1fb   : > { %1806 = vmatmul.mubr.f32.gmra.mrb[8].mxu0 %v968_v44  ;;  %v1272_v44 = vlaneseq }
 0x1fc   : > { %1808 = vmatprep.mubr.f32.mxu0 %v969_v46 }
 0x1fd   : > { %v1273_v45 = vand.u32 127, %v1272_v44 }
 0x1ff   : > { %1809 = vmatmul.mubr.f32.gmra.mrb[10].mxu0 %v970_v50  ;;  %v1274_v46 = vadd.s32 128, %v1273_v45  ;;  %v1276_v49 = vadd.s32 %v1275_v47, %v1273_v45  ;;  %v2746_v50 = vshrl.u32 %v1272_v44, 7 }
 0x200   : > { %1811 = vmatprep.mubr.f32.mxu0 %v971_v52 }
 0x201   : > { %v1277_v48 = vadd.s32 %v1275_v47, %v1274_v46  ;;  %vm1280_vm1 = vcmp.lt.s32.totalorder %v1276_v49, 300  ;;  %vm1289_vm2 = vcmp.eq.s32.totalorder %v2746_v50, 1  ;;  %vm1286_vm3 = vcmp.eq.s32.totalorder %v2746_v50, 0 }
 0x202   : > { %v2751_v52 = vsel %vm1280_vm1, 1.0, %v2281_v60 }
 0x203   : > { %1812 = vmatmul.mubr.f32.gmra.mrb[12].mxu0 %v972_v56  ;;  %vm1281_vm0 = vcmp.lt.s32.totalorder %v1277_v48, 300 }
 0x204   : > { %1814 = vmatprep.mubr.f32.mxu0 %v973_v58  ;;  %v2748_v51 = vsel %vm1281_vm0, 1.0, %v2281_v60 }
 0x205   : > { %1636 = vmatprep.mubr.msk.f32.mxu1 %vm1289_vm2, %v2748_v51 }
 0x207   : > { %1815 = vmatmul.mubr.f32.gmra.mrb[14].mxu0 %v974_v63 }
 0x208   : > { %1817 = vmatprep.mubr.f32.mxu0 %v975_v1 }
 0x20b   : > { %1818 = vmatmul.mubr.f32.gmra.mrb[16].mxu0 %v976_v5 }
 0x20c   : > { %1820 = vmatprep.mubr.f32.mxu0 %v977_v7 }
 0x20f   : > { %1821 = vmatmul.mubr.f32.gmra.mrb[18].mxu0 %v978_v11 }
 0x210   : > { %1823 = vmatprep.mubr.f32.mxu0 %v979_v13 }
 0x213   : > { %1824 = vmatmul.mubr.f32.gmra.mrb[20].mxu0 %v980_v17 }
 0x214   : > { %1826 = vmatprep.mubr.f32.mxu0 %v981_v19 }
 0x217   : > { %1827 = vmatmul.mubr.f32.gmra.mrb[22].mxu0 %v982_v23 }
 0x218   : > { %1829 = vmatprep.mubr.f32.mxu0 %v983_v25 }
 0x21b   : > { %1830 = vmatmul.mubr.f32.gmra.mrb[24].mxu0 %v984_v29 }
 0x21c   : > { %1832 = vmatprep.mubr.f32.mxu0 %v985_v31 }
 0x21f   : > { %1833 = vmatmul.mubr.f32.gmra.mrb[26].mxu0 %v986_v35 }
 0x220   : > { %1835 = vmatprep.mubr.f32.mxu0 %v987_v37 }
 0x223   : > { %1836 = vmatmul.mubr.f32.gmra.mrb[28].mxu0 %v988_v40 }
 0x224   : > { %1838 = vmatprep.mubr.f32.mxu0 %v989_v42 }
 0x227   : > { %1839 = vmatmul.mubr.f32.gmra.mrb[30].mxu0 %v990_v43 }
 0x2be   : > { %v1795_v54 = vpop.f32.mrb[0].mxu0 }
 0x2bf   : > { %v2759_v55 = vadd.f32 %v1795_v54, %v2756_v53  ;;  %v1080_v56 = vpop.f32.mrb[1].mxu0 }
 0x2c0   : > { %v2762_v57 = vadd.f32 %v2756_v53, %v1080_v56 }
 0x2c1   : > { %1240 = vst [vmem:[%s2525_s14 + $0x8] sm:$0xff] %v2759_v55  ;;  %v2768_v58 = vmul.f32 %v2759_v55, %v2759_v55 }
 0x2c2   : > { %1239 = vst [vmem:[%s2525_s14] sm:$0xff] %v2762_v57  ;;  %v1955_v59 = vpack.c.bf16 %v2759_v55, %v2762_v57  ;;  %v1798_v61 = vpop.f32.mrb[2].mxu0  ;;  %v2776_v62 = vmul.f32 %v2762_v57, %v2762_v57 }
 0x2c3   : > { %v2779_v63 = vadd.f32 %v1798_v61, %v2756_v53  ;;  %v1090_v0 = vpop.f32.mrb[3].mxu0 }
 0x2c4   : > { %v2782_v1 = vadd.f32 %v2756_v53, %v1090_v0  ;;  %v1923_v2 = vpack.c.bf16 %v2768_v58, %v2776_v62 }
 0x2c5   : > { %1242 = vst [vmem:[%s2525_s14 + $0x18] sm:$0xff] %v2779_v63  ;;  %v2790_v3 = vmul.f32 %v2779_v63, %v2779_v63 }
 0x2c6   : > { %1241 = vst [vmem:[%s2525_s14 + $0x10] sm:$0xff] %v2782_v1  ;;  %v2796_v4 = vmul.f32 %v2782_v1, %v2782_v1  ;;  %v1959_v5 = vpack.c.bf16 %v2779_v63, %v2782_v1  ;;  %v1801_v6 = vpop.f32.mrb[4].mxu0 }
 0x2c7   : > { %v2801_v7 = vadd.f32 %v1801_v6, %v2756_v53  ;;  %v1100_v8 = vpop.f32.mrb[5].mxu0 }
 0x2c8   : > { %v2804_v9 = vadd.f32 %v2756_v53, %v1100_v8  ;;  %v1927_v10 = vpack.c.bf16 %v2790_v3, %v2796_v4 }
 0x2c9   : > { %1244 = vst [vmem:[%s2525_s14 + $0x28] sm:$0xff] %v2801_v7  ;;  %v2812_v11 = vmul.f32 %v2801_v7, %v2801_v7 }
 0x2ca   : > { %1243 = vst [vmem:[%s2525_s14 + $0x20] sm:$0xff] %v2804_v9  ;;  %v2818_v12 = vmul.f32 %v2804_v9, %v2804_v9  ;;  %v1963_v13 = vpack.c.bf16 %v2801_v7, %v2804_v9  ;;  %v1804_v14 = vpop.f32.mrb[6].mxu0 }
 0x2cb   : > { %v2823_v15 = vadd.f32 %v1804_v14, %v2756_v53  ;;  %v1110_v16 = vpop.f32.mrb[7].mxu0 }
 0x2cc   : > { %v2826_v17 = vadd.f32 %v2756_v53, %v1110_v16  ;;  %v1931_v18 = vpack.c.bf16 %v2812_v11, %v2818_v12 }
 0x2cd   : > { %1246 = vst [vmem:[%s2525_s14 + $0x38] sm:$0xff] %v2823_v15  ;;  %v2834_v19 = vmul.f32 %v2823_v15, %v2823_v15 }
 0x2ce   : > { %1245 = vst [vmem:[%s2525_s14 + $0x30] sm:$0xff] %v2826_v17  ;;  %v2840_v20 = vmul.f32 %v2826_v17, %v2826_v17  ;;  %v1807_v22 = vpop.f32.mrb[8].mxu0 }
 0x2cf   : > { %v2845_v23 = vadd.f32 %v1807_v22, %v2756_v53  ;;  %v1120_v24 = vpop.f32.mrb[9].mxu0 }
 0x2d0   : > { %v2848_v25 = vadd.f32 %v2756_v53, %v1120_v24  ;;  %v1935_v26 = vpack.c.bf16 %v2834_v19, %v2840_v20 }
 0x2d1   : > { %1248 = vst [vmem:[%s2525_s14 + $0x48] sm:$0xff] %v2845_v23  ;;  %v2856_v27 = vmul.f32 %v2845_v23, %v2845_v23 }
 0x2d2   : > { %1247 = vst [vmem:[%s2525_s14 + $0x40] sm:$0xff] %v2848_v25  ;;  %v2862_v28 = vmul.f32 %v2848_v25, %v2848_v25  ;;  %v1810_v30 = vpop.f32.mrb[10].mxu0 }
 0x2d3   : > { %v2867_v31 = vadd.f32 %v1810_v30, %v2756_v53  ;;  %v1130_v32 = vpop.f32.mrb[11].mxu0 }
 0x2d4   : > { %v2870_v33 = vadd.f32 %v2756_v53, %v1130_v32  ;;  %v1939_v34 = vpack.c.bf16 %v2856_v27, %v2862_v28 }
 0x2d5   : > { %1250 = vst [vmem:[%s2525_s14 + $0x58] sm:$0xff] %v2867_v31  ;;  %v2878_v35 = vmul.f32 %v2867_v31, %v2867_v31 }
 0x2d6   : > { %1249 = vst [vmem:[%s2525_s14 + $0x50] sm:$0xff] %v2870_v33  ;;  %v2884_v36 = vmul.f32 %v2870_v33, %v2870_v33  ;;  %v1813_v38 = vpop.f32.mrb[12].mxu0  ;;  %v3139_v55 = vpack.c.bf16 %v2867_v31, %v2870_v33 }
 0x2d7   : > { %v2889_v39 = vadd.f32 %v1813_v38, %v2756_v53  ;;  %v1140_v40 = vpop.f32.mrb[13].mxu0 }
 0x2d8   : > { %v2892_v41 = vadd.f32 %v2756_v53, %v1140_v40  ;;  %v1943_v42 = vpack.c.bf16 %v2878_v35, %v2884_v36 }
 0x2d9   : > { %1252 = vst [vmem:[%s2525_s14 + $0x68] sm:$0xff] %v2889_v39  ;;  %v2900_v43 = vmul.f32 %v2889_v39, %v2889_v39 }
 0x2da   : > { %1251 = vst [vmem:[%s2525_s14 + $0x60] sm:$0xff] %v2892_v41  ;;  %v2906_v44 = vmul.f32 %v2892_v41, %v2892_v41  ;;  %v1816_v46 = vpop.f32.mrb[14].mxu0  ;;  %v3140_v57 = vpack.c.bf16 %v2889_v39, %v2892_v41 }
 0x2db   : > { %v2911_v47 = vadd.f32 %v1816_v46, %v2756_v53  ;;  %v1150_v48 = vpop.f32.mrb[15].mxu0 }
 0x2dc   : > { %v2914_v49 = vadd.f32 %v2756_v53, %v1150_v48  ;;  %v1947_v60 = vpack.c.bf16 %v2900_v43, %v2906_v44 }
 0x2dd   : > { %1254 = vst [vmem:[%s2525_s14 + $0x78] sm:$0xff] %v2911_v47  ;;  %v2922_v54 = vmul.f32 %v2911_v47, %v2911_v47 }
 0x2de   : > { %1253 = vst [vmem:[%s2525_s14 + $0x70] sm:$0xff] %v2914_v49  ;;  %v2928_v56 = vmul.f32 %v2914_v49, %v2914_v49  ;;  %v1819_v0 = vpop.f32.mrb[16].mxu0 }
 0x2df   : > { %v2933_v6 = vadd.f32 %v1819_v0, %v2756_v53  ;;  %v1160_v8 = vpop.f32.mrb[17].mxu0 }
 0x2e0   : > { %v2936_v14 = vadd.f32 %v2756_v53, %v1160_v8  ;;  %v1951_v16 = vpack.c.bf16 %v2922_v54, %v2928_v56 }
 0x2e1   : > { %1256 = vst [vmem:[%s2525_s14 + $0x88] sm:$0xff] %v2933_v6  ;;  %v1309_v22 = vmul.f32 %v2933_v6, %v2933_v6 }
 0x2e2   : > { %1255 = vst [vmem:[%s2525_s14 + $0x80] sm:$0xff] %v2936_v14  ;;  %v1822_v24 = vpop.f32.mrb[18].mxu0  ;;  %v1308_v30 = vmul.f32 %v2936_v14, %v2936_v14  ;;  %v1953_v32 = vpack.c.bf16 %v2933_v6, %v2936_v14 }
 0x2e3   : > { %v2951_v38 = vadd.f32 %v1822_v24, %v2756_v53  ;;  %v1170_v40 = vpop.f32.mrb[19].mxu0 }
 0x2e4   : > { %v2954_v46 = vadd.f32 %v2756_v53, %v1170_v40  ;;  %v1921_v48 = vpack.c.bf16 %v1309_v22, %v1308_v30 }
 0x2e5   : > { %1258 = vst [vmem:[%s2525_s14 + $0x98] sm:$0xff] %v2951_v38  ;;  %v1311_v0 = vmul.f32 %v2951_v38, %v2951_v38 }
 0x2e6   : > { %1257 = vst [vmem:[%s2525_s14 + $0x90] sm:$0xff] %v2954_v46  ;;  %v1310_v8 = vmul.f32 %v2954_v46, %v2954_v46  ;;  %v1825_v61 = vpop.f32.mrb[20].mxu0  ;;  %1922 = vmatprep.subr.bf16.mxu1 %v1921_v48  ;;  %v1957_v24 = vpack.c.bf16 %v2951_v38, %v2954_v46 }
 0x2e7   : > { %v2967_v40 = vadd.f32 %v1825_v61, %v2756_v53  ;;  %v1180_v45 = vpop.f32.mrb[21].mxu0  ;;  %1924 = vmatpush3.bf16.msra.mxu1 %v1923_v2 }
 0x2e8   : > { %v2973_v22 = vadd.f32 %v2756_v53, %v1180_v45  ;;  %v1925_v30 = vpack.c.bf16 %v1311_v0, %v1310_v8 }
 0x2e9   : > { %1260 = vst [vmem:[%s2525_s14 + $0xa8] sm:$0xff] %v2967_v40  ;;  %v1313_v48 = vmul.f32 %v2967_v40, %v2967_v40 }
 0x2ea   : > { %1259 = vst [vmem:[%s2525_s14 + $0xa0] sm:$0xff] %v2973_v22  ;;  %v1312_v61 = vmul.f32 %v2973_v22, %v2973_v22  ;;  %v1828_v37 = vpop.f32.mrb[22].mxu0  ;;  %1926 = vmatprep.subr.bf16.mxu1 %v1925_v30  ;;  %v1961_v58 = vpack.c.bf16 %v2967_v40, %v2973_v22 }
 0x2eb   : > { %v2986_v62 = vadd.f32 %v1828_v37, %v2756_v53  ;;  %v1190_v2 = vpop.f32.mrb[23].mxu0  ;;  %1928 = vmatpush3.bf16.msra.mxu1 %v1927_v10 }
 0x2ec   : > { %v2992_v45 = vadd.f32 %v2756_v53, %v1190_v2  ;;  %v1929_v0 = vpack.c.bf16 %v1313_v48, %v1312_v61 }
 0x2ed   : > { %1262 = vst [vmem:[%s2525_s14 + $0xb8] sm:$0xff] %v2986_v62  ;;  %v1315_v8 = vmul.f32 %v2986_v62, %v2986_v62 }
 0x2ee   : > { %1261 = vst [vmem:[%s2525_s14 + $0xb0] sm:$0xff] %v2992_v45  ;;  %v1314_v37 = vmul.f32 %v2992_v45, %v2992_v45  ;;  %v1831_v30 = vpop.f32.mrb[24].mxu0  ;;  %1930 = vmatprep.subr.bf16.mxu1 %v1929_v0  ;;  %v1965_v3 = vpack.c.bf16 %v2986_v62, %v2992_v45 }
 0x2ef   : > { %v1206_v4 = vadd.f32 %v1831_v30, %v2756_v53  ;;  %v1200_v10 = vpop.f32.mrb[25].mxu0  ;;  %1932 = vmatpush3.bf16.msra.mxu1 %v1931_v18 }
 0x2f0   : > { %v1201_v48 = vadd.f32 %v2756_v53, %v1200_v10  ;;  %v1933_v61 = vpack.c.bf16 %v1315_v8, %v1314_v37 }
 0x2f1   : > { %1264 = vst [vmem:[%s2525_s14 + $0xc8] sm:$0xff] %v1206_v4  ;;  %v1317_v2 = vmul.f32 %v1206_v4, %v1206_v4 }
 0x2f2   : > { %1263 = vst [vmem:[%s2525_s14 + $0xc0] sm:$0xff] %v1201_v48  ;;  %v1316_v29 = vmul.f32 %v1201_v48, %v1201_v48  ;;  %v1834_v0 = vpop.f32.mrb[26].mxu0  ;;  %1934 = vmatprep.subr.bf16.mxu1 %v1933_v61  ;;  %v1969_v21 = vpack.c.bf16 %v1206_v4, %v1201_v48 }
 0x2f3   : > { %v1216_v62 = vadd.f32 %v1834_v0, %v2756_v53  ;;  %v1210_v45 = vpop.f32.mrb[27].mxu0  ;;  %1936 = vmatpush3.bf16.msra.mxu1 %v1935_v26 }
 0x2f4   : > { %v1211_v11 = vadd.f32 %v2756_v53, %v1210_v45  ;;  %v1937_v12 = vpack.c.bf16 %v1317_v2, %v1316_v29 }
 0x2f5   : > { %1266 = vst [vmem:[%s2525_s14 + $0xd8] sm:$0xff] %v1216_v62  ;;  %v1319_v18 = vmul.f32 %v1216_v62, %v1216_v62 }
 0x2f6   : > { %1265 = vst [vmem:[%s2525_s14 + $0xd0] sm:$0xff] %v1211_v11  ;;  %v1318_v8 = vmul.f32 %v1211_v11, %v1211_v11  ;;  %v1837_v37 = vpop.f32.mrb[28].mxu0  ;;  %1938 = vmatprep.subr.bf16.mxu1 %v1937_v12  ;;  %v1973_v30 = vpack.c.bf16 %v1216_v62, %v1211_v11 }
 0x2f7   : > { %v1226_v4 = vadd.f32 %v1837_v37, %v2756_v53  ;;  %v1220_v10 = vpop.f32.mrb[29].mxu0  ;;  %1940 = vmatpush3.bf16.msra.mxu1 %v1939_v34 }
 0x2f8   : > { %v1221_v19 = vadd.f32 %v2756_v53, %v1220_v10  ;;  %v1941_v20 = vpack.c.bf16 %v1319_v18, %v1318_v8 }
 0x2f9   : > { %1268 = vst [vmem:[%s2525_s14 + $0xe8] sm:$0xff] %v1226_v4  ;;  %v1321_v26 = vmul.f32 %v1226_v4, %v1226_v4 }
 0x2fa   : > { %1267 = vst [vmem:[%s2525_s14 + $0xe0] sm:$0xff] %v1221_v19  ;;  %v1320_v29 = vmul.f32 %v1221_v19, %v1221_v19  ;;  %v1840_v48 = vpop.f32.mrb[30].mxu0  ;;  %1942 = vmatprep.subr.bf16.mxu1 %v1941_v20  ;;  %v1977_v61 = vpack.c.bf16 %v1226_v4, %v1221_v19 }
 0x2fb   : > { %v1236_v2 = vadd.f32 %v1840_v48, %v2756_v53  ;;  %v1230_v0 = vpop.f32.mrb[31].mxu0  ;;  %1944 = vmatpush3.bf16.msra.mxu1 %v1943_v42 }
 0x2fc   : > { %v1231_v27 = vadd.f32 %v2756_v53, %v1230_v0  ;;  %v1945_v28 = vpack.c.bf16 %v1321_v26, %v1320_v29  ;;  %v3138_v53 = vpack.c.bf16 %v2845_v23, %v2848_v25 }
 0x2fd   : > { %1270 = vst [vmem:[%s2525_s14 + $0xf8] sm:$0xff] %v1236_v2  ;;  %v1323_v34 = vmul.f32 %v1236_v2, %v1236_v2 }
 0x2fe   : > { %1269 = vst [vmem:[%s2525_s14 + $0xf0] sm:$0xff] %v1231_v27  ;;  %v1322_v62 = vmul.f32 %v1231_v27, %v1231_v27  ;;  %1946 = vmatprep.subr.bf16.mxu1 %v1945_v28  ;;  %v1981_v45 = vpack.c.bf16 %v1236_v2, %v1231_v27 }
 0x2ff   : > { %1948 = vmatpush3.bf16.msra.mxu1 %v1947_v60 }
 0x300   : > { %v1949_v11 = vpack.c.bf16 %v1323_v34, %v1322_v62 }
 0x302   : > { %1950 = vmatprep.subr.bf16.mxu1 %v1949_v11 }
 0x303   : > { %1952 = vmatpush3.bf16.msra.mxu1 %v1951_v16 }
 0x304   : > { %1954 = vmatprep.subr.bf16.mxu1 %v1953_v32 }
 0x306   : > { %1637 = vmatmul.mubr.msk.f32.vlgmr.msra.gmra.mrb[0].mxu1 %vm1289_vm2, %v2751_v52 }
 0x307   : > { %1956 = vmatpush3.bf16.msra.mxu1 %v1955_v59  ;;  %1638 = vmatprep.mubr.msk.f32.mxu1 %vm1286_vm3, %v2748_v51  ;;  %v3137_v51 = vpack.c.bf16 %v2823_v15, %v2826_v17  ;;  %v3141_v59 = vpack.c.bf16 %v2911_v47, %v2914_v49 }
 0x308   : > { %1958 = vmatprep.subr.bf16.mxu1 %v1957_v24 }
 0x30b   : > { %1960 = vmatpush3.bf16.msra.mxu1 %v1959_v5 }
 0x30c   : > { %1962 = vmatprep.subr.bf16.mxu1 %v1961_v58 }
 0x30f   : > { %1964 = vmatpush3.bf16.msra.mxu1 %v1963_v13 }
 0x310   : > { %1966 = vmatprep.subr.bf16.mxu1 %v1965_v3 }
 0x313   : > { %1968 = vmatpush3.bf16.msra.mxu1 %v3137_v51 }
 0x314   : > { %1970 = vmatprep.subr.bf16.mxu1 %v1969_v21 }
 0x317   : > { %1972 = vmatpush3.bf16.msra.mxu1 %v3138_v53 }
 0x318   : > { %1974 = vmatprep.subr.bf16.mxu1 %v1973_v30 }
 0x31b   : > { %1976 = vmatpush3.bf16.msra.mxu1 %v3139_v55 }
 0x31c   : > { %1978 = vmatprep.subr.bf16.mxu1 %v1977_v61 }
 0x31f   : > { %1980 = vmatpush3.bf16.msra.mxu1 %v3140_v57 }
 0x320   : > { %1982 = vmatprep.subr.bf16.mxu1 %v1981_v45 }
 0x323   : > { %1984 = vmatpush3.bf16.msra.mxu1 %v3141_v59 }
 0x326   : > { %1639 = vmatmul.mubr.msk.f32.vlgmr.msra.gmra.mrb[2].mxu1 %vm1286_vm3, %v2751_v52 }
 0x3d9   : > { %v1723_v63 = vpop.f32.mrb[0].mxu1 }
 0x3da   : > { %v1724_v1 = vpop.f32.mrb[1].mxu1 }
 0x3db   : > { %v1725_v5 = vadd.f32 %v1724_v1, %v1723_v63 }
 0x3f9   : > { %v1758_v7 = vpop.f32.mrb[2].mxu1 }
 0x3fa   : > { %v1759_v9 = vpop.f32.mrb[3].mxu1 }
 0x3fb   : > { %v1760_v13 = vadd.f32 %v1759_v9, %v1758_v7 }
 0x3fd   : > { %v1461_v15 = vadd.f32 %v1760_v13, %v1725_v5 }
 0x3ff   : > { %1464 = vst [vmem:[%s2531_s25] sm:$0xff] %v1461_v15 }
 0x400 PF: > { %s24_s13 = sadd.s32 1, %s2271_s13   ;;  %s3142_s14 = sld [smem:[#allocation10_spill]] }
 0x401   : > { %p21_p13 = scmp.ge.s32.totalorder %s24_s13, 6   ;;  %s3143_s28 = smov %s2247_s4 }
 0x402   : > { %s3144_s4 = smov %s2251_s29  ;;  %s3145_s29 = smov %s2471_s19 }
 0x403   : > { %s3146_s30 = smov %s2263_s11  ;;  %s3147_s10 = smov %s2267_s12 }
 0x404   : > { %s3149_s12 = smov %s3155_s26  ;;  %23 = sbr.rel (!%p21_p13) target bundleno = 9 (0x9), region = 123 }
 0x406   : > { %s3148_s11 = smov %s3142_s14 }
 0x40b   :  { %1501 = vsyncpa [#allocation4], 1 }
 0x40c   :  { %1503 = vsyncpa [#allocation4 + $0x1], 1 }
 0x40d   :  { %1504 = vsyncpa [#allocation6], 1 }

// kernel: dense_layer_forward_padded.4
= control target key start
LH: loop header
LB: loop body
LE: loop exit
PB: predicated region body
PF: predicated region fallthrough
CT: control target
= control target key end

     0   :  { %s3592_s0 = inlined_call_operand.vmem [shape: f32[1,128], index: 0, kind: input, shape index: {}]   ;;  %s3593_s1 = inlined_call_operand.vmem [shape: f32[1,128], index: 1, kind: input, shape index: {}]   ;;  %s3594_s2 = inlined_call_operand.vmem [shape: f32[512,512], index: 2, kind: input, shape index: {}]   ;;  %s3595_s3 = inlined_call_operand.vmem [shape: f32[512,128], index: 3, kind: input, shape index: {}]   ;;  %s3596_s4 = inlined_call_operand.vmem [shape: f32[128,128], index: 4, kind: input, shape index: {}]   ;;  %s3597_s5 = inlined_call_operand.vmem [shape: f32[1,128], index: 5, kind: input, shape index: {}]   ;;  %s3598_s6 = inlined_call_operand.vmem [shape: f32[128,128], index: 6, kind: input, shape index: {}]   ;;  %s3599_s7 = inlined_call_operand.vmem [shape: f32[1,128], index: 7, kind: input, shape index: {}]   ;;  %s3600_s8 = inlined_call_operand.vmem [shape: f32[512,128], index: 8, kind: output, shape index: {0}]   ;;  %s3601_s9 = inlined_call_operand.vmem [shape: f32[2,8,128], index: 9, kind: output, shape index: {1}]  }
   0x1   :  { %3605 = sst [smem:[#allocation7_spill]] %s3594_s2 }
   0x2   :  { %s2739_s30 = smov 0   ;;  %s2741_s10 = smov 0  }
   0x3   :  { %s2743_s11 = smov 0   ;;  %s2745_s12 = smov 0  }
   0x4   :  { %s2747_s13 = smov 0   ;;  %s2749_s14 = smov 0  }
   0x5   :  { %s2751_s15 = smov 0  }
   0x6 LB: > { %3606 = sst [smem:[#allocation4_spill]] %s2680_s14  ;;  %s29_s16 = sadd.s32 1, %s2676_s13  ;;  %s2684_s15 = sphi %s2751_s15, %s20_s15   ;;  %s2680_s14 = sphi %s2749_s14, %s3612_s14   ;;  %s2676_s13 = sphi %s2747_s13, %s3616_s13   ;;  %s2672_s12 = sphi %s2745_s12, %s3610_s12   ;;  %s2668_s11 = sphi %s2743_s11, %s3615_s11   ;;  %s2664_s10 = sphi %s2741_s10, %s3614_s10   ;;  %s2660_s30 = sphi %s2739_s30, %s3613_s30  }
   0x7   : > { %p30_p0 = scmp.ge.s32.totalorder %s29_s16, 2  ;;  %s32_s17 = sadd.s32 1, %s2680_s14 }
   0x8   : > { %p90_p1 = scmp.ne.s32.totalorder %s2664_s10, %s2660_s30  ;;  %p91_p2 = scmp.eq.s32.totalorder %s2684_s15, 0 }
   0x9   : > { %s3618_s16 = smov (%p30_p0, %s29_s16), 0  ;;  %s3620_s17 = smov (!%p30_p0, %s32_s17), %s2680_s14 }
   0xa   : > { %3607 = sst [smem:[#allocation5_spill]] %s3618_s16  ;;  %p92_p3 = por %p91_p2, %p90_p1 }
   0xb   : > { %p34_p4 = scmp.ge.s32.totalorder %s3620_s17, 2  ;;  %s79_s18 = ssub.s32 %s2676_s13, %s3618_s16 }
   0xc   : > { %s83_s21 = sadd.s32 1, %s2664_s10  ;;  %p2008_p6 = scmp.ge.s32.totalorder %s2684_s15, 4 }
   0xd   : > { %s3622_s17 = smov (%p34_p4, %s3620_s17), 0 }
   0xe   : > { %3608 = sst [smem:[#allocation6_spill]] %s3622_s17  ;;  %s78_s19 = ssub.s32 %s2680_s14, %s3622_s17 }
   0xf   : > { %s80_s20 = sor.u32 %s79_s18, %s78_s19  ;;  %296 = sbr.rel (%p2008_p6) target bundleno = 64 (0x40), region = 40 }
  0x10   : > { %p81_p5 = scmp.eq.s32.totalorder %s80_s20, 0 }
  0x12   : > { %s2790_s22 = scalar_select %p81_p5, %s2664_s10, %s83_s21  }
  0x16   : > { %299 = sbr.rel (!%p92_p3) target bundleno = 64 (0x40), region = 44  ;;  %s301_s23 = sand.u32 (%p92_p3), 1, %s2664_s10  }
  0x17   : > { %s2011_s24 = sshll.u32 (%p92_p3), %s2676_s13, 1  ;;  %s2009_s25 = sshll.u32 (%p92_p3), %s301_s23, 9 }
  0x18   : > { %s2036_s26 = sshll.u32 (%p92_p3), %s2680_s14, 7  ;;  %s3609_s2 = sld [smem:[#allocation7_spill]] (%p92_p3) }
  0x19   : > { %s307_s27 = sadd.s32 (%p92_p3), %s2036_s26, %s2011_s24  ;;  %s2804_s19 = scalar_lea.vmem (%p92_p3), [#allocation3], %s2009_s25 }
  0x1a   : > { %s2013_s28 = sshll.u32 (%p92_p3), %s307_s27, 3 }
  0x1e   : > { %s2799_s18 = scalar_lea.vmem %s3609_s2, %s2013_s28 }
  0x1f   : > { %v322_v0 = vld [vmem:[%s2799_s18] sm:$0xff]  ;;  %v324_v1 = vld [vmem:[%s2799_s18 + $0x8] sm:$0xff] }
  0x20   : > { %v326_v2 = vld [vmem:[%s2799_s18 + $0x20] sm:$0xff]  ;;  %323 = vst [vmem:[%s2804_s19] sm:$0xff] %v322_v0  ;;  %325 = vst [vmem:[%s2804_s19 + $0x8] sm:$0xff] %v324_v1  ;;  %v328_v3 = vld [vmem:[%s2799_s18 + $0x28] sm:$0xff] }
  0x21   : > { %327 = vst [vmem:[%s2804_s19 + $0x10] sm:$0xff] %v326_v2  ;;  %v330_v4 = vld [vmem:[%s2799_s18 + $0x40] sm:$0xff]  ;;  %v332_v5 = vld [vmem:[%s2799_s18 + $0x48] sm:$0xff]  ;;  %329 = vst [vmem:[%s2804_s19 + $0x18] sm:$0xff] %v328_v3 }
  0x22   : > { %331 = vst [vmem:[%s2804_s19 + $0x20] sm:$0xff] %v330_v4  ;;  %333 = vst [vmem:[%s2804_s19 + $0x28] sm:$0xff] %v332_v5  ;;  %v334_v6 = vld [vmem:[%s2799_s18 + $0x60] sm:$0xff]  ;;  %v336_v7 = vld [vmem:[%s2799_s18 + $0x68] sm:$0xff] }
  0x23   : > { %v338_v8 = vld [vmem:[%s2799_s18 + $0x80] sm:$0xff]  ;;  %335 = vst [vmem:[%s2804_s19 + $0x30] sm:$0xff] %v334_v6  ;;  %337 = vst [vmem:[%s2804_s19 + $0x38] sm:$0xff] %v336_v7  ;;  %v340_v9 = vld [vmem:[%s2799_s18 + $0x88] sm:$0xff] }
  0x24   : > { %339 = vst [vmem:[%s2804_s19 + $0x40] sm:$0xff] %v338_v8  ;;  %v342_v10 = vld [vmem:[%s2799_s18 + $0xa0] sm:$0xff]  ;;  %v344_v11 = vld [vmem:[%s2799_s18 + $0xa8] sm:$0xff]  ;;  %341 = vst [vmem:[%s2804_s19 + $0x48] sm:$0xff] %v340_v9 }
  0x25   : > { %343 = vst [vmem:[%s2804_s19 + $0x50] sm:$0xff] %v342_v10  ;;  %345 = vst [vmem:[%s2804_s19 + $0x58] sm:$0xff] %v344_v11  ;;  %v346_v12 = vld [vmem:[%s2799_s18 + $0xc0] sm:$0xff]  ;;  %v348_v13 = vld [vmem:[%s2799_s18 + $0xc8] sm:$0xff] }
  0x26   : > { %v350_v14 = vld [vmem:[%s2799_s18 + $0xe0] sm:$0xff]  ;;  %347 = vst [vmem:[%s2804_s19 + $0x60] sm:$0xff] %v346_v12  ;;  %349 = vst [vmem:[%s2804_s19 + $0x68] sm:$0xff] %v348_v13  ;;  %v352_v15 = vld [vmem:[%s2799_s18 + $0xe8] sm:$0xff] }
  0x27   : > { %351 = vst [vmem:[%s2804_s19 + $0x70] sm:$0xff] %v350_v14  ;;  %v354_v16 = vld [vmem:[%s2799_s18 + $0x100] sm:$0xff]  ;;  %v356_v17 = vld [vmem:[%s2799_s18 + $0x108] sm:$0xff]  ;;  %353 = vst [vmem:[%s2804_s19 + $0x78] sm:$0xff] %v352_v15 }
  0x28   : > { %355 = vst [vmem:[%s2804_s19 + $0x80] sm:$0xff] %v354_v16  ;;  %357 = vst [vmem:[%s2804_s19 + $0x88] sm:$0xff] %v356_v17  ;;  %v358_v18 = vld [vmem:[%s2799_s18 + $0x120] sm:$0xff]  ;;  %v360_v19 = vld [vmem:[%s2799_s18 + $0x128] sm:$0xff] }
  0x29   : > { %v362_v20 = vld [vmem:[%s2799_s18 + $0x140] sm:$0xff]  ;;  %359 = vst [vmem:[%s2804_s19 + $0x90] sm:$0xff] %v358_v18  ;;  %361 = vst [vmem:[%s2804_s19 + $0x98] sm:$0xff] %v360_v19  ;;  %v364_v21 = vld [vmem:[%s2799_s18 + $0x148] sm:$0xff] }
  0x2a   : > { %363 = vst [vmem:[%s2804_s19 + $0xa0] sm:$0xff] %v362_v20  ;;  %v366_v22 = vld [vmem:[%s2799_s18 + $0x160] sm:$0xff]  ;;  %v368_v23 = vld [vmem:[%s2799_s18 + $0x168] sm:$0xff]  ;;  %365 = vst [vmem:[%s2804_s19 + $0xa8] sm:$0xff] %v364_v21 }
  0x2b   : > { %367 = vst [vmem:[%s2804_s19 + $0xb0] sm:$0xff] %v366_v22  ;;  %369 = vst [vmem:[%s2804_s19 + $0xb8] sm:$0xff] %v368_v23  ;;  %v370_v24 = vld [vmem:[%s2799_s18 + $0x180] sm:$0xff]  ;;  %v372_v25 = vld [vmem:[%s2799_s18 + $0x188] sm:$0xff] }
  0x2c   : > { %v374_v26 = vld [vmem:[%s2799_s18 + $0x1a0] sm:$0xff]  ;;  %371 = vst [vmem:[%s2804_s19 + $0xc0] sm:$0xff] %v370_v24  ;;  %373 = vst [vmem:[%s2804_s19 + $0xc8] sm:$0xff] %v372_v25  ;;  %v376_v27 = vld [vmem:[%s2799_s18 + $0x1a8] sm:$0xff] }
  0x2d   : > { %375 = vst [vmem:[%s2804_s19 + $0xd0] sm:$0xff] %v374_v26  ;;  %v378_v28 = vld [vmem:[%s2799_s18 + $0x1c0] sm:$0xff]  ;;  %v380_v29 = vld [vmem:[%s2799_s18 + $0x1c8] sm:$0xff]  ;;  %377 = vst [vmem:[%s2804_s19 + $0xd8] sm:$0xff] %v376_v27 }
  0x2e   : > { %379 = vst [vmem:[%s2804_s19 + $0xe0] sm:$0xff] %v378_v28  ;;  %381 = vst [vmem:[%s2804_s19 + $0xe8] sm:$0xff] %v380_v29  ;;  %v382_v30 = vld [vmem:[%s2799_s18 + $0x1e0] sm:$0xff]  ;;  %v384_v31 = vld [vmem:[%s2799_s18 + $0x1e8] sm:$0xff] }
  0x2f   : > { %v386_v32 = vld [vmem:[%s2799_s18 + $0x200] sm:$0xff]  ;;  %383 = vst [vmem:[%s2804_s19 + $0xf0] sm:$0xff] %v382_v30  ;;  %385 = vst [vmem:[%s2804_s19 + $0xf8] sm:$0xff] %v384_v31  ;;  %v388_v33 = vld [vmem:[%s2799_s18 + $0x208] sm:$0xff] }
  0x30   : > { %387 = vst [vmem:[%s2804_s19 + $0x100] sm:$0xff] %v386_v32  ;;  %v390_v34 = vld [vmem:[%s2799_s18 + $0x220] sm:$0xff]  ;;  %v392_v35 = vld [vmem:[%s2799_s18 + $0x228] sm:$0xff]  ;;  %389 = vst [vmem:[%s2804_s19 + $0x108] sm:$0xff] %v388_v33 }
  0x31   : > { %391 = vst [vmem:[%s2804_s19 + $0x110] sm:$0xff] %v390_v34  ;;  %393 = vst [vmem:[%s2804_s19 + $0x118] sm:$0xff] %v392_v35  ;;  %v394_v36 = vld [vmem:[%s2799_s18 + $0x240] sm:$0xff]  ;;  %v396_v37 = vld [vmem:[%s2799_s18 + $0x248] sm:$0xff] }
  0x32   : > { %v398_v38 = vld [vmem:[%s2799_s18 + $0x260] sm:$0xff]  ;;  %395 = vst [vmem:[%s2804_s19 + $0x120] sm:$0xff] %v394_v36  ;;  %397 = vst [vmem:[%s2804_s19 + $0x128] sm:$0xff] %v396_v37  ;;  %v400_v39 = vld [vmem:[%s2799_s18 + $0x268] sm:$0xff] }
  0x33   : > { %399 = vst [vmem:[%s2804_s19 + $0x130] sm:$0xff] %v398_v38  ;;  %v402_v40 = vld [vmem:[%s2799_s18 + $0x280] sm:$0xff]  ;;  %v404_v41 = vld [vmem:[%s2799_s18 + $0x288] sm:$0xff]  ;;  %401 = vst [vmem:[%s2804_s19 + $0x138] sm:$0xff] %v400_v39 }
  0x34   : > { %403 = vst [vmem:[%s2804_s19 + $0x140] sm:$0xff] %v402_v40  ;;  %405 = vst [vmem:[%s2804_s19 + $0x148] sm:$0xff] %v404_v41  ;;  %v406_v42 = vld [vmem:[%s2799_s18 + $0x2a0] sm:$0xff]  ;;  %v408_v43 = vld [vmem:[%s2799_s18 + $0x2a8] sm:$0xff] }
  0x35   : > { %v410_v44 = vld [vmem:[%s2799_s18 + $0x2c0] sm:$0xff]  ;;  %407 = vst [vmem:[%s2804_s19 + $0x150] sm:$0xff] %v406_v42  ;;  %409 = vst [vmem:[%s2804_s19 + $0x158] sm:$0xff] %v408_v43  ;;  %v412_v45 = vld [vmem:[%s2799_s18 + $0x2c8] sm:$0xff] }
  0x36   : > { %411 = vst [vmem:[%s2804_s19 + $0x160] sm:$0xff] %v410_v44  ;;  %v414_v46 = vld [vmem:[%s2799_s18 + $0x2e0] sm:$0xff]  ;;  %v416_v47 = vld [vmem:[%s2799_s18 + $0x2e8] sm:$0xff]  ;;  %413 = vst [vmem:[%s2804_s19 + $0x168] sm:$0xff] %v412_v45 }
  0x37   : > { %415 = vst [vmem:[%s2804_s19 + $0x170] sm:$0xff] %v414_v46  ;;  %417 = vst [vmem:[%s2804_s19 + $0x178] sm:$0xff] %v416_v47  ;;  %v418_v48 = vld [vmem:[%s2799_s18 + $0x300] sm:$0xff]  ;;  %v420_v49 = vld [vmem:[%s2799_s18 + $0x308] sm:$0xff] }
  0x38   : > { %v422_v50 = vld [vmem:[%s2799_s18 + $0x320] sm:$0xff]  ;;  %419 = vst [vmem:[%s2804_s19 + $0x180] sm:$0xff] %v418_v48  ;;  %421 = vst [vmem:[%s2804_s19 + $0x188] sm:$0xff] %v420_v49  ;;  %v424_v51 = vld [vmem:[%s2799_s18 + $0x328] sm:$0xff] }
  0x39   : > { %423 = vst [vmem:[%s2804_s19 + $0x190] sm:$0xff] %v422_v50  ;;  %v426_v52 = vld [vmem:[%s2799_s18 + $0x340] sm:$0xff]  ;;  %v428_v53 = vld [vmem:[%s2799_s18 + $0x348] sm:$0xff]  ;;  %425 = vst [vmem:[%s2804_s19 + $0x198] sm:$0xff] %v424_v51 }
  0x3a   : > { %427 = vst [vmem:[%s2804_s19 + $0x1a0] sm:$0xff] %v426_v52  ;;  %429 = vst [vmem:[%s2804_s19 + $0x1a8] sm:$0xff] %v428_v53  ;;  %v430_v54 = vld [vmem:[%s2799_s18 + $0x360] sm:$0xff]  ;;  %v432_v55 = vld [vmem:[%s2799_s18 + $0x368] sm:$0xff] }
  0x3b   : > { %v434_v56 = vld [vmem:[%s2799_s18 + $0x380] sm:$0xff]  ;;  %431 = vst [vmem:[%s2804_s19 + $0x1b0] sm:$0xff] %v430_v54  ;;  %433 = vst [vmem:[%s2804_s19 + $0x1b8] sm:$0xff] %v432_v55  ;;  %v436_v57 = vld [vmem:[%s2799_s18 + $0x388] sm:$0xff] }
  0x3c   : > { %435 = vst [vmem:[%s2804_s19 + $0x1c0] sm:$0xff] %v434_v56  ;;  %v438_v58 = vld [vmem:[%s2799_s18 + $0x3a0] sm:$0xff]  ;;  %v440_v59 = vld [vmem:[%s2799_s18 + $0x3a8] sm:$0xff]  ;;  %437 = vst [vmem:[%s2804_s19 + $0x1c8] sm:$0xff] %v436_v57 }
  0x3d   : > { %439 = vst [vmem:[%s2804_s19 + $0x1d0] sm:$0xff] %v438_v58  ;;  %441 = vst [vmem:[%s2804_s19 + $0x1d8] sm:$0xff] %v440_v59  ;;  %v442_v60 = vld [vmem:[%s2799_s18 + $0x3c0] sm:$0xff]  ;;  %v444_v61 = vld [vmem:[%s2799_s18 + $0x3c8] sm:$0xff] }
  0x3e   : > { %v446_v62 = vld [vmem:[%s2799_s18 + $0x3e0] sm:$0xff]  ;;  %443 = vst [vmem:[%s2804_s19 + $0x1e0] sm:$0xff] %v442_v60  ;;  %445 = vst [vmem:[%s2804_s19 + $0x1e8] sm:$0xff] %v444_v61  ;;  %v448_v63 = vld [vmem:[%s2799_s18 + $0x3e8] sm:$0xff] }
  0x3f   : > { %447 = vst [vmem:[%s2804_s19 + $0x1f0] sm:$0xff] %v446_v62  ;;  %449 = vst [vmem:[%s2804_s19 + $0x1f8] sm:$0xff] %v448_v63 }
  0x40 PF: > { %p2014_p7 = scmp.ge.s32.totalorder %s2684_s15, 1  ;;  %p463_p8 = scmp.lt.s32.totalorder %s2684_s15, 5 }
  0x42   : > { %p464_p9 = pnand %p2014_p7, %p463_p8 }
  0x43   : > { %s470_s17 = sand.u32 (!%p464_p9), 1, %s2660_s30   ;;  %s2016_s20 = sshll.u32 (!%p464_p9), %s2668_s11, 5 }
  0x44   : > { %467 = sbr.rel (%p464_p9) target bundleno = 1165 (0x48d), region = 71  ;;  %s2015_s21 = sshll.u32 (!%p464_p9), %s470_s17, 9 }
  0x45   : > { %p517_p10 = scmp.lt.s32.totalorder (!%p464_p9), %s2016_s20, 63  ;;  %s2018_s23 = sshll.u32 (!%p464_p9), %s2672_s12, 5 }
  0x46   : > { %p523_p11 = scmp.lt.s32.totalorder (!%p464_p9), %s2018_s23, 63  ;;  %p528_p12 = scmp.lt.s32.totalorder (!%p464_p9), %s2672_s12, 1 }
  0x47   : > { %p2021_p13 = scmp.ne.s32.totalorder (!%p464_p9), %s2668_s11, 0 }
  0x4b   : > { %s3624_s20 = smov (!%p517_p10, %s2016_s20), 63  ;;  %s3626_s23 = smov (!%p523_p11, %s2018_s23), 63 }
  0x4c   : > { %s2017_s24 = sshll.u32 %s3624_s20, 3  ;;  %s2019_s29 = sshll.u32 %s3626_s23, 3  ;;  %v2686_v0 = vmov (!%p2021_p13), 0.0  }
  0x4d   : > { %s2940_s27 = scalar_lea.vmem %s3595_s3, %s2017_s24  ;;  %s2946_s30 = scalar_lea.vmem %s3600_s8, %s2019_s29  ;;  %536 = vst [vmem:[#allocation2] sm:$0xff] (!%p2021_p13), %v2686_v0  ;;  %537 = vst [vmem:[#allocation2 + $0x8] sm:$0xff] (!%p2021_p13), %v2686_v0 }
  0x4e   : > { %s529_s28 = scalar_select %p528_p12, %s2672_s12, 1 }
  0x4f   : > { %s2953_s20 = scalar_lea.vmem [#allocation3], %s2015_s21  ;;  %535 = sbr.rel (%p2021_p13) target bundleno = 94 (0x5e), region = 79  ;;  %538 = vst [vmem:[#allocation2 + $0x10] sm:$0xff] (!%p2021_p13), %v2686_v0  ;;  %539 = vst [vmem:[#allocation2 + $0x18] sm:$0xff] (!%p2021_p13), %v2686_v0 }
  0x50   : > { %s2020_s17 = sshll.u32 %s529_s28, 3  ;;  %540 = vst [vmem:[#allocation2 + $0x20] sm:$0xff] (!%p2021_p13), %v2686_v0  ;;  %541 = vst [vmem:[#allocation2 + $0x28] sm:$0xff] (!%p2021_p13), %v2686_v0 }
  0x51   : > { %s2951_s14 = scalar_lea.vmem %s3601_s9, %s2020_s17  ;;  %542 = vst [vmem:[#allocation2 + $0x30] sm:$0xff] (!%p2021_p13), %v2686_v0  ;;  %543 = vst [vmem:[#allocation2 + $0x38] sm:$0xff] (!%p2021_p13), %v2686_v0 }
  0x52   : > { %544 = vst [vmem:[#allocation2 + $0x40] sm:$0xff] (!%p2021_p13), %v2686_v0  ;;  %545 = vst [vmem:[#allocation2 + $0x48] sm:$0xff] (!%p2021_p13), %v2686_v0 }
  0x53   : > { %546 = vst [vmem:[#allocation2 + $0x50] sm:$0xff] (!%p2021_p13), %v2686_v0  ;;  %547 = vst [vmem:[#allocation2 + $0x58] sm:$0xff] (!%p2021_p13), %v2686_v0 }
  0x54   : > { %548 = vst [vmem:[#allocation2 + $0x60] sm:$0xff] (!%p2021_p13), %v2686_v0  ;;  %549 = vst [vmem:[#allocation2 + $0x68] sm:$0xff] (!%p2021_p13), %v2686_v0 }
  0x55   : > { %550 = vst [vmem:[#allocation2 + $0x70] sm:$0xff] (!%p2021_p13), %v2686_v0  ;;  %551 = vst [vmem:[#allocation2 + $0x78] sm:$0xff] (!%p2021_p13), %v2686_v0 }
  0x56   : > { %552 = vst [vmem:[#allocation2 + $0x80] sm:$0xff] %v2686_v0  ;;  %553 = vst [vmem:[#allocation2 + $0x88] sm:$0xff] %v2686_v0 }
  0x57   : > { %554 = vst [vmem:[#allocation2 + $0x90] sm:$0xff] %v2686_v0  ;;  %555 = vst [vmem:[#allocation2 + $0x98] sm:$0xff] %v2686_v0 }
  0x58   : > { %556 = vst [vmem:[#allocation2 + $0xa0] sm:$0xff] %v2686_v0  ;;  %557 = vst [vmem:[#allocation2 + $0xa8] sm:$0xff] %v2686_v0 }
  0x59   : > { %558 = vst [vmem:[#allocation2 + $0xb0] sm:$0xff] %v2686_v0  ;;  %559 = vst [vmem:[#allocation2 + $0xb8] sm:$0xff] %v2686_v0 }
  0x5a   : > { %560 = vst [vmem:[#allocation2 + $0xc0] sm:$0xff] %v2686_v0  ;;  %561 = vst [vmem:[#allocation2 + $0xc8] sm:$0xff] %v2686_v0 }
  0x5b   : > { %562 = vst [vmem:[#allocation2 + $0xd0] sm:$0xff] %v2686_v0  ;;  %563 = vst [vmem:[#allocation2 + $0xd8] sm:$0xff] %v2686_v0 }
  0x5c   : > { %564 = vst [vmem:[#allocation2 + $0xe0] sm:$0xff] %v2686_v0  ;;  %565 = vst [vmem:[#allocation2 + $0xe8] sm:$0xff] %v2686_v0 }
  0x5d   : > { %566 = vst [vmem:[#allocation2 + $0xf0] sm:$0xff] %v2686_v0  ;;  %567 = vst [vmem:[#allocation2 + $0xf8] sm:$0xff] %v2686_v0 }
  0x5e PF: > { %v568_v1 = vld [vmem:[%s2940_s27] sm:$0xff]  ;;  %v569_v2 = vld [vmem:[%s2940_s27 + $0x8] sm:$0xff]  ;;  %v2687_v4 = vmov 0.0|0.0   ;;  %v570_v8 = vld [vmem:[%s2940_s27 + $0x10] sm:$0xff]  ;;  %p2024_p0 = scmp.ne.s32.totalorder %s2668_s11, 1 }
  0x5f   : > { %v2961_v3 = vld [vmem:[%s3592_s0] ss:$0 sm:$0xff]  ;;  %2363 = vmatprep.subr.bf16.mxu0 %v2687_v4  ;;  %2539 = vmatprep.subr.bf16.mxu1 %v2687_v4  ;;  %v571_v9 = vld [vmem:[%s2940_s27 + $0x18] sm:$0xff]  ;;  %v573_v13 = vld [vmem:[%s2940_s27 + $0x28] sm:$0xff]  ;;  %s2027_s18 = sshll.u32 (!%p2024_p0), %s2672_s12, 8 }
  0x60   : > { %v607_v5 = vmul.f32 %v2961_v3, %v568_v1  ;;  %v608_v6 = vmul.f32 %v2961_v3, %v569_v2  ;;  %v2970_v7 = vld [vmem:[%s3593_s1] ss:$0 sm:$0xff]  ;;  %v609_v10 = vmul.f32 %v2961_v3, %v570_v8  ;;  %v610_v11 = vmul.f32 %v2961_v3, %v571_v9  ;;  %v574_v14 = vld [vmem:[%s2940_s27 + $0x30] sm:$0xff]  ;;  %v575_v19 = vld [vmem:[%s2940_s27 + $0x38] sm:$0xff] }
  0x61   : > { %v572_v12 = vld [vmem:[%s2940_s27 + $0x20] sm:$0xff]  ;;  %v612_v18 = vmul.f32 %v2961_v3, %v573_v13  ;;  %v613_v22 = vmul.f32 %v2961_v3, %v574_v14  ;;  %v614_v23 = vmul.f32 %v2961_v3, %v575_v19  ;;  %v577_v31 = vld [vmem:[%s2940_s27 + $0x48] sm:$0xff]  ;;  %v578_v40 = vld [vmem:[%s2940_s27 + $0x50] sm:$0xff] }
  0x62   : > { %v646_v15 = vadd.f32 %v2970_v7, %v607_v5  ;;  %v647_v16 = vadd.f32 %v2970_v7, %v608_v6  ;;  %v611_v17 = vmul.f32 %v2961_v3, %v572_v12  ;;  %v648_v20 = vadd.f32 %v2970_v7, %v609_v10  ;;  %v576_v28 = vld [vmem:[%s2940_s27 + $0x40] sm:$0xff]  ;;  %v579_v41 = vld [vmem:[%s2940_s27 + $0x58] sm:$0xff]  ;;  %v743_v42 = vld [vmem:[%s2953_s20 + $0x8] sm:$0xff] }
  0x63   : > { %v649_v21 = vadd.f32 %v2970_v7, %v610_v11  ;;  %v651_v27 = vadd.f32 %v2970_v7, %v612_v18  ;;  %v652_v33 = vadd.f32 %v2970_v7, %v613_v22  ;;  %v653_v34 = vadd.f32 %v2970_v7, %v614_v23  ;;  %v775_v43 = vld [vmem:[%s2953_s20 + $0x108] sm:$0xff]  ;;  %870 = vmatprep.mubr.f32.mxu0 %v743_v42  ;;  %v580_v51 = vld [vmem:[%s2940_s27 + $0x60] sm:$0xff]  ;;  %v582_v60 = vld [vmem:[%s2940_s27 + $0x70] sm:$0xff] }
  0x64   : > { %v678_v24 = vmax.f32 %v646_v15, 0.0  ;;  %v679_v25 = vmax.f32 %v647_v16, 0.0  ;;  %v650_v26 = vadd.f32 %v2970_v7, %v611_v17  ;;  %v680_v29 = vmax.f32 %v648_v20, 0.0  ;;  %950 = vmatprep.mubr.f32.mxu1 %v775_v43  ;;  %v581_v52 = vld [vmem:[%s2940_s27 + $0x68] sm:$0xff]  ;;  %v583_v61 = vld [vmem:[%s2940_s27 + $0x78] sm:$0xff]  ;;  %v584_v8 = vld [vmem:[%s2940_s27 + $0x80] sm:$0xff] }
  0x65   : > { %v681_v30 = vmax.f32 %v649_v21, 0.0  ;;  %v615_v35 = vmul.f32 %v2961_v3, %v576_v28  ;;  %v683_v38 = vmax.f32 %v651_v27, 0.0  ;;  %v616_v39 = vmul.f32 %v2961_v3, %v577_v31  ;;  %v585_v9 = vld [vmem:[%s2940_s27 + $0x88] sm:$0xff]  ;;  %v586_v17 = vld [vmem:[%s2940_s27 + $0x90] sm:$0xff]  ;;  %v587_v18 = vld [vmem:[%s2940_s27 + $0x98] sm:$0xff] }
  0x66   : > { %v2364_v32 = vpack.c.bf16 %v679_v25, %v678_v24  ;;  %v682_v37 = vmax.f32 %v650_v26, 0.0  ;;  %v684_v44 = vmax.f32 %v652_v33, 0.0  ;;  %v685_v45 = vmax.f32 %v653_v34, 0.0  ;;  %v588_v26 = vld [vmem:[%s2940_s27 + $0xa0] sm:$0xff]  ;;  %v589_v27 = vld [vmem:[%s2940_s27 + $0xa8] sm:$0xff] }
  0x67   : > { %v2367_v36 = vpack.c.bf16 %v681_v30, %v680_v29  ;;  %v654_v46 = vadd.f32 %v2970_v7, %v615_v35  ;;  %v617_v47 = vmul.f32 %v2961_v3, %v578_v40  ;;  %v655_v49 = vadd.f32 %v2970_v7, %v616_v39  ;;  %v590_v35 = vld [vmem:[%s2940_s27 + $0xb0] sm:$0xff] }
  0x68   : > { %2365 = vmatpush1.bf16.msra.mxu0 %v2364_v32  ;;  %2555 = vmatpush1.bf16.msra.mxu1 %v2364_v32  ;;  %v2370_v48 = vpack.c.bf16 %v683_v38, %v682_v37  ;;  %v618_v50 = vmul.f32 %v2961_v3, %v579_v41  ;;  %v2373_v53 = vpack.c.bf16 %v685_v45, %v684_v44  ;;  %v592_v44 = vld [vmem:[%s2940_s27 + $0xc0] sm:$0xff]  ;;  %v593_v45 = vld [vmem:[%s2940_s27 + $0xc8] sm:$0xff] }
  0x69   : > { %2366 = vmatprep.subr.bf16.mxu0 %v2687_v4  ;;  %2540 = vmatprep.subr.bf16.mxu1 %v2687_v4  ;;  %v686_v54 = vmax.f32 %v654_v46, 0.0  ;;  %v656_v55 = vadd.f32 %v2970_v7, %v617_v47  ;;  %v687_v56 = vmax.f32 %v655_v49, 0.0  ;;  %v619_v58 = vmul.f32 %v2961_v3, %v580_v51 }
  0x6a   : > { %v657_v57 = vadd.f32 %v2970_v7, %v618_v50  ;;  %v620_v59 = vmul.f32 %v2961_v3, %v581_v52  ;;  %v621_v63 = vmul.f32 %v2961_v3, %v582_v60  ;;  %v622_v0 = vmul.f32 %v2961_v3, %v583_v61 }
  0x6b   : > { %v688_v62 = vmax.f32 %v656_v55, 0.0  ;;  %v2376_v1 = vpack.c.bf16 %v687_v56, %v686_v54  ;;  %v658_v5 = vadd.f32 %v2970_v7, %v619_v58  ;;  %v623_v12 = vmul.f32 %v2961_v3, %v584_v8  ;;  %v595_v54 = vld [vmem:[%s2940_s27 + $0xd8] sm:$0xff] }
  0x6c   : > { %2368 = vmatpush1.bf16.msra.mxu0 %v2367_v36  ;;  %2556 = vmatpush1.bf16.msra.mxu1 %v2367_v36  ;;  %v689_v2 = vmax.f32 %v657_v57, 0.0  ;;  %v659_v6 = vadd.f32 %v2970_v7, %v620_v59  ;;  %v660_v10 = vadd.f32 %v2970_v7, %v621_v63  ;;  %v661_v11 = vadd.f32 %v2970_v7, %v622_v0  ;;  %v591_v36 = vld [vmem:[%s2940_s27 + $0xb8] sm:$0xff]  ;;  %v597_v63 = vld [vmem:[%s2940_s27 + $0xe8] sm:$0xff] }
  0x6d   : > { %2369 = vmatprep.subr.bf16.mxu0 %v2687_v4  ;;  %2541 = vmatprep.subr.bf16.mxu1 %v2687_v4  ;;  %v690_v14 = vmax.f32 %v658_v5, 0.0  ;;  %v624_v16 = vmul.f32 %v2961_v3, %v585_v9  ;;  %v662_v20 = vadd.f32 %v2970_v7, %v623_v12  ;;  %v625_v21 = vmul.f32 %v2961_v3, %v586_v17 }
  0x6e   : > { %v2379_v13 = vpack.c.bf16 %v689_v2, %v688_v62  ;;  %v691_v15 = vmax.f32 %v659_v6, 0.0  ;;  %v692_v19 = vmax.f32 %v660_v10, 0.0  ;;  %v693_v23 = vmax.f32 %v661_v11, 0.0  ;;  %v596_v62 = vld [vmem:[%s2940_s27 + $0xe0] sm:$0xff]  ;;  %v598_v10 = vld [vmem:[%s2940_s27 + $0xf0] sm:$0xff]  ;;  %v599_v11 = vld [vmem:[%s2940_s27 + $0xf8] sm:$0xff] }
  0x6f   : > { %v663_v24 = vadd.f32 %v2970_v7, %v624_v16  ;;  %v626_v25 = vmul.f32 %v2961_v3, %v587_v18  ;;  %v694_v28 = vmax.f32 %v662_v20, 0.0  ;;  %v664_v29 = vadd.f32 %v2970_v7, %v625_v21 }
  0x70   : > { %2371 = vmatpush1.bf16.msra.mxu0 %v2370_v48  ;;  %2557 = vmatpush1.bf16.msra.mxu1 %v2370_v48  ;;  %v2382_v22 = vpack.c.bf16 %v691_v15, %v690_v14  ;;  %v627_v30 = vmul.f32 %v2961_v3, %v588_v26  ;;  %v2385_v31 = vpack.c.bf16 %v693_v23, %v692_v19  ;;  %v742_v26 = vld [vmem:[%s2953_s20] sm:$0xff] }
  0x71   : > { %2372 = vmatprep.subr.bf16.mxu0 %v2687_v4  ;;  %2542 = vmatprep.subr.bf16.mxu1 %v2687_v4  ;;  %v695_v32 = vmax.f32 %v663_v24, 0.0  ;;  %v665_v33 = vadd.f32 %v2970_v7, %v626_v25  ;;  %v628_v34 = vmul.f32 %v2961_v3, %v589_v27  ;;  %v696_v37 = vmax.f32 %v664_v29, 0.0  ;;  %v774_v27 = vld [vmem:[%s2953_s20 + $0x100] sm:$0xff]  ;;  %v777_v29 = vld [vmem:[%s2953_s20 + $0x118] sm:$0xff] }
  0x72   : > { %v666_v38 = vadd.f32 %v2970_v7, %v627_v30  ;;  %v629_v39 = vmul.f32 %v2961_v3, %v590_v35  ;;  %v630_v43 = vmul.f32 %v2961_v3, %v591_v36  ;;  %v631_v48 = vmul.f32 %v2961_v3, %v592_v44  ;;  %v744_v30 = vld [vmem:[%s2953_s20 + $0x10] sm:$0xff]  ;;  %v749_v35 = vld [vmem:[%s2953_s20 + $0x38] sm:$0xff] }
  0x73   : > { %v2388_v40 = vpack.c.bf16 %v695_v32, %v694_v28  ;;  %v697_v41 = vmax.f32 %v665_v33, 0.0  ;;  %v667_v42 = vadd.f32 %v2970_v7, %v628_v34  ;;  %v632_v52 = vmul.f32 %v2961_v3, %v593_v45  ;;  %v745_v28 = vld [vmem:[%s2953_s20 + $0x18] sm:$0xff]  ;;  %v747_v32 = vld [vmem:[%s2953_s20 + $0x28] sm:$0xff]  ;;  %v746_v33 = vld [vmem:[%s2953_s20 + $0x20] sm:$0xff] }
  0x74   : > { %2374 = vmatpush1.bf16.msra.mxu0 %v2373_v53  ;;  %2558 = vmatpush1.bf16.msra.mxu1 %v2373_v53  ;;  %v698_v46 = vmax.f32 %v666_v38, 0.0  ;;  %v668_v47 = vadd.f32 %v2970_v7, %v629_v39  ;;  %v669_v51 = vadd.f32 %v2970_v7, %v630_v43  ;;  %v594_v53 = vld [vmem:[%s2940_s27 + $0xd0] sm:$0xff]  ;;  %v670_v56 = vadd.f32 %v2970_v7, %v631_v48  ;;  %v778_v34 = vld [vmem:[%s2953_s20 + $0x120] sm:$0xff]  ;;  %v781_v36 = vld [vmem:[%s2953_s20 + $0x138] sm:$0xff] }
  0x75   : > { %2375 = vmatprep.subr.bf16.mxu0 %v2687_v4  ;;  %2543 = vmatprep.subr.bf16.mxu1 %v2687_v4  ;;  %v2391_v49 = vpack.c.bf16 %v697_v41, %v696_v37  ;;  %v699_v50 = vmax.f32 %v667_v42, 0.0  ;;  %v633_v57 = vmul.f32 %v2961_v3, %v594_v53  ;;  %v671_v60 = vadd.f32 %v2970_v7, %v632_v52  ;;  %v748_v37 = vld [vmem:[%s2953_s20 + $0x30] sm:$0xff]  ;;  %v751_v39 = vld [vmem:[%s2953_s20 + $0x48] sm:$0xff]  ;;  %v750_v41 = vld [vmem:[%s2953_s20 + $0x40] sm:$0xff] }
  0x76   : > { %v700_v55 = vmax.f32 %v668_v47, 0.0  ;;  %v701_v59 = vmax.f32 %v669_v51, 0.0  ;;  %v634_v61 = vmul.f32 %v2961_v3, %v595_v54  ;;  %v702_v0 = vmax.f32 %v670_v56, 0.0  ;;  %v780_v38 = vld [vmem:[%s2953_s20 + $0x130] sm:$0xff]  ;;  %v782_v42 = vld [vmem:[%s2953_s20 + $0x140] sm:$0xff]  ;;  %v753_v43 = vld [vmem:[%s2953_s20 + $0x58] sm:$0xff] }
  0x77   : > { %v2394_v58 = vpack.c.bf16 %v699_v50, %v698_v46  ;;  %v635_v2 = vmul.f32 %v2961_v3, %v596_v62  ;;  %v703_v6 = vmax.f32 %v671_v60, 0.0  ;;  %v636_v9 = vmul.f32 %v2961_v3, %v597_v63  ;;  %v785_v44 = vld [vmem:[%s2953_s20 + $0x158] sm:$0xff]  ;;  %v752_v45 = vld [vmem:[%s2953_s20 + $0x50] sm:$0xff]  ;;  %v755_v47 = vld [vmem:[%s2953_s20 + $0x68] sm:$0xff] }
  0x78   : > { %2377 = vmatpush1.bf16.msra.mxu0 %v2376_v1  ;;  %2559 = vmatpush1.bf16.msra.mxu1 %v2376_v1  ;;  %v672_v1 = vadd.f32 %v2970_v7, %v633_v57  ;;  %v2397_v5 = vpack.c.bf16 %v701_v59, %v700_v55  ;;  %v673_v8 = vadd.f32 %v2970_v7, %v634_v61  ;;  %v784_v46 = vld [vmem:[%s2953_s20 + $0x150] sm:$0xff]  ;;  %v787_v48 = vld [vmem:[%s2953_s20 + $0x168] sm:$0xff]  ;;  %v786_v50 = vld [vmem:[%s2953_s20 + $0x160] sm:$0xff] }
  0x79   : > { %2378 = vmatprep.subr.bf16.mxu0 %v2687_v4  ;;  %2544 = vmatprep.subr.bf16.mxu1 %v2687_v4  ;;  %v637_v14 = vmul.f32 %v2961_v3, %v598_v10  ;;  %v2400_v15 = vpack.c.bf16 %v703_v6, %v702_v0  ;;  %v675_v17 = vadd.f32 %v2970_v7, %v636_v9  ;;  %v757_v51 = vld [vmem:[%s2953_s20 + $0x78] sm:$0xff]  ;;  %v756_v53 = vld [vmem:[%s2953_s20 + $0x70] sm:$0xff]  ;;  %v759_v55 = vld [vmem:[%s2953_s20 + $0x88] sm:$0xff] }
  0x7a   : > { %v704_v12 = vmax.f32 %v672_v1, 0.0  ;;  %v705_v16 = vmax.f32 %v673_v8, 0.0  ;;  %v638_v18 = vmul.f32 %v2961_v3, %v599_v11  ;;  %v789_v52 = vld [vmem:[%s2953_s20 + $0x178] sm:$0xff]  ;;  %v788_v54 = vld [vmem:[%s2953_s20 + $0x170] sm:$0xff]  ;;  %v791_v56 = vld [vmem:[%s2953_s20 + $0x188] sm:$0xff] }
  0x7b   : > { %v707_v21 = vmax.f32 %v675_v17, 0.0  ;;  %v758_v57 = vld [vmem:[%s2953_s20 + $0x80] sm:$0xff]  ;;  %v761_v59 = vld [vmem:[%s2953_s20 + $0x98] sm:$0xff]  ;;  %v760_v61 = vld [vmem:[%s2953_s20 + $0x90] sm:$0xff] }
  0x7c   : > { %2380 = vmatpush1.bf16.msra.mxu0 %v2379_v13  ;;  %2560 = vmatpush1.bf16.msra.mxu1 %v2379_v13  ;;  %v674_v13 = vadd.f32 %v2970_v7, %v635_v2  ;;  %v2403_v20 = vpack.c.bf16 %v705_v16, %v704_v12  ;;  %v677_v23 = vadd.f32 %v2970_v7, %v638_v18  ;;  %v793_v60 = vld [vmem:[%s2953_s20 + $0x198] sm:$0xff]  ;;  %v792_v62 = vld [vmem:[%s2953_s20 + $0x190] sm:$0xff]  ;;  %v763_v63 = vld [vmem:[%s2953_s20 + $0xa8] sm:$0xff] }
  0x7d   : > { %2381 = vmatprep.subr.bf16.mxu0 %v2687_v4  ;;  %2545 = vmatprep.subr.bf16.mxu1 %v2687_v4  ;;  %v795_v0 = vld [vmem:[%s2953_s20 + $0x1a8] sm:$0xff]  ;;  %v762_v1 = vld [vmem:[%s2953_s20 + $0xa0] sm:$0xff]  ;;  %v797_v6 = vld [vmem:[%s2953_s20 + $0x1b8] sm:$0xff] }
  0x7e   : > { %v706_v19 = vmax.f32 %v674_v13, 0.0  ;;  %v709_v25 = vmax.f32 %v677_v23, 0.0  ;;  %v794_v2 = vld [vmem:[%s2953_s20 + $0x1a0] sm:$0xff]  ;;  %v764_v8 = vld [vmem:[%s2953_s20 + $0xb0] sm:$0xff]  ;;  %v767_v10 = vld [vmem:[%s2953_s20 + $0xc8] sm:$0xff] }
  0x7f   : > { %v796_v9 = vld [vmem:[%s2953_s20 + $0x1b0] sm:$0xff]  ;;  %v799_v11 = vld [vmem:[%s2953_s20 + $0x1c8] sm:$0xff]  ;;  %v766_v12 = vld [vmem:[%s2953_s20 + $0xc0] sm:$0xff] }
  0x80   : > { %2383 = vmatpush1.bf16.msra.mxu0 %v2382_v22  ;;  %2561 = vmatpush1.bf16.msra.mxu1 %v2382_v22  ;;  %v676_v22 = vadd.f32 %v2970_v7, %v637_v14  ;;  %v2406_v3 = vpack.c.bf16 %v707_v21, %v706_v19  ;;  %v798_v13 = vld [vmem:[%s2953_s20 + $0x1c0] sm:$0xff]  ;;  %v769_v14 = vld [vmem:[%s2953_s20 + $0xd8] sm:$0xff]  ;;  %v768_v16 = vld [vmem:[%s2953_s20 + $0xd0] sm:$0xff] }
  0x81   : > { %2384 = vmatprep.subr.bf16.mxu0 %v2687_v4  ;;  %2546 = vmatprep.subr.bf16.mxu1 %v2687_v4  ;;  %v800_v17 = vld [vmem:[%s2953_s20 + $0x1d0] sm:$0xff]  ;;  %v771_v18 = vld [vmem:[%s2953_s20 + $0xe8] sm:$0xff]  ;;  %v802_v21 = vld [vmem:[%s2953_s20 + $0x1e0] sm:$0xff] }
  0x82   : > { %v708_v24 = vmax.f32 %v676_v22, 0.0  ;;  %v803_v19 = vld [vmem:[%s2953_s20 + $0x1e8] sm:$0xff]  ;;  %v773_v22 = vld [vmem:[%s2953_s20 + $0xf8] sm:$0xff] }
  0x83   : > { %v805_v23 = vld [vmem:[%s2953_s20 + $0x1f8] sm:$0xff] }
  0x84   : > { %2386 = vmatpush1.bf16.msra.mxu0 %v2385_v31  ;;  %2562 = vmatpush1.bf16.msra.mxu1 %v2385_v31  ;;  %v2409_v7 = vpack.c.bf16 %v709_v25, %v708_v24  ;;  %v776_v31 = vld [vmem:[%s2953_s20 + $0x110] sm:$0xff]  ;;  %v710_v25 = vld [vmem:[#allocation2] sm:$0xff] }
  0x85   : > { %2387 = vmatprep.subr.bf16.mxu0 %v2687_v4  ;;  %2547 = vmatprep.subr.bf16.mxu1 %v2687_v4  ;;  %v804_v24 = vld [vmem:[%s2953_s20 + $0x1f0] sm:$0xff] }
  0x88   : > { %2389 = vmatpush1.bf16.msra.mxu0 %v2388_v40  ;;  %2563 = vmatpush1.bf16.msra.mxu1 %v2388_v40  ;;  %v783_v40 = vld [vmem:[%s2953_s20 + $0x148] sm:$0xff] }
  0x89   : > { %2390 = vmatprep.subr.bf16.mxu0 %v2687_v4  ;;  %2548 = vmatprep.subr.bf16.mxu1 %v2687_v4 }
  0x8c   : > { %2392 = vmatpush1.bf16.msra.mxu0 %v2391_v49  ;;  %2564 = vmatpush1.bf16.msra.mxu1 %v2391_v49  ;;  %v754_v49 = vld [vmem:[%s2953_s20 + $0x60] sm:$0xff] }
  0x8d   : > { %2393 = vmatprep.subr.bf16.mxu0 %v2687_v4  ;;  %2549 = vmatprep.subr.bf16.mxu1 %v2687_v4 }
  0x90   : > { %2395 = vmatpush1.bf16.msra.mxu0 %v2394_v58  ;;  %2565 = vmatpush1.bf16.msra.mxu1 %v2394_v58  ;;  %v790_v58 = vld [vmem:[%s2953_s20 + $0x180] sm:$0xff] }
  0x91   : > { %2396 = vmatprep.subr.bf16.mxu0 %v2687_v4  ;;  %2550 = vmatprep.subr.bf16.mxu1 %v2687_v4 }
  0x94   : > { %2398 = vmatpush1.bf16.msra.mxu0 %v2397_v5  ;;  %2566 = vmatpush1.bf16.msra.mxu1 %v2397_v5  ;;  %v765_v5 = vld [vmem:[%s2953_s20 + $0xb8] sm:$0xff] }
  0x95   : > { %2399 = vmatprep.subr.bf16.mxu0 %v2687_v4  ;;  %2551 = vmatprep.subr.bf16.mxu1 %v2687_v4 }
  0x98   : > { %2401 = vmatpush1.bf16.msra.mxu0 %v2400_v15  ;;  %2567 = vmatpush1.bf16.msra.mxu1 %v2400_v15  ;;  %v801_v15 = vld [vmem:[%s2953_s20 + $0x1d8] sm:$0xff] }
  0x99   : > { %2402 = vmatprep.subr.bf16.mxu0 %v2687_v4  ;;  %2552 = vmatprep.subr.bf16.mxu1 %v2687_v4 }
  0x9c   : > { %2404 = vmatpush1.bf16.msra.mxu0 %v2403_v20  ;;  %2568 = vmatpush1.bf16.msra.mxu1 %v2403_v20  ;;  %v770_v20 = vld [vmem:[%s2953_s20 + $0xe0] sm:$0xff] }
  0x9d   : > { %2405 = vmatprep.subr.bf16.mxu0 %v2687_v4  ;;  %2553 = vmatprep.subr.bf16.mxu1 %v2687_v4 }
  0xa0   : > { %2407 = vmatpush1.bf16.msra.mxu0 %v2406_v3  ;;  %2569 = vmatpush1.bf16.msra.mxu1 %v2406_v3  ;;  %v772_v3 = vld [vmem:[%s2953_s20 + $0xf0] sm:$0xff] }
  0xa1   : > { %2408 = vmatprep.subr.bf16.mxu0 %v2687_v4  ;;  %2554 = vmatprep.subr.bf16.mxu1 %v2687_v4  ;;  %v779_v4 = vld [vmem:[%s2953_s20 + $0x128] sm:$0xff] }
  0xa4   : > { %2410 = vmatpush1.bf16.msra.mxu0 %v2409_v7  ;;  %2570 = vmatpush1.bf16.msra.mxu1 %v2409_v7  ;;  %v726_v7 = vld [vmem:[#allocation2 + $0x80] sm:$0xff] }
  0xa7   : > { %871 = vmatmul.mubr.f32.vlgmr.msra.gmra.mrb[0].mxu0 %v742_v26  ;;  %951 = vmatmul.mubr.f32.vlgmr.msra.gmra.mrb[0].mxu1 %v774_v27 }
  0xa8   : > { %875 = vmatprep.mubr.f32.mxu0 %v745_v28  ;;  %955 = vmatprep.mubr.f32.mxu1 %v777_v29 }
  0xab   : > { %876 = vmatmul.mubr.f32.gmra.mrb[2].mxu0 %v744_v30  ;;  %956 = vmatmul.mubr.f32.gmra.mrb[2].mxu1 %v776_v31 }
  0xac   : > { %880 = vmatprep.mubr.f32.mxu0 %v747_v32  ;;  %960 = vmatprep.mubr.f32.mxu1 %v779_v4  ;;  %v711_v32 = vld [vmem:[#allocation2 + $0x8] sm:$0xff] }
  0xad   : > { %v727_v4 = vld [vmem:[#allocation2 + $0x88] sm:$0xff] }
  0xaf   : > { %881 = vmatmul.mubr.f32.gmra.mrb[4].mxu0 %v746_v33  ;;  %961 = vmatmul.mubr.f32.gmra.mrb[4].mxu1 %v778_v34 }
  0xb0   : > { %885 = vmatprep.mubr.f32.mxu0 %v749_v35  ;;  %965 = vmatprep.mubr.f32.mxu1 %v781_v36 }
  0xb3   : > { %886 = vmatmul.mubr.f32.gmra.mrb[6].mxu0 %v748_v37  ;;  %966 = vmatmul.mubr.f32.gmra.mrb[6].mxu1 %v780_v38 }
  0xb4   : > { %890 = vmatprep.mubr.f32.mxu0 %v751_v39  ;;  %970 = vmatprep.mubr.f32.mxu1 %v783_v40  ;;  %v712_v39 = vld [vmem:[#allocation2 + $0x10] sm:$0xff] }
  0xb5   : > { %v728_v40 = vld [vmem:[#allocation2 + $0x90] sm:$0xff] }
  0xb7   : > { %891 = vmatmul.mubr.f32.gmra.mrb[8].mxu0 %v750_v41  ;;  %971 = vmatmul.mubr.f32.gmra.mrb[8].mxu1 %v782_v42 }
  0xb8   : > { %895 = vmatprep.mubr.f32.mxu0 %v753_v43  ;;  %975 = vmatprep.mubr.f32.mxu1 %v785_v44 }
  0xbb   : > { %896 = vmatmul.mubr.f32.gmra.mrb[10].mxu0 %v752_v45  ;;  %976 = vmatmul.mubr.f32.gmra.mrb[10].mxu1 %v784_v46 }
  0xbc   : > { %900 = vmatprep.mubr.f32.mxu0 %v755_v47  ;;  %980 = vmatprep.mubr.f32.mxu1 %v787_v48  ;;  %v713_v47 = vld [vmem:[#allocation2 + $0x18] sm:$0xff] }
  0xbd   : > { %v729_v48 = vld [vmem:[#allocation2 + $0x98] sm:$0xff] }
  0xbf   : > { %901 = vmatmul.mubr.f32.gmra.mrb[12].mxu0 %v754_v49  ;;  %981 = vmatmul.mubr.f32.gmra.mrb[12].mxu1 %v786_v50 }
  0xc0   : > { %905 = vmatprep.mubr.f32.mxu0 %v757_v51  ;;  %985 = vmatprep.mubr.f32.mxu1 %v789_v52 }
  0xc3   : > { %906 = vmatmul.mubr.f32.gmra.mrb[14].mxu0 %v756_v53  ;;  %986 = vmatmul.mubr.f32.gmra.mrb[14].mxu1 %v788_v54 }
  0xc4   : > { %910 = vmatprep.mubr.f32.mxu0 %v759_v55  ;;  %990 = vmatprep.mubr.f32.mxu1 %v791_v56  ;;  %v714_v55 = vld [vmem:[#allocation2 + $0x20] sm:$0xff] }
  0xc5   : > { %v730_v56 = vld [vmem:[#allocation2 + $0xa0] sm:$0xff] }
  0xc7   : > { %911 = vmatmul.mubr.f32.gmra.mrb[16].mxu0 %v758_v57  ;;  %991 = vmatmul.mubr.f32.gmra.mrb[16].mxu1 %v790_v58 }
  0xc8   : > { %915 = vmatprep.mubr.f32.mxu0 %v761_v59  ;;  %995 = vmatprep.mubr.f32.mxu1 %v793_v60 }
  0xcb   : > { %916 = vmatmul.mubr.f32.gmra.mrb[18].mxu0 %v760_v61  ;;  %996 = vmatmul.mubr.f32.gmra.mrb[18].mxu1 %v792_v62 }
  0xcc   : > { %920 = vmatprep.mubr.f32.mxu0 %v763_v63  ;;  %1000 = vmatprep.mubr.f32.mxu1 %v795_v0  ;;  %v715_v63 = vld [vmem:[#allocation2 + $0x28] sm:$0xff] }
  0xcd   : > { %v731_v0 = vld [vmem:[#allocation2 + $0xa8] sm:$0xff] }
  0xcf   : > { %921 = vmatmul.mubr.f32.gmra.mrb[20].mxu0 %v762_v1  ;;  %1001 = vmatmul.mubr.f32.gmra.mrb[20].mxu1 %v794_v2 }
  0xd0   : > { %925 = vmatprep.mubr.f32.mxu0 %v765_v5  ;;  %1005 = vmatprep.mubr.f32.mxu1 %v797_v6 }
  0xd3   : > { %926 = vmatmul.mubr.f32.gmra.mrb[22].mxu0 %v764_v8  ;;  %1006 = vmatmul.mubr.f32.gmra.mrb[22].mxu1 %v796_v9 }
  0xd4   : > { %930 = vmatprep.mubr.f32.mxu0 %v767_v10  ;;  %1010 = vmatprep.mubr.f32.mxu1 %v799_v11  ;;  %v716_v10 = vld [vmem:[#allocation2 + $0x30] sm:$0xff] }
  0xd5   : > { %v732_v11 = vld [vmem:[#allocation2 + $0xb0] sm:$0xff] }
  0xd7   : > { %931 = vmatmul.mubr.f32.gmra.mrb[24].mxu0 %v766_v12  ;;  %1011 = vmatmul.mubr.f32.gmra.mrb[24].mxu1 %v798_v13 }
  0xd8   : > { %935 = vmatprep.mubr.f32.mxu0 %v769_v14  ;;  %1015 = vmatprep.mubr.f32.mxu1 %v801_v15 }
  0xdb   : > { %936 = vmatmul.mubr.f32.gmra.mrb[26].mxu0 %v768_v16  ;;  %1016 = vmatmul.mubr.f32.gmra.mrb[26].mxu1 %v800_v17 }
  0xdc   : > { %940 = vmatprep.mubr.f32.mxu0 %v771_v18  ;;  %1020 = vmatprep.mubr.f32.mxu1 %v803_v19  ;;  %v717_v18 = vld [vmem:[#allocation2 + $0x38] sm:$0xff] }
  0xdd   : > { %v733_v19 = vld [vmem:[#allocation2 + $0xb8] sm:$0xff] }
  0xdf   : > { %941 = vmatmul.mubr.f32.gmra.mrb[28].mxu0 %v770_v20  ;;  %1021 = vmatmul.mubr.f32.gmra.mrb[28].mxu1 %v802_v21 }
  0xe0   : > { %945 = vmatprep.mubr.f32.mxu0 %v773_v22  ;;  %1025 = vmatprep.mubr.f32.mxu1 %v805_v23 }
  0xe3   : > { %946 = vmatmul.mubr.f32.gmra.mrb[30].mxu0 %v772_v3  ;;  %1026 = vmatmul.mubr.f32.gmra.mrb[30].mxu1 %v804_v24 }
 0x17a   : > { %v872_v26 = vpop.f32.mrb[0].mxu0  ;;  %v952_v27 = vpop.f32.mrb[0].mxu1 }
 0x17b   : > { %v1031_v28 = vadd.f32 %v872_v26, %v710_v25  ;;  %v1047_v29 = vadd.f32 %v952_v27, %v726_v7  ;;  %v874_v30 = vpop.f32.mrb[1].mxu0  ;;  %v954_v31 = vpop.f32.mrb[1].mxu1  ;;  %v718_v25 = vld [vmem:[#allocation2 + $0x40] sm:$0xff] }
 0x17c   : > { %v734_v7 = vld [vmem:[#allocation2 + $0xc0] sm:$0xff] }
 0x17d   : > { %1063 = vst [vmem:[#allocation2] sm:$0xff] %v1031_v28  ;;  %1079 = vst [vmem:[#allocation2 + $0x80] sm:$0xff] %v1047_v29 }
 0x17e   : > { %v877_v33 = vpop.f32.mrb[2].mxu0  ;;  %v957_v34 = vpop.f32.mrb[2].mxu1 }
 0x17f   : > { %v1032_v35 = vadd.f32 %v877_v33, %v711_v32  ;;  %v1048_v36 = vadd.f32 %v957_v34, %v727_v4  ;;  %v879_v37 = vpop.f32.mrb[3].mxu0  ;;  %v959_v38 = vpop.f32.mrb[3].mxu1  ;;  %v719_v32 = vld [vmem:[#allocation2 + $0x48] sm:$0xff] }
 0x180   : > { %v735_v4 = vld [vmem:[#allocation2 + $0xc8] sm:$0xff] }
 0x181   : > { %1064 = vst [vmem:[#allocation2 + $0x8] sm:$0xff] %v1032_v35  ;;  %1080 = vst [vmem:[#allocation2 + $0x88] sm:$0xff] %v1048_v36 }
 0x182   : > { %v882_v41 = vpop.f32.mrb[4].mxu0  ;;  %v962_v42 = vpop.f32.mrb[4].mxu1 }
 0x183   : > { %v1033_v43 = vadd.f32 %v882_v41, %v712_v39  ;;  %v1049_v44 = vadd.f32 %v962_v42, %v728_v40  ;;  %v884_v45 = vpop.f32.mrb[5].mxu0  ;;  %v964_v46 = vpop.f32.mrb[5].mxu1  ;;  %v720_v39 = vld [vmem:[#allocation2 + $0x50] sm:$0xff] }
 0x184   : > { %v736_v40 = vld [vmem:[#allocation2 + $0xd0] sm:$0xff] }
 0x185   : > { %1065 = vst [vmem:[#allocation2 + $0x10] sm:$0xff] %v1033_v43  ;;  %1081 = vst [vmem:[#allocation2 + $0x90] sm:$0xff] %v1049_v44 }
 0x186   : > { %v887_v49 = vpop.f32.mrb[6].mxu0  ;;  %v967_v50 = vpop.f32.mrb[6].mxu1 }
 0x187   : > { %v1034_v51 = vadd.f32 %v887_v49, %v713_v47  ;;  %v1050_v52 = vadd.f32 %v967_v50, %v729_v48  ;;  %v889_v53 = vpop.f32.mrb[7].mxu0  ;;  %v969_v54 = vpop.f32.mrb[7].mxu1  ;;  %v721_v47 = vld [vmem:[#allocation2 + $0x58] sm:$0xff] }
 0x188   : > { %v737_v48 = vld [vmem:[#allocation2 + $0xd8] sm:$0xff] }
 0x189   : > { %1066 = vst [vmem:[#allocation2 + $0x18] sm:$0xff] %v1034_v51  ;;  %1082 = vst [vmem:[#allocation2 + $0x98] sm:$0xff] %v1050_v52 }
 0x18a   : > { %v892_v57 = vpop.f32.mrb[8].mxu0  ;;  %v972_v58 = vpop.f32.mrb[8].mxu1 }
 0x18b   : > { %v1035_v59 = vadd.f32 %v892_v57, %v714_v55  ;;  %v1051_v60 = vadd.f32 %v972_v58, %v730_v56  ;;  %v894_v61 = vpop.f32.mrb[9].mxu0  ;;  %v974_v62 = vpop.f32.mrb[9].mxu1  ;;  %v722_v55 = vld [vmem:[#allocation2 + $0x60] sm:$0xff] }
 0x18c   : > { %v738_v56 = vld [vmem:[#allocation2 + $0xe0] sm:$0xff] }
 0x18d   : > { %1067 = vst [vmem:[#allocation2 + $0x20] sm:$0xff] %v1035_v59  ;;  %1083 = vst [vmem:[#allocation2 + $0xa0] sm:$0xff] %v1051_v60 }
 0x18e   : > { %v897_v1 = vpop.f32.mrb[10].mxu0  ;;  %v977_v2 = vpop.f32.mrb[10].mxu1 }
 0x18f   : > { %v1036_v5 = vadd.f32 %v897_v1, %v715_v63  ;;  %v1052_v6 = vadd.f32 %v977_v2, %v731_v0  ;;  %v899_v8 = vpop.f32.mrb[11].mxu0  ;;  %v979_v9 = vpop.f32.mrb[11].mxu1  ;;  %v723_v63 = vld [vmem:[#allocation2 + $0x68] sm:$0xff] }
 0x190   : > { %v739_v0 = vld [vmem:[#allocation2 + $0xe8] sm:$0xff] }
 0x191   : > { %1068 = vst [vmem:[#allocation2 + $0x28] sm:$0xff] %v1036_v5  ;;  %1084 = vst [vmem:[#allocation2 + $0xa8] sm:$0xff] %v1052_v6 }
 0x192   : > { %v902_v12 = vpop.f32.mrb[12].mxu0  ;;  %v982_v13 = vpop.f32.mrb[12].mxu1 }
 0x193   : > { %v1037_v14 = vadd.f32 %v902_v12, %v716_v10  ;;  %v1053_v15 = vadd.f32 %v982_v13, %v732_v11  ;;  %v904_v16 = vpop.f32.mrb[13].mxu0  ;;  %v984_v17 = vpop.f32.mrb[13].mxu1  ;;  %v724_v10 = vld [vmem:[#allocation2 + $0x70] sm:$0xff] }
 0x194   : > { %v740_v11 = vld [vmem:[#allocation2 + $0xf0] sm:$0xff] }
 0x195   : > { %1069 = vst [vmem:[#allocation2 + $0x30] sm:$0xff] %v1037_v14  ;;  %1085 = vst [vmem:[#allocation2 + $0xb0] sm:$0xff] %v1053_v15 }
 0x196   : > { %v907_v20 = vpop.f32.mrb[14].mxu0  ;;  %v987_v21 = vpop.f32.mrb[14].mxu1 }
 0x197   : > { %v1038_v22 = vadd.f32 %v907_v20, %v717_v18  ;;  %v1054_v23 = vadd.f32 %v987_v21, %v733_v19  ;;  %v909_v3 = vpop.f32.mrb[15].mxu0  ;;  %v989_v24 = vpop.f32.mrb[15].mxu1  ;;  %v725_v18 = vld [vmem:[#allocation2 + $0x78] sm:$0xff] }
 0x198   : > { %v741_v19 = vld [vmem:[#allocation2 + $0xf8] sm:$0xff] }
 0x199   : > { %1070 = vst [vmem:[#allocation2 + $0x38] sm:$0xff] %v1038_v22  ;;  %1086 = vst [vmem:[#allocation2 + $0xb8] sm:$0xff] %v1054_v23 }
 0x19a   : > { %v912_v26 = vpop.f32.mrb[16].mxu0  ;;  %v992_v27 = vpop.f32.mrb[16].mxu1 }
 0x19b   : > { %v1039_v28 = vadd.f32 %v912_v26, %v718_v25  ;;  %v1055_v29 = vadd.f32 %v992_v27, %v734_v7  ;;  %v914_v30 = vpop.f32.mrb[17].mxu0  ;;  %v994_v31 = vpop.f32.mrb[17].mxu1  ;;  %v1131_v25 = vld [vmem:[%s3596_s4] sm:$0xff] (!%p2024_p0)  ;;  %v1132_v7 = vld [vmem:[%s3596_s4 + $0x8] sm:$0xff] (!%p2024_p0)  ;;  %v1133_v26 = vld [vmem:[%s3596_s4 + $0x10] sm:$0xff] (!%p2024_p0) }
 0x19c   : > { %v2411_v27 = vpack.c.bf16 (!%p2024_p0), %v1132_v7, %v1131_v25  ;;  %v1135_v30 = vld [vmem:[%s3596_s4 + $0x20] sm:$0xff] (!%p2024_p0)  ;;  %v1136_v31 = vld [vmem:[%s3596_s4 + $0x28] sm:$0xff] (!%p2024_p0)  ;;  %v1118_v25 = vld [vmem:[#allocation2 + $0x98] sm:$0xff] (!%p2024_p0) }
 0x19d   : > { %1071 = vst [vmem:[#allocation2 + $0x40] sm:$0xff] %v1039_v28  ;;  %1087 = vst [vmem:[#allocation2 + $0xc0] sm:$0xff] %v1055_v29  ;;  %v1134_v28 = vld [vmem:[%s3596_s4 + $0x18] sm:$0xff] (!%p2024_p0)  ;;  %v1119_v7 = vld [vmem:[#allocation2 + $0xa0] sm:$0xff] (!%p2024_p0) }
 0x19e   : > { %v917_v33 = vpop.f32.mrb[18].mxu0  ;;  %v997_v34 = vpop.f32.mrb[18].mxu1  ;;  %v2415_v29 = vpack.c.bf16 (!%p2024_p0), %v1134_v28, %v1133_v26  ;;  %2412 = vmatprep.subr.bf16.mxu0 (!%p2024_p0), %v2411_v27  ;;  %v1120_v26 = vld [vmem:[#allocation2 + $0xa8] sm:$0xff] (!%p2024_p0) }
 0x19f   : > { %v1040_v35 = vadd.f32 %v917_v33, %v719_v32  ;;  %v1056_v36 = vadd.f32 %v997_v34, %v735_v4  ;;  %v919_v37 = vpop.f32.mrb[19].mxu0  ;;  %v999_v38 = vpop.f32.mrb[19].mxu1  ;;  %2414 = vmatpush3.bf16.msra.mxu0 (!%p2024_p0), %v2411_v27  ;;  %v2419_v32 = vpack.c.bf16 (!%p2024_p0), %v1136_v31, %v1135_v30  ;;  %v1099_v4 = vld [vmem:[#allocation2] sm:$0xff] (!%p2024_p0)  ;;  %v1137_v33 = vld [vmem:[%s3596_s4 + $0x30] sm:$0xff] (!%p2024_p0)  ;;  %v1138_v34 = vld [vmem:[%s3596_s4 + $0x38] sm:$0xff] (!%p2024_p0) }
 0x1a0   : > { %2416 = vmatprep.subr.bf16.mxu0 (!%p2024_p0), %v2415_v29  ;;  %2235 = vmatprep.mubr.f32.mxu0 (!%p2024_p0), %v1099_v4  ;;  %v1140_v37 = vld [vmem:[%s3596_s4 + $0x48] sm:$0xff] (!%p2024_p0)  ;;  %v1121_v27 = vld [vmem:[#allocation2 + $0xb0] sm:$0xff] (!%p2024_p0)  ;;  %v1122_v28 = vld [vmem:[#allocation2 + $0xb8] sm:$0xff] (!%p2024_p0) }
 0x1a1   : > { %1072 = vst [vmem:[#allocation2 + $0x48] sm:$0xff] %v1040_v35  ;;  %1088 = vst [vmem:[#allocation2 + $0xc8] sm:$0xff] %v1056_v36  ;;  %v2423_v35 = vpack.c.bf16 (!%p2024_p0), %v1138_v34, %v1137_v33  ;;  %v1139_v36 = vld [vmem:[%s3596_s4 + $0x40] sm:$0xff] (!%p2024_p0) }
 0x1a2   : > { %v922_v41 = vpop.f32.mrb[20].mxu0  ;;  %v1002_v42 = vpop.f32.mrb[20].mxu1  ;;  %v2427_v38 = vpack.c.bf16 (!%p2024_p0), %v1140_v37, %v1139_v36  ;;  %v1425_v36 = vld [vmem:[%s3598_s6 + $0x70] sm:$0xff] (!%p2024_p0)  ;;  %v1426_v37 = vld [vmem:[%s3598_s6 + $0x78] sm:$0xff] (!%p2024_p0) }
 0x1a3   : > { %v1041_v43 = vadd.f32 %v922_v41, %v720_v39  ;;  %v1057_v44 = vadd.f32 %v1002_v42, %v736_v40  ;;  %v924_v45 = vpop.f32.mrb[21].mxu0  ;;  %v1004_v46 = vpop.f32.mrb[21].mxu1  ;;  %2418 = vmatpush3.bf16.msra.mxu0 (!%p2024_p0), %v2415_v29  ;;  %v1141_v39 = vld [vmem:[%s3596_s4 + $0x50] sm:$0xff] (!%p2024_p0)  ;;  %v1142_v40 = vld [vmem:[%s3596_s4 + $0x58] sm:$0xff] (!%p2024_p0)  ;;  %v1411_v41 = vld [vmem:[%s3598_s6] sm:$0xff] (!%p2024_p0) }
 0x1a4   : > { %2420 = vmatprep.subr.bf16.mxu0 (!%p2024_p0), %v2419_v32  ;;  %v1412_v42 = vld [vmem:[%s3598_s6 + $0x8] sm:$0xff] (!%p2024_p0)  ;;  %v1143_v45 = vld [vmem:[%s3596_s4 + $0x60] sm:$0xff] (!%p2024_p0) }
 0x1a5   : > { %1073 = vst [vmem:[#allocation2 + $0x50] sm:$0xff] %v1041_v43  ;;  %1089 = vst [vmem:[#allocation2 + $0xd0] sm:$0xff] %v1057_v44  ;;  %v1413_v43 = vld [vmem:[%s3598_s6 + $0x10] sm:$0xff] (!%p2024_p0)  ;;  %v2431_v44 = vpack.c.bf16 (!%p2024_p0), %v1142_v40, %v1141_v39  ;;  %v2443_v46 = vpack.c.bf16 (!%p2024_p0), %v1412_v42, %v1411_v41  ;;  %v1123_v29 = vld [vmem:[#allocation2 + $0xc0] sm:$0xff] (!%p2024_p0) }
 0x1a6   : > { %v927_v49 = vpop.f32.mrb[22].mxu0  ;;  %v1007_v50 = vpop.f32.mrb[22].mxu1  ;;  %v3258_v39 = vld [vmem:[%s3597_s5] ss:$0 sm:$0xff] (!%p2024_p0) }
 0x1a7   : > { %v1042_v51 = vadd.f32 %v927_v49, %v721_v47  ;;  %v1058_v52 = vadd.f32 %v1007_v50, %v737_v48  ;;  %v929_v53 = vpop.f32.mrb[23].mxu0  ;;  %v1009_v54 = vpop.f32.mrb[23].mxu1  ;;  %2422 = vmatpush3.bf16.msra.mxu0 (!%p2024_p0), %v2419_v32  ;;  %v1414_v47 = vld [vmem:[%s3598_s6 + $0x18] sm:$0xff] (!%p2024_p0)  ;;  %v1144_v48 = vld [vmem:[%s3596_s4 + $0x68] sm:$0xff] (!%p2024_p0)  ;;  %v1415_v50 = vld [vmem:[%s3598_s6 + $0x20] sm:$0xff] (!%p2024_p0)  ;;  %2444 = vmatprep.subr.bf16.mxu1 (!%p2024_p0), %v2443_v46 }
 0x1a8   : > { %2424 = vmatprep.subr.bf16.mxu0 (!%p2024_p0), %v2423_v35  ;;  %v2447_v49 = vpack.c.bf16 (!%p2024_p0), %v1414_v47, %v1413_v43  ;;  %2446 = vmatpush3.bf16.msra.mxu1 (!%p2024_p0), %v2443_v46  ;;  %v1145_v53 = vld [vmem:[%s3596_s4 + $0x70] sm:$0xff] (!%p2024_p0)  ;;  %v1124_v30 = vld [vmem:[#allocation2 + $0xc8] sm:$0xff] (!%p2024_p0) }
 0x1a9   : > { %1074 = vst [vmem:[#allocation2 + $0x58] sm:$0xff] %v1042_v51  ;;  %1090 = vst [vmem:[#allocation2 + $0xd8] sm:$0xff] %v1058_v52  ;;  %v1416_v51 = vld [vmem:[%s3598_s6 + $0x28] sm:$0xff] (!%p2024_p0)  ;;  %v2435_v52 = vpack.c.bf16 (!%p2024_p0), %v1144_v48, %v1143_v45 }
 0x1aa   : > { %v932_v57 = vpop.f32.mrb[24].mxu0  ;;  %v1012_v58 = vpop.f32.mrb[24].mxu1  ;;  %2448 = vmatprep.subr.bf16.mxu1 (!%p2024_p0), %v2447_v49  ;;  %v2451_v54 = vpack.c.bf16 (!%p2024_p0), %v1416_v51, %v1415_v50 }
 0x1ab   : > { %v1043_v59 = vadd.f32 %v932_v57, %v722_v55  ;;  %v1059_v60 = vadd.f32 %v1012_v58, %v738_v56  ;;  %v934_v61 = vpop.f32.mrb[25].mxu0  ;;  %v1014_v62 = vpop.f32.mrb[25].mxu1  ;;  %2426 = vmatpush3.bf16.msra.mxu0 (!%p2024_p0), %v2423_v35  ;;  %v1146_v55 = vld [vmem:[%s3596_s4 + $0x78] sm:$0xff] (!%p2024_p0)  ;;  %v1417_v56 = vld [vmem:[%s3598_s6 + $0x30] sm:$0xff] (!%p2024_p0) }
 0x1ac   : > { %2428 = vmatprep.subr.bf16.mxu0 (!%p2024_p0), %v2427_v38  ;;  %v1418_v57 = vld [vmem:[%s3598_s6 + $0x38] sm:$0xff] (!%p2024_p0)  ;;  %2450 = vmatpush3.bf16.msra.mxu1 (!%p2024_p0), %v2447_v49  ;;  %v2439_v58 = vpack.c.bf16 (!%p2024_p0), %v1146_v55, %v1145_v53  ;;  %v1420_v61 = vld [vmem:[%s3598_s6 + $0x48] sm:$0xff] (!%p2024_p0)  ;;  %v1125_v31 = vld [vmem:[#allocation2 + $0xd0] sm:$0xff] (!%p2024_p0) }
 0x1ad   : > { %1075 = vst [vmem:[#allocation2 + $0x60] sm:$0xff] %v1043_v59  ;;  %1091 = vst [vmem:[#allocation2 + $0xe0] sm:$0xff] %v1059_v60  ;;  %2452 = vmatprep.subr.bf16.mxu1 (!%p2024_p0), %v2451_v54  ;;  %v2455_v59 = vpack.c.bf16 (!%p2024_p0), %v1418_v57, %v1417_v56  ;;  %v1419_v60 = vld [vmem:[%s3598_s6 + $0x40] sm:$0xff] (!%p2024_p0) }
 0x1ae   : > { %v937_v1 = vpop.f32.mrb[26].mxu0  ;;  %v1017_v2 = vpop.f32.mrb[26].mxu1  ;;  %v2459_v62 = vpack.c.bf16 (!%p2024_p0), %v1420_v61, %v1419_v60 }
 0x1af   : > { %v1044_v5 = vadd.f32 %v937_v1, %v723_v63  ;;  %v1060_v6 = vadd.f32 %v1017_v2, %v739_v0  ;;  %v939_v8 = vpop.f32.mrb[27].mxu0  ;;  %v1019_v9 = vpop.f32.mrb[27].mxu1  ;;  %2430 = vmatpush3.bf16.msra.mxu0 (!%p2024_p0), %v2427_v38  ;;  %v1421_v63 = vld [vmem:[%s3598_s6 + $0x50] sm:$0xff] (!%p2024_p0)  ;;  %v1422_v0 = vld [vmem:[%s3598_s6 + $0x58] sm:$0xff] (!%p2024_p0)  ;;  %v1100_v1 = vld [vmem:[#allocation2 + $0x8] sm:$0xff] (!%p2024_p0)  ;;  %v2471_v38 = vpack.c.bf16 (!%p2024_p0), %v1426_v37, %v1425_v36 }
 0x1b0   : > { %2432 = vmatprep.subr.bf16.mxu0 (!%p2024_p0), %v2431_v44  ;;  %2454 = vmatpush3.bf16.msra.mxu1 (!%p2024_p0), %v2451_v54  ;;  %v1101_v2 = vld [vmem:[#allocation2 + $0x10] sm:$0xff] (!%p2024_p0)  ;;  %v1424_v8 = vld [vmem:[%s3598_s6 + $0x68] sm:$0xff] (!%p2024_p0)  ;;  %v1102_v9 = vld [vmem:[#allocation2 + $0x18] sm:$0xff] (!%p2024_p0) }
 0x1b1   : > { %1076 = vst [vmem:[#allocation2 + $0x68] sm:$0xff] %v1044_v5  ;;  %1092 = vst [vmem:[#allocation2 + $0xe8] sm:$0xff] %v1060_v6  ;;  %2456 = vmatprep.subr.bf16.mxu1 (!%p2024_p0), %v2455_v59  ;;  %v2463_v5 = vpack.c.bf16 (!%p2024_p0), %v1422_v0, %v1421_v63  ;;  %v1423_v6 = vld [vmem:[%s3598_s6 + $0x60] sm:$0xff] (!%p2024_p0)  ;;  %v1126_v32 = vld [vmem:[#allocation2 + $0xd8] sm:$0xff] (!%p2024_p0) }
 0x1b2   : > { %v942_v12 = vpop.f32.mrb[28].mxu0  ;;  %v1022_v13 = vpop.f32.mrb[28].mxu1 }
 0x1b3   : > { %v1045_v14 = vadd.f32 %v942_v12, %v724_v10  ;;  %v1061_v15 = vadd.f32 %v1022_v13, %v740_v11  ;;  %v944_v16 = vpop.f32.mrb[29].mxu0  ;;  %v1024_v17 = vpop.f32.mrb[29].mxu1  ;;  %1098 = sbr.rel (%p2024_p0) target bundleno = 1165 (0x48d), region = 83  ;;  %2434 = vmatpush3.bf16.msra.mxu0 (!%p2024_p0), %v2431_v44  ;;  %v1103_v10 = vld [vmem:[#allocation2 + $0x20] sm:$0xff] (!%p2024_p0)  ;;  %v2467_v11 = vpack.c.bf16 (!%p2024_p0), %v1424_v8, %v1423_v6  ;;  %v1104_v12 = vld [vmem:[#allocation2 + $0x28] sm:$0xff] (!%p2024_p0)  ;;  %v1105_v13 = vld [vmem:[#allocation2 + $0x30] sm:$0xff] (!%p2024_p0) }
 0x1b4   : > { %2436 = vmatprep.subr.bf16.mxu0 (!%p2024_p0), %v2435_v52  ;;  %2458 = vmatpush3.bf16.msra.mxu1 (!%p2024_p0), %v2455_v59  ;;  %v1108_v16 = vld [vmem:[#allocation2 + $0x48] sm:$0xff] (!%p2024_p0)  ;;  %v1109_v17 = vld [vmem:[#allocation2 + $0x50] sm:$0xff] (!%p2024_p0)  ;;  %v1127_v4 = vld [vmem:[#allocation2 + $0xe0] sm:$0xff] (!%p2024_p0) }
 0x1b5   : > { %1077 = vst [vmem:[#allocation2 + $0x70] sm:$0xff] %v1045_v14  ;;  %1093 = vst [vmem:[#allocation2 + $0xf0] sm:$0xff] %v1061_v15  ;;  %2460 = vmatprep.subr.bf16.mxu1 (!%p2024_p0), %v2459_v62  ;;  %v1106_v14 = vld [vmem:[#allocation2 + $0x38] sm:$0xff] (!%p2024_p0)  ;;  %v1107_v15 = vld [vmem:[#allocation2 + $0x40] sm:$0xff] (!%p2024_p0) }
 0x1b6   : > { %v947_v20 = vpop.f32.mrb[30].mxu0  ;;  %v1027_v21 = vpop.f32.mrb[30].mxu1 }
 0x1b7   : > { %v1046_v22 = vadd.f32 %v947_v20, %v725_v18  ;;  %v1062_v23 = vadd.f32 %v1027_v21, %v741_v19  ;;  %v949_v3 = vpop.f32.mrb[31].mxu0  ;;  %v1029_v24 = vpop.f32.mrb[31].mxu1  ;;  %2438 = vmatpush3.bf16.msra.mxu0 (!%p2024_p0), %v2435_v52  ;;  %v1110_v18 = vld [vmem:[#allocation2 + $0x58] sm:$0xff] (!%p2024_p0)  ;;  %v1111_v19 = vld [vmem:[#allocation2 + $0x60] sm:$0xff] (!%p2024_p0) }
 0x1b8   : > { %2440 = vmatprep.subr.bf16.mxu0 (!%p2024_p0), %v2439_v58  ;;  %2462 = vmatpush3.bf16.msra.mxu1 (!%p2024_p0), %v2459_v62  ;;  %v1112_v20 = vld [vmem:[#allocation2 + $0x68] sm:$0xff] (!%p2024_p0)  ;;  %v1117_v24 = vld [vmem:[#allocation2 + $0x90] sm:$0xff] (!%p2024_p0) }
 0x1b9   : > { %1078 = vst [vmem:[#allocation2 + $0x78] sm:$0xff] %v1046_v22  ;;  %1094 = vst [vmem:[#allocation2 + $0xf8] sm:$0xff] %v1062_v23  ;;  %2464 = vmatprep.subr.bf16.mxu1 (!%p2024_p0), %v2463_v5  ;;  %v1115_v23 = vld [vmem:[#allocation2 + $0x80] sm:$0xff] (!%p2024_p0)  ;;  %v1116_v3 = vld [vmem:[#allocation2 + $0x88] sm:$0xff] (!%p2024_p0) }
 0x1ba   : > { %v1128_v33 = vld [vmem:[#allocation2 + $0xe8] sm:$0xff] }
 0x1bb   : > { %2442 = vmatpush3.bf16.msra.mxu0 %v2439_v58 }
 0x1bc   : > { %2466 = vmatpush3.bf16.msra.mxu1 %v2463_v5  ;;  %v1113_v21 = vld [vmem:[#allocation2 + $0x70] sm:$0xff] }
 0x1bd   : > { %2468 = vmatprep.subr.bf16.mxu1 %v2467_v11  ;;  %v1129_v34 = vld [vmem:[#allocation2 + $0xf0] sm:$0xff] }
 0x1be   : > { %2236 = vmatmul.mubr.f32.vlgmr.msra.gmra.mrb[0].mxu0 %v1100_v1 }
 0x1bf   : > { %2238 = vmatprep.mubr.f32.mxu0 %v1101_v2 }
 0x1c0   : > { %2470 = vmatpush3.bf16.msra.mxu1 %v2467_v11  ;;  %v1114_v22 = vld [vmem:[#allocation2 + $0x78] sm:$0xff] }
 0x1c1   : > { %v1130_v35 = vld [vmem:[#allocation2 + $0xf8] sm:$0xff]  ;;  %2472 = vmatprep.subr.bf16.mxu1 %v2471_v38 }
 0x1c2   : > { %2239 = vmatmul.mubr.f32.gmra.mrb[2].mxu0 %v1102_v9 }
 0x1c3   : > { %2241 = vmatprep.mubr.f32.mxu0 %v1103_v10 }
 0x1c4   : > { %2474 = vmatpush3.bf16.msra.mxu1 %v2471_v38 }
 0x1c6   : > { %2242 = vmatmul.mubr.f32.gmra.mrb[4].mxu0 %v1104_v12 }
 0x1c7   : > { %2244 = vmatprep.mubr.f32.mxu0 %v1105_v13 }
 0x1ca   : > { %2245 = vmatmul.mubr.f32.gmra.mrb[6].mxu0 %v1106_v14 }
 0x1cb   : > { %2247 = vmatprep.mubr.f32.mxu0 %v1107_v15 }
 0x1ce   : > { %2248 = vmatmul.mubr.f32.gmra.mrb[8].mxu0 %v1108_v16 }
 0x1cf   : > { %2250 = vmatprep.mubr.f32.mxu0 %v1109_v17 }
 0x1d2   : > { %2251 = vmatmul.mubr.f32.gmra.mrb[10].mxu0 %v1110_v18 }
 0x1d3   : > { %2253 = vmatprep.mubr.f32.mxu0 %v1111_v19 }
 0x1d6   : > { %2254 = vmatmul.mubr.f32.gmra.mrb[12].mxu0 %v1112_v20 }
 0x1d7   : > { %2256 = vmatprep.mubr.f32.mxu0 %v1113_v21 }
 0x1da   : > { %2257 = vmatmul.mubr.f32.gmra.mrb[14].mxu0 %v1114_v22 }
 0x1db   : > { %2259 = vmatprep.mubr.f32.mxu0 %v1115_v23 }
 0x1de   : > { %2260 = vmatmul.mubr.f32.gmra.mrb[16].mxu0 %v1116_v3 }
 0x1df   : > { %2262 = vmatprep.mubr.f32.mxu0 %v1117_v24 }
 0x1e2   : > { %2263 = vmatmul.mubr.f32.gmra.mrb[18].mxu0 %v1118_v25 }
 0x1e3   : > { %2265 = vmatprep.mubr.f32.mxu0 %v1119_v7 }
 0x1e6   : > { %2266 = vmatmul.mubr.f32.gmra.mrb[20].mxu0 %v1120_v26 }
 0x1e7   : > { %2268 = vmatprep.mubr.f32.mxu0 %v1121_v27 }
 0x1ea   : > { %2269 = vmatmul.mubr.f32.gmra.mrb[22].mxu0 %v1122_v28 }
 0x1eb   : > { %2271 = vmatprep.mubr.f32.mxu0 %v1123_v29 }
 0x1ee   : > { %2272 = vmatmul.mubr.f32.gmra.mrb[24].mxu0 %v1124_v30 }
 0x1ef   : > { %2274 = vmatprep.mubr.f32.mxu0 %v1125_v31 }
 0x1f2   : > { %2275 = vmatmul.mubr.f32.gmra.mrb[26].mxu0 %v1126_v32 }
 0x1f3   : > { %2277 = vmatprep.mubr.f32.mxu0 %v1127_v4 }
 0x1f6   : > { %2278 = vmatmul.mubr.f32.gmra.mrb[28].mxu0 %v1128_v33 }
 0x1f7   : > { %2280 = vmatprep.mubr.f32.mxu0 %v1129_v34 }
 0x1fa   : > { %2281 = vmatmul.mubr.f32.gmra.mrb[30].mxu0 %v1130_v35 }
 0x291   : > { %v2237_v40 = vpop.f32.mrb[0].mxu0 }
 0x292   : > { %v1226_v41 = vadd.f32 %v2237_v40, %v3258_v39  ;;  %v1220_v42 = vpop.f32.mrb[1].mxu0 }
 0x293   : > { %v1221_v43 = vadd.f32 %v3258_v39, %v1220_v42 }
 0x294   : > { %v1380_v46 = vmax.f32 %v1226_v41, 0.0 }
 0x295   : > { %v2240_v44 = vpop.f32.mrb[2].mxu0  ;;  %v1379_v45 = vmax.f32 %v1221_v43, 0.0 }
 0x296   : > { %v1236_v47 = vadd.f32 %v2240_v44, %v3258_v39  ;;  %v1230_v48 = vpop.f32.mrb[3].mxu0 }
 0x297   : > { %v1231_v49 = vadd.f32 %v3258_v39, %v1230_v48  ;;  %2315 = vmatprep.mubr.f32.mxu1 %v1379_v45 }
 0x298   : > { %2316 = vmatmul.mubr.f32.vlgmr.msra.gmra.mrb[0].mxu1 %v1380_v46  ;;  %v1382_v52 = vmax.f32 %v1236_v47, 0.0 }
 0x299   : > { %v1381_v50 = vmax.f32 %v1231_v49, 0.0  ;;  %v2243_v51 = vpop.f32.mrb[4].mxu0 }
 0x29a   : > { %v1246_v53 = vadd.f32 %v2243_v51, %v3258_v39  ;;  %v1240_v54 = vpop.f32.mrb[5].mxu0 }
 0x29b   : > { %v1241_v55 = vadd.f32 %v3258_v39, %v1240_v54  ;;  %2318 = vmatprep.mubr.f32.mxu1 %v1381_v50 }
 0x29c   : > { %2319 = vmatmul.mubr.f32.gmra.mrb[2].mxu1 %v1382_v52  ;;  %v1384_v58 = vmax.f32 %v1246_v53, 0.0 }
 0x29d   : > { %v1383_v56 = vmax.f32 %v1241_v55, 0.0  ;;  %v2246_v57 = vpop.f32.mrb[6].mxu0 }
 0x29e   : > { %v1256_v59 = vadd.f32 %v2246_v57, %v3258_v39  ;;  %v1250_v60 = vpop.f32.mrb[7].mxu0 }
 0x29f   : > { %v1251_v61 = vadd.f32 %v3258_v39, %v1250_v60  ;;  %2321 = vmatprep.mubr.f32.mxu1 %v1383_v56 }
 0x2a0   : > { %2322 = vmatmul.mubr.f32.gmra.mrb[4].mxu1 %v1384_v58  ;;  %v1386_v0 = vmax.f32 %v1256_v59, 0.0 }
 0x2a1   : > { %v1385_v62 = vmax.f32 %v1251_v61, 0.0  ;;  %v2249_v63 = vpop.f32.mrb[8].mxu0 }
 0x2a2   : > { %v1266_v1 = vadd.f32 %v2249_v63, %v3258_v39  ;;  %v1260_v2 = vpop.f32.mrb[9].mxu0 }
 0x2a3   : > { %v1261_v5 = vadd.f32 %v3258_v39, %v1260_v2  ;;  %2324 = vmatprep.mubr.f32.mxu1 %v1385_v62 }
 0x2a4   : > { %2325 = vmatmul.mubr.f32.gmra.mrb[6].mxu1 %v1386_v0  ;;  %v1388_v9 = vmax.f32 %v1266_v1, 0.0 }
 0x2a5   : > { %v1387_v6 = vmax.f32 %v1261_v5, 0.0  ;;  %v2252_v8 = vpop.f32.mrb[10].mxu0 }
 0x2a6   : > { %v1276_v10 = vadd.f32 %v2252_v8, %v3258_v39  ;;  %v1270_v11 = vpop.f32.mrb[11].mxu0 }
 0x2a7   : > { %v1271_v12 = vadd.f32 %v3258_v39, %v1270_v11  ;;  %2327 = vmatprep.mubr.f32.mxu1 %v1387_v6 }
 0x2a8   : > { %2328 = vmatmul.mubr.f32.gmra.mrb[8].mxu1 %v1388_v9  ;;  %v1390_v15 = vmax.f32 %v1276_v10, 0.0 }
 0x2a9   : > { %v1389_v13 = vmax.f32 %v1271_v12, 0.0  ;;  %v2255_v14 = vpop.f32.mrb[12].mxu0  ;;  %v1692_v12 = vlaneseq }
 0x2aa   : > { %v1286_v16 = vadd.f32 %v2255_v14, %v3258_v39  ;;  %v1280_v17 = vpop.f32.mrb[13].mxu0 }
 0x2ab   : > { %v1281_v18 = vadd.f32 %v3258_v39, %v1280_v17  ;;  %2330 = vmatprep.mubr.f32.mxu1 %v1389_v13  ;;  %v1693_v13 = vand.u32 127, %v1692_v12 }
 0x2ac   : > { %2331 = vmatmul.mubr.f32.gmra.mrb[10].mxu1 %v1390_v15  ;;  %v1392_v21 = vmax.f32 %v1286_v16, 0.0  ;;  %v1695_v15 = vstv %s2027_s18 }
 0x2ad   : > { %v1391_v19 = vmax.f32 %v1281_v18, 0.0  ;;  %v2258_v20 = vpop.f32.mrb[14].mxu0  ;;  %v1694_v14 = vadd.s32 128, %v1693_v13  ;;  %v1696_v17 = vadd.s32 %v1695_v15, %v1693_v13  ;;  %v3293_v18 = vshrl.u32 %v1692_v12, 7 }
 0x2ae   : > { %v1296_v22 = vadd.f32 %v2258_v20, %v3258_v39  ;;  %v1290_v23 = vpop.f32.mrb[15].mxu0 }
 0x2af   : > { %v1291_v3 = vadd.f32 %v3258_v39, %v1290_v23  ;;  %2333 = vmatprep.mubr.f32.mxu1 %v1391_v19  ;;  %v1697_v16 = vadd.s32 %v1695_v15, %v1694_v14  ;;  %vm1700_vm1 = vcmp.lt.s32.totalorder %v1696_v17, 300  ;;  %vm1709_vm2 = vcmp.eq.s32.totalorder %v3293_v18, 1 }
 0x2b0   : > { %2334 = vmatmul.mubr.f32.gmra.mrb[12].mxu1 %v1392_v21  ;;  %v1394_v7 = vmax.f32 %v1296_v22, 0.0  ;;  %vm1706_vm3 = vcmp.eq.s32.totalorder %v3293_v18, 0  ;;  %v3306_v21 = vld [vmem:[%s3599_s7] ss:$0 sm:$0xff] }
 0x2b1   : > { %v1393_v24 = vmax.f32 %v1291_v3, 0.0  ;;  %v2261_v25 = vpop.f32.mrb[16].mxu0  ;;  %vm1701_vm0 = vcmp.lt.s32.totalorder %v1697_v16, 300 }
 0x2b2   : > { %v1306_v26 = vadd.f32 %v2261_v25, %v3258_v39  ;;  %v1300_v27 = vpop.f32.mrb[17].mxu0 }
 0x2b3   : > { %v1301_v28 = vadd.f32 %v3258_v39, %v1300_v27  ;;  %2336 = vmatprep.mubr.f32.mxu1 %v1393_v24 }
 0x2b4   : > { %2337 = vmatmul.mubr.f32.gmra.mrb[14].mxu1 %v1394_v7  ;;  %v1396_v31 = vmax.f32 %v1306_v26, 0.0 }
 0x2b5   : > { %v1395_v29 = vmax.f32 %v1301_v28, 0.0  ;;  %v2264_v30 = vpop.f32.mrb[18].mxu0 }
 0x2b6   : > { %v1316_v32 = vadd.f32 %v2264_v30, %v3258_v39  ;;  %v1310_v4 = vpop.f32.mrb[19].mxu0 }
 0x2b7   : > { %v1311_v33 = vadd.f32 %v3258_v39, %v1310_v4  ;;  %2339 = vmatprep.mubr.f32.mxu1 %v1395_v29 }
 0x2b8   : > { %2340 = vmatmul.mubr.f32.gmra.mrb[16].mxu1 %v1396_v31  ;;  %v1398_v36 = vmax.f32 %v1316_v32, 0.0 }
 0x2b9   : > { %v1397_v34 = vmax.f32 %v1311_v33, 0.0  ;;  %v2267_v35 = vpop.f32.mrb[20].mxu0 }
 0x2ba   : > { %v1326_v37 = vadd.f32 %v2267_v35, %v3258_v39  ;;  %v1320_v38 = vpop.f32.mrb[21].mxu0 }
 0x2bb   : > { %v1321_v40 = vadd.f32 %v3258_v39, %v1320_v38  ;;  %2342 = vmatprep.mubr.f32.mxu1 %v1397_v34 }
 0x2bc   : > { %2343 = vmatmul.mubr.f32.gmra.mrb[18].mxu1 %v1398_v36  ;;  %v1400_v43 = vmax.f32 %v1326_v37, 0.0 }
 0x2bd   : > { %v1399_v41 = vmax.f32 %v1321_v40, 0.0  ;;  %v2270_v42 = vpop.f32.mrb[22].mxu0 }
 0x2be   : > { %v1336_v44 = vadd.f32 %v2270_v42, %v3258_v39  ;;  %v1330_v45 = vpop.f32.mrb[23].mxu0 }
 0x2bf   : > { %v1331_v46 = vadd.f32 %v3258_v39, %v1330_v45  ;;  %2345 = vmatprep.mubr.f32.mxu1 %v1399_v41 }
 0x2c0   : > { %2346 = vmatmul.mubr.f32.gmra.mrb[20].mxu1 %v1400_v43  ;;  %v1402_v49 = vmax.f32 %v1336_v44, 0.0 }
 0x2c1   : > { %v1401_v47 = vmax.f32 %v1331_v46, 0.0  ;;  %v2273_v48 = vpop.f32.mrb[24].mxu0 }
 0x2c2   : > { %v1346_v50 = vadd.f32 %v2273_v48, %v3258_v39  ;;  %v1340_v51 = vpop.f32.mrb[25].mxu0 }
 0x2c3   : > { %v1341_v52 = vadd.f32 %v3258_v39, %v1340_v51  ;;  %2348 = vmatprep.mubr.f32.mxu1 %v1401_v47 }
 0x2c4   : > { %2349 = vmatmul.mubr.f32.gmra.mrb[22].mxu1 %v1402_v49  ;;  %v1404_v55 = vmax.f32 %v1346_v50, 0.0 }
 0x2c5   : > { %v1403_v53 = vmax.f32 %v1341_v52, 0.0  ;;  %v2276_v54 = vpop.f32.mrb[26].mxu0 }
 0x2c6   : > { %v1356_v56 = vadd.f32 %v2276_v54, %v3258_v39  ;;  %v1350_v57 = vpop.f32.mrb[27].mxu0 }
 0x2c7   : > { %v1351_v58 = vadd.f32 %v3258_v39, %v1350_v57  ;;  %2351 = vmatprep.mubr.f32.mxu1 %v1403_v53 }
 0x2c8   : > { %2352 = vmatmul.mubr.f32.gmra.mrb[24].mxu1 %v1404_v55  ;;  %v1406_v61 = vmax.f32 %v1356_v56, 0.0 }
 0x2c9   : > { %v1405_v59 = vmax.f32 %v1351_v58, 0.0  ;;  %v2279_v60 = vpop.f32.mrb[28].mxu0 }
 0x2ca   : > { %v1366_v62 = vadd.f32 %v2279_v60, %v3258_v39  ;;  %v1360_v63 = vpop.f32.mrb[29].mxu0 }
 0x2cb   : > { %v1361_v0 = vadd.f32 %v3258_v39, %v1360_v63  ;;  %2354 = vmatprep.mubr.f32.mxu1 %v1405_v59 }
 0x2cc   : > { %2355 = vmatmul.mubr.f32.gmra.mrb[26].mxu1 %v1406_v61  ;;  %v1408_v5 = vmax.f32 %v1366_v62, 0.0 }
 0x2cd   : > { %v1407_v1 = vmax.f32 %v1361_v0, 0.0  ;;  %v2282_v2 = vpop.f32.mrb[30].mxu0 }
 0x2ce   : > { %v1376_v6 = vadd.f32 %v2282_v2, %v3258_v39  ;;  %v1370_v8 = vpop.f32.mrb[31].mxu0 }
 0x2cf   : > { %v1371_v9 = vadd.f32 %v3258_v39, %v1370_v8  ;;  %2357 = vmatprep.mubr.f32.mxu1 %v1407_v1  ;;  %v2688_v39 = vmov 0.0  }
 0x2d0   : > { %2358 = vmatmul.mubr.f32.gmra.mrb[28].mxu1 %v1408_v5  ;;  %v1410_v11 = vmax.f32 %v1376_v6, 0.0  ;;  %v2029_v19 = vsel %vm1701_vm0, 1.0, %v2688_v39  ;;  %v3297_v20 = vsel %vm1700_vm1, 1.0, %v2688_v39 }
 0x2d1   : > { %v1409_v10 = vmax.f32 %v1371_v9, 0.0  ;;  %2030 = vmatprep.mubr.msk.f32.mxu0 %vm1709_vm2, %v2029_v19 }
 0x2d3   : > { %2360 = vmatprep.mubr.f32.mxu1 %v1409_v10 }
 0x2d4   : > { %2361 = vmatmul.mubr.f32.gmra.mrb[30].mxu1 %v1410_v11 }
 0x2d5   : > { %2032 = vmatprep.mubr.msk.f32.mxu1 %vm1706_vm3, %v2029_v19 }
 0x36b   : > { %v2317_v22 = vpop.f32.mrb[0].mxu1 }
 0x36c   : > { %v3309_v23 = vadd.f32 %v2317_v22, %v3306_v21  ;;  %v1500_v3 = vpop.f32.mrb[1].mxu1 }
 0x36d   : > { %v3312_v24 = vadd.f32 %v3306_v21, %v1500_v3 }
 0x36e   : > { %1660 = vst [vmem:[%s2946_s30 + $0x8] sm:$0xff] %v3309_v23  ;;  %v3318_v25 = vmul.f32 %v3309_v23, %v3309_v23 }
 0x36f   : > { %1659 = vst [vmem:[%s2946_s30] sm:$0xff] %v3312_v24  ;;  %v3324_v7 = vmul.f32 %v3312_v24, %v3312_v24  ;;  %v2509_v26 = vpack.c.bf16 %v3309_v23, %v3312_v24  ;;  %v2320_v27 = vpop.f32.mrb[2].mxu1 }
 0x370   : > { %v3329_v28 = vadd.f32 %v2320_v27, %v3306_v21  ;;  %v1510_v29 = vpop.f32.mrb[3].mxu1 }
 0x371   : > { %v2477_v30 = vpack.c.bf16 %v3318_v25, %v3324_v7  ;;  %v3334_v31 = vadd.f32 %v3306_v21, %v1510_v29 }
 0x372   : > { %1662 = vst [vmem:[%s2946_s30 + $0x18] sm:$0xff] %v3329_v28  ;;  %v3340_v32 = vmul.f32 %v3329_v28, %v3329_v28 }
 0x373   : > { %1661 = vst [vmem:[%s2946_s30 + $0x10] sm:$0xff] %v3334_v31  ;;  %v3346_v4 = vmul.f32 %v3334_v31, %v3334_v31  ;;  %v2513_v33 = vpack.c.bf16 %v3329_v28, %v3334_v31  ;;  %v2323_v34 = vpop.f32.mrb[4].mxu1 }
 0x374   : > { %v3351_v35 = vadd.f32 %v2323_v34, %v3306_v21  ;;  %v1520_v36 = vpop.f32.mrb[5].mxu1 }
 0x375   : > { %v2481_v37 = vpack.c.bf16 %v3340_v32, %v3346_v4  ;;  %v3356_v38 = vadd.f32 %v3306_v21, %v1520_v36 }
 0x376   : > { %1664 = vst [vmem:[%s2946_s30 + $0x28] sm:$0xff] %v3351_v35  ;;  %v3362_v40 = vmul.f32 %v3351_v35, %v3351_v35 }
 0x377   : > { %1663 = vst [vmem:[%s2946_s30 + $0x20] sm:$0xff] %v3356_v38  ;;  %v3368_v41 = vmul.f32 %v3356_v38, %v3356_v38  ;;  %v2517_v42 = vpack.c.bf16 %v3351_v35, %v3356_v38  ;;  %v2326_v43 = vpop.f32.mrb[6].mxu1 }
 0x378   : > { %v3373_v44 = vadd.f32 %v2326_v43, %v3306_v21  ;;  %v1530_v45 = vpop.f32.mrb[7].mxu1 }
 0x379   : > { %v2485_v46 = vpack.c.bf16 %v3362_v40, %v3368_v41  ;;  %v3378_v47 = vadd.f32 %v3306_v21, %v1530_v45 }
 0x37a   : > { %1666 = vst [vmem:[%s2946_s30 + $0x38] sm:$0xff] %v3373_v44  ;;  %v3384_v48 = vmul.f32 %v3373_v44, %v3373_v44 }
 0x37b   : > { %1665 = vst [vmem:[%s2946_s30 + $0x30] sm:$0xff] %v3378_v47  ;;  %v3390_v49 = vmul.f32 %v3378_v47, %v3378_v47  ;;  %v2521_v50 = vpack.c.bf16 %v3373_v44, %v3378_v47  ;;  %v2329_v51 = vpop.f32.mrb[8].mxu1 }
 0x37c   : > { %v3395_v52 = vadd.f32 %v2329_v51, %v3306_v21  ;;  %v1540_v53 = vpop.f32.mrb[9].mxu1 }
 0x37d   : > { %v2489_v54 = vpack.c.bf16 %v3384_v48, %v3390_v49  ;;  %v3400_v55 = vadd.f32 %v3306_v21, %v1540_v53 }
 0x37e   : > { %1668 = vst [vmem:[%s2946_s30 + $0x48] sm:$0xff] %v3395_v52  ;;  %v3406_v56 = vmul.f32 %v3395_v52, %v3395_v52 }
 0x37f   : > { %1667 = vst [vmem:[%s2946_s30 + $0x40] sm:$0xff] %v3400_v55  ;;  %v3412_v57 = vmul.f32 %v3400_v55, %v3400_v55  ;;  %v2525_v58 = vpack.c.bf16 %v3395_v52, %v3400_v55  ;;  %v2332_v59 = vpop.f32.mrb[10].mxu1 }
 0x380   : > { %v3417_v60 = vadd.f32 %v2332_v59, %v3306_v21  ;;  %v1550_v61 = vpop.f32.mrb[11].mxu1 }
 0x381   : > { %v2493_v62 = vpack.c.bf16 %v3406_v56, %v3412_v57  ;;  %v3422_v63 = vadd.f32 %v3306_v21, %v1550_v61 }
 0x382   : > { %1670 = vst [vmem:[%s2946_s30 + $0x58] sm:$0xff] %v3417_v60  ;;  %v3428_v0 = vmul.f32 %v3417_v60, %v3417_v60 }
 0x383   : > { %1669 = vst [vmem:[%s2946_s30 + $0x50] sm:$0xff] %v3422_v63  ;;  %v3434_v1 = vmul.f32 %v3422_v63, %v3422_v63  ;;  %v2529_v2 = vpack.c.bf16 %v3417_v60, %v3422_v63  ;;  %v2335_v5 = vpop.f32.mrb[12].mxu1 }
 0x384   : > { %v3439_v6 = vadd.f32 %v2335_v5, %v3306_v21  ;;  %v1560_v8 = vpop.f32.mrb[13].mxu1 }
 0x385   : > { %v2497_v9 = vpack.c.bf16 %v3428_v0, %v3434_v1  ;;  %v3444_v10 = vadd.f32 %v3306_v21, %v1560_v8 }
 0x386   : > { %1672 = vst [vmem:[%s2946_s30 + $0x68] sm:$0xff] %v3439_v6  ;;  %v3450_v11 = vmul.f32 %v3439_v6, %v3439_v6 }
 0x387   : > { %1671 = vst [vmem:[%s2946_s30 + $0x60] sm:$0xff] %v3444_v10  ;;  %v3456_v12 = vmul.f32 %v3444_v10, %v3444_v10  ;;  %v2533_v13 = vpack.c.bf16 %v3439_v6, %v3444_v10  ;;  %v2338_v14 = vpop.f32.mrb[14].mxu1 }
 0x388   : > { %v3461_v15 = vadd.f32 %v2338_v14, %v3306_v21  ;;  %v1570_v16 = vpop.f32.mrb[15].mxu1 }
 0x389   : > { %v2501_v17 = vpack.c.bf16 %v3450_v11, %v3456_v12  ;;  %v3466_v39 = vadd.f32 %v3306_v21, %v1570_v16 }
 0x38a   : > { %1674 = vst [vmem:[%s2946_s30 + $0x78] sm:$0xff] %v3461_v15  ;;  %v3472_v19 = vmul.f32 %v3461_v15, %v3461_v15 }
 0x38b   : > { %1673 = vst [vmem:[%s2946_s30 + $0x70] sm:$0xff] %v3466_v39  ;;  %v3478_v22 = vmul.f32 %v3466_v39, %v3466_v39  ;;  %v2537_v3 = vpack.c.bf16 %v3461_v15, %v3466_v39  ;;  %v2341_v27 = vpop.f32.mrb[16].mxu1 }
 0x38c   : > { %v1586_v29 = vadd.f32 %v2341_v27, %v3306_v21  ;;  %v1580_v34 = vpop.f32.mrb[17].mxu1 }
 0x38d   : > { %v2505_v36 = vpack.c.bf16 %v3472_v19, %v3478_v22  ;;  %v1581_v43 = vadd.f32 %v3306_v21, %v1580_v34 }
 0x38e   : > { %1676 = vst [vmem:[%s2946_s30 + $0x88] sm:$0xff] %v1586_v29  ;;  %v1729_v45 = vmul.f32 %v1586_v29, %v1586_v29 }
 0x38f   : > { %1675 = vst [vmem:[%s2946_s30 + $0x80] sm:$0xff] %v1581_v43  ;;  %v1728_v51 = vmul.f32 %v1581_v43, %v1581_v43  ;;  %v2344_v53 = vpop.f32.mrb[18].mxu1  ;;  %v2507_v59 = vpack.c.bf16 %v1586_v29, %v1581_v43 }
 0x390   : > { %v1596_v61 = vadd.f32 %v2344_v53, %v3306_v21  ;;  %v1590_v5 = vpop.f32.mrb[19].mxu1 }
 0x391   : > { %v1591_v8 = vadd.f32 %v3306_v21, %v1590_v5  ;;  %2508 = vmatprep.subr.bf16.mxu1 %v2507_v59  ;;  %v2475_v14 = vpack.c.bf16 %v1729_v45, %v1728_v51 }
 0x392   : > { %1678 = vst [vmem:[%s2946_s30 + $0x98] sm:$0xff] %v1596_v61  ;;  %v1731_v16 = vmul.f32 %v1596_v61, %v1596_v61  ;;  %2510 = vmatpush3.bf16.msra.mxu1 %v2509_v26 }
 0x393   : > { %1677 = vst [vmem:[%s2946_s30 + $0x90] sm:$0xff] %v1591_v8  ;;  %v1730_v27 = vmul.f32 %v1591_v8, %v1591_v8  ;;  %v2347_v34 = vpop.f32.mrb[20].mxu1  ;;  %2476 = vmatprep.subr.bf16.mxu0 %v2475_v14  ;;  %v2511_v29 = vpack.c.bf16 %v1596_v61, %v1591_v8 }
 0x394   : > { %v1606_v43 = vadd.f32 %v2347_v34, %v3306_v21  ;;  %v1600_v53 = vpop.f32.mrb[21].mxu1  ;;  %2478 = vmatpush3.bf16.msra.mxu0 %v2477_v30 }
 0x395   : > { %v1601_v45 = vadd.f32 %v3306_v21, %v1600_v53  ;;  %2512 = vmatprep.subr.bf16.mxu1 %v2511_v29  ;;  %v2479_v51 = vpack.c.bf16 %v1731_v16, %v1730_v27 }
 0x396   : > { %1680 = vst [vmem:[%s2946_s30 + $0xa8] sm:$0xff] %v1606_v43  ;;  %v1733_v23 = vmul.f32 %v1606_v43, %v1606_v43  ;;  %2514 = vmatpush3.bf16.msra.mxu1 %v2513_v33 }
 0x397   : > { %1679 = vst [vmem:[%s2946_s30 + $0xa0] sm:$0xff] %v1601_v45  ;;  %v1732_v24 = vmul.f32 %v1601_v45, %v1601_v45  ;;  %v2350_v26 = vpop.f32.mrb[22].mxu1  ;;  %2480 = vmatprep.subr.bf16.mxu0 %v2479_v51  ;;  %v2515_v59 = vpack.c.bf16 %v1606_v43, %v1601_v45 }
 0x398   : > { %v1616_v25 = vadd.f32 %v2350_v26, %v3306_v21  ;;  %v1610_v7 = vpop.f32.mrb[23].mxu1  ;;  %2482 = vmatpush3.bf16.msra.mxu0 %v2481_v37 }
 0x399   : > { %v1611_v30 = vadd.f32 %v3306_v21, %v1610_v7  ;;  %2516 = vmatprep.subr.bf16.mxu1 %v2515_v59  ;;  %v2483_v61 = vpack.c.bf16 %v1733_v23, %v1732_v24 }
 0x39a   : > { %1682 = vst [vmem:[%s2946_s30 + $0xb8] sm:$0xff] %v1616_v25  ;;  %v1735_v28 = vmul.f32 %v1616_v25, %v1616_v25  ;;  %2518 = vmatpush3.bf16.msra.mxu1 %v2517_v42 }
 0x39b   : > { %1681 = vst [vmem:[%s2946_s30 + $0xb0] sm:$0xff] %v1611_v30  ;;  %v1734_v31 = vmul.f32 %v1611_v30, %v1611_v30  ;;  %v2353_v33 = vpop.f32.mrb[24].mxu1  ;;  %2484 = vmatprep.subr.bf16.mxu0 %v2483_v61  ;;  %v2519_v5 = vpack.c.bf16 %v1616_v25, %v1611_v30 }
 0x39c   : > { %v1626_v32 = vadd.f32 %v2353_v33, %v3306_v21  ;;  %v1620_v4 = vpop.f32.mrb[25].mxu1  ;;  %2486 = vmatpush3.bf16.msra.mxu0 %v2485_v46 }
 0x39d   : > { %v1621_v37 = vadd.f32 %v3306_v21, %v1620_v4  ;;  %2520 = vmatprep.subr.bf16.mxu1 %v2519_v5  ;;  %v2487_v8 = vpack.c.bf16 %v1735_v28, %v1734_v31 }
 0x39e   : > { %1684 = vst [vmem:[%s2946_s30 + $0xc8] sm:$0xff] %v1626_v32  ;;  %v1737_v35 = vmul.f32 %v1626_v32, %v1626_v32  ;;  %2522 = vmatpush3.bf16.msra.mxu1 %v2521_v50 }
 0x39f   : > { %1683 = vst [vmem:[%s2946_s30 + $0xc0] sm:$0xff] %v1621_v37  ;;  %v1736_v38 = vmul.f32 %v1621_v37, %v1621_v37  ;;  %v2356_v42 = vpop.f32.mrb[26].mxu1  ;;  %2488 = vmatprep.subr.bf16.mxu0 %v2487_v8  ;;  %v2523_v14 = vpack.c.bf16 %v1626_v32, %v1621_v37 }
 0x3a0   : > { %v1636_v40 = vadd.f32 %v2356_v42, %v3306_v21  ;;  %v1630_v41 = vpop.f32.mrb[27].mxu1  ;;  %2490 = vmatpush3.bf16.msra.mxu0 %v2489_v54 }
 0x3a1   : > { %v1631_v46 = vadd.f32 %v3306_v21, %v1630_v41  ;;  %2524 = vmatprep.subr.bf16.mxu1 %v2523_v14  ;;  %v2491_v16 = vpack.c.bf16 %v1737_v35, %v1736_v38 }
 0x3a2   : > { %1686 = vst [vmem:[%s2946_s30 + $0xd8] sm:$0xff] %v1636_v40  ;;  %v1739_v44 = vmul.f32 %v1636_v40, %v1636_v40  ;;  %2526 = vmatpush3.bf16.msra.mxu1 %v2525_v58 }
 0x3a3   : > { %1685 = vst [vmem:[%s2946_s30 + $0xd0] sm:$0xff] %v1631_v46  ;;  %v1738_v47 = vmul.f32 %v1631_v46, %v1631_v46  ;;  %v2359_v50 = vpop.f32.mrb[28].mxu1  ;;  %2492 = vmatprep.subr.bf16.mxu0 %v2491_v16  ;;  %v2527_v27 = vpack.c.bf16 %v1636_v40, %v1631_v46 }
 0x3a4   : > { %v1646_v48 = vadd.f32 %v2359_v50, %v3306_v21  ;;  %v1640_v49 = vpop.f32.mrb[29].mxu1  ;;  %2494 = vmatpush3.bf16.msra.mxu0 %v2493_v62 }
 0x3a5   : > { %v1641_v54 = vadd.f32 %v3306_v21, %v1640_v49  ;;  %2528 = vmatprep.subr.bf16.mxu1 %v2527_v27  ;;  %v2495_v34 = vpack.c.bf16 %v1739_v44, %v1738_v47 }
 0x3a6   : > { %1688 = vst [vmem:[%s2946_s30 + $0xe8] sm:$0xff] %v1646_v48  ;;  %v1741_v52 = vmul.f32 %v1646_v48, %v1646_v48  ;;  %2530 = vmatpush3.bf16.msra.mxu1 %v2529_v2 }
 0x3a7   : > { %1687 = vst [vmem:[%s2946_s30 + $0xe0] sm:$0xff] %v1641_v54  ;;  %v1740_v55 = vmul.f32 %v1641_v54, %v1641_v54  ;;  %v2362_v58 = vpop.f32.mrb[30].mxu1  ;;  %2496 = vmatprep.subr.bf16.mxu0 %v2495_v34  ;;  %v2531_v29 = vpack.c.bf16 %v1646_v48, %v1641_v54 }
 0x3a8   : > { %v1656_v56 = vadd.f32 %v2362_v58, %v3306_v21  ;;  %v1650_v57 = vpop.f32.mrb[31].mxu1  ;;  %2498 = vmatpush3.bf16.msra.mxu0 %v2497_v9 }
 0x3a9   : > { %v1651_v62 = vadd.f32 %v3306_v21, %v1650_v57  ;;  %2532 = vmatprep.subr.bf16.mxu1 %v2531_v29  ;;  %v2499_v43 = vpack.c.bf16 %v1741_v52, %v1740_v55 }
 0x3aa   : > { %1690 = vst [vmem:[%s2946_s30 + $0xf8] sm:$0xff] %v1656_v56  ;;  %v1743_v60 = vmul.f32 %v1656_v56, %v1656_v56  ;;  %2534 = vmatpush3.bf16.msra.mxu1 %v2533_v13 }
 0x3ab   : > { %1689 = vst [vmem:[%s2946_s30 + $0xf0] sm:$0xff] %v1651_v62  ;;  %v1742_v63 = vmul.f32 %v1651_v62, %v1651_v62  ;;  %2500 = vmatprep.subr.bf16.mxu0 %v2499_v43  ;;  %v2535_v2 = vpack.c.bf16 %v1656_v56, %v1651_v62 }
 0x3ac   : > { %2502 = vmatpush3.bf16.msra.mxu0 %v2501_v17 }
 0x3ad   : > { %2536 = vmatprep.subr.bf16.mxu1 %v2535_v2  ;;  %v2503_v0 = vpack.c.bf16 %v1743_v60, %v1742_v63 }
 0x3ae   : > { %2538 = vmatpush3.bf16.msra.mxu1 %v2537_v3 }
 0x3af   : > { %2504 = vmatprep.subr.bf16.mxu0 %v2503_v0 }
 0x3b0   : > { %2506 = vmatpush3.bf16.msra.mxu0 %v2505_v36 }
 0x3b1   : > { %2033 = vmatmul.mubr.msk.f32.vlgmr.msra.gmra.mrb[32].mxu1 %vm1706_vm3, %v3297_v20 }
 0x3b3   : > { %2031 = vmatmul.mubr.msk.f32.vlgmr.msra.gmra.mrb[32].mxu0 %vm1709_vm2, %v3297_v20 }
 0x484   : > { %v2200_v21 = vpop.f32.mrb[32].mxu1 }
 0x485   : > { %v2201_v1 = vpop.f32.mrb[33].mxu1 }
 0x486   : > { %v2165_v6 = vpop.f32.mrb[32].mxu0  ;;  %v2202_v9 = vadd.f32 %v2201_v1, %v2200_v21 }
 0x487   : > { %v2166_v10 = vpop.f32.mrb[33].mxu0 }
 0x488   : > { %v2167_v11 = vadd.f32 %v2166_v10, %v2165_v6 }
 0x48a   : > { %v1881_v12 = vadd.f32 %v2202_v9, %v2167_v11 }
 0x48c   : > { %1884 = vst [vmem:[%s2951_s14] sm:$0xff] %v1881_v12 }
 0x48d PF: > { %s20_s15 = sadd.s32 1, %s2684_s15   ;;  %s3610_s12 = sld [smem:[#allocation4_spill]] }
 0x48e   : > { %p17_p1 = scmp.ge.s32.totalorder %s20_s15, 6   ;;  %s3611_s17 = sld [smem:[#allocation5_spill]] }
 0x48f   : > { %s3612_s14 = sld [smem:[#allocation6_spill]]  ;;  %s3613_s30 = smov %s2664_s10 }
 0x490   : > { %s3614_s10 = smov %s2790_s22  ;;  %s3615_s11 = smov %s2676_s13 }
 0x491   :  { %19 = sbr.rel (!%p17_p1) target bundleno = 6 (0x6), region = 133 }
 0x494   : > { %s3616_s13 = smov %s3611_s17 }

</bundles_post_ra>
